<compile_context>
chip_gen: v7x
topology: tpu7x:2x2x1
jax: 0.10.0
libtpu: 0.0.40
codegen_flags: <defaults>
</compile_context>

<pallas_src>
import functools

import jax
import jax.numpy as jnp
import numpy as np
from jax.experimental import pallas as pl
from jax.experimental.pallas import tpu as pltpu

# ----------------------------- configuration (small synthetic sizes) -------------
DIM_REP = 64          # dim_rep (512 in the original, scaled down)
DIFF_DIM = 128        # diff_dim (hard-coded 128 in the module)
NUM_JOINTS = 17       # num_joints
PARAM_POSE_DIM = 24 * 6
HEADS_PAD = 256       # fused pose+shape head output padded to 2*128 lanes
NUM_VERTS = 640       # SMPL vertex count (6890 in reality); padded to 128 lanes below
MESH_IN = NUM_VERTS * 3 // 15   # stands in for the hard-coded 1378 of the real mesh
BLEND_K_PAD = 224     # 10 (betas) + 207 (pose feature) padded to a clean K
SMPL_PARENTS = [-1, 0, 0, 0, 1, 2, 3, 4, 5, 6, 7, 8, 9, 9, 9,
                12, 13, 14, 16, 17, 18, 19, 20, 21]

# Lane-tile caps for the V-tiled kernels.  Per generation at real SMPL sizes:
#   v7x: ~1024-2048 (64 MiB VMEM/TC, keep grid length >= 2 for both TCs)
#   v6e: 2048-4096 (128 MiB VMEM), v5e: ~1024-2048 (consider pl.Buffered(3) on
#   the weight stream if xprof shows exposed DMA).
BLEND_LANE_CAP = 2048
SKIN_LANE_CAP = 1024
_TILED_VMEM_LIMIT = 48 * 1024 * 1024   # <= v7x scoped headroom; fine on v5e/v6e


def _lane_tile(total, cap, min_tiles=2):
    """Largest multiple of 128 dividing `total`, <= cap, preferring >= min_tiles tiles."""
    cands = [t for t in range(128, min(cap, total) + 1, 128) if total % t == 0]
    if not cands:
        return total
    multi = [t for t in cands if total // t >= min_tiles]
    return max(multi) if multi else max(cands)


def _compute_levels(parents):
    depth = [0] * len(parents)
    for i in range(1, len(parents)):
        depth[i] = depth[parents[i]] + 1
    levels = {}
    for i, d in enumerate(depth):
        levels.setdefault(d, []).append(i)
    return [levels[d] for d in sorted(levels)]


SMPL_LEVELS = _compute_levels(SMPL_PARENTS)


# ----------------------------- Pallas kernels ------------------------------------
def _gelu_tanh(x):
    # TODO(synk): nn.GELU uses the exact erf form; tanh approximation used here for
    # a safe Mosaic lowering.
    return 0.5 * x * (1.0 + jnp.tanh(0.7978845608028654 * (x + 0.044715 * x * x * x)))


def _linear_kernel(x_ref, w_ref, b_ref, o_ref, *, act):
    y = jnp.dot(x_ref[...], w_ref[...], preferred_element_type=jnp.float32)
    y = y + b_ref[...]
    if act == "relu":
        y = jnp.maximum(y, 0.0)
    elif act == "gelu":
        y = _gelu_tanh(y)
    o_ref[...] = y.astype(o_ref.dtype)


def pallas_linear(x, w, b, act="none"):
    """y = act(x @ w + b); x:[M,K], w:[K,N], b:[N].  Small single-block matmul."""
    M, K = x.shape
    Kw, N = w.shape
    assert K == Kw
    return pl.pallas_call(
        functools.partial(_linear_kernel, act=act),
        out_shape=jax.ShapeDtypeStruct((M, N), jnp.float32),
        grid=(1,),
        in_specs=[pl.BlockSpec((M, K), lambda i: (0, 0)),
                  pl.BlockSpec((K, N), lambda i: (0, 0)),
                  pl.BlockSpec((1, N), lambda i: (0, 0))],
        out_specs=pl.BlockSpec((M, N), lambda i: (0, 0)),
    )(x, w, b.reshape(1, N))


def _matmul_kernel(x_ref, w_ref, o_ref):
    o_ref[...] = jnp.dot(x_ref[...], w_ref[...], preferred_element_type=jnp.float32)


def pallas_matmul(x, w):
    """y = x @ w (no bias); used for the lane-dense H36M joint regression."""
    M, K = x.shape
    Kw, N = w.shape
    assert K == Kw
    return pl.pallas_call(
        _matmul_kernel,
        out_shape=jax.ShapeDtypeStruct((M, N), jnp.float32),
        grid=(1,),
        in_specs=[pl.BlockSpec((M, K), lambda i: (0, 0)),
                  pl.BlockSpec((K, N), lambda i: (0, 0))],
        out_specs=pl.BlockSpec((M, N), lambda i: (0, 0)),
    )(x, w)


# --- fused blend-shape kernel: v_posed = v_template + [betas|pose_feat] @ W --------
def _posed_kernel(x_ref, w_ref, vt_ref, o_ref):
    o_ref[...] = vt_ref[...] + jnp.dot(x_ref[...], w_ref[...],
                                       preferred_element_type=jnp.float32)


def pallas_blend_posed(x, blenddirs, v_template_flat):
    """v_posed [N, 3*V] (coordinate-major).  Tiled over the 3*V axis; x stays resident
    while the bf16 weight tiles stream, pipelining HBM traffic against the MXU."""
    N, K = x.shape
    V3 = blenddirs.shape[1]
    tn = _lane_tile(V3, BLEND_LANE_CAP)
    return pl.pallas_call(
        _posed_kernel,
        out_shape=jax.ShapeDtypeStruct((N, V3), jnp.float32),
        grid=(V3 // tn,),
        in_specs=[pl.BlockSpec((N, K), lambda n: (0, 0)),
                  pl.BlockSpec((K, tn), lambda n: (0, n)),
                  pl.BlockSpec((1, tn), lambda n: (0, n))],
        out_specs=pl.BlockSpec((N, tn), lambda n: (0, n)),
        compiler_params=pltpu.CompilerParams(
            dimension_semantics=("parallel",),
            vmem_limit_bytes=_TILED_VMEM_LIMIT),
    )(x, blenddirs, v_template_flat)


# --- fused LBS skinning: one (12N,24)@(24,tv) MXU op per V-tile, applied in place ---
def _skin_kernel(w_ref, a_ref, vp_ref, o_ref):
    N = vp_ref.shape[1]
    # single MXU contraction per tile: (12N, 24) @ (24, tv) -> (12N, tv)
    t = jnp.dot(a_ref[...], w_ref[...], preferred_element_type=jnp.float32)
    x = vp_ref[0]
    y = vp_ref[1]
    z = vp_ref[2]
    for i in range(3):
        base = i * 4 * N
        t0 = t[base:base + N]
        t1 = t[base + N:base + 2 * N]
        t2 = t[base + 2 * N:base + 3 * N]
        t3 = t[base + 3 * N:base + 4 * N]
        o_ref[i] = t0 * x + t1 * y + t2 * z + t3


def pallas_skinning(lbs_weights_t, A, v_posed_planes, scale=1000.0):
    """LBS skinning without materializing T_mat.

    lbs_weights_t: [24, V] (bf16), A: [N, 24, 4, 4] (f32), v_posed_planes: [3, N, V].
    Returns vertices as [3, N, V] coordinate planes, already scaled (scale folded into A).
    """
    K, V = lbs_weights_t.shape
    _, N, _ = v_posed_planes.shape
    tv = _lane_tile(V, SKIN_LANE_CAP)
    # (N,24,4,4) -> (3,4,N,24) -> (12N,24); fold the *1000 mm scale into A (exact).
    A_flat = (jnp.transpose(A, (2, 3, 0, 1))[:3] * scale
              ).reshape(12 * N, K).astype(lbs_weights_t.dtype)
    return pl.pallas_call(
        _skin_kernel,
        out_shape=jax.ShapeDtypeStruct((3, N, V), jnp.float32),
        grid=(V // tv,),
        in_specs=[pl.BlockSpec((K, tv), lambda v: (0, v)),
                  pl.BlockSpec((12 * N, K), lambda v: (0, 0)),
                  pl.BlockSpec((3, N, tv), lambda v: (0, 0, v))],
        out_specs=pl.BlockSpec((3, N, tv), lambda v: (0, 0, v)),
        compiler_params=pltpu.CompilerParams(
            dimension_semantics=("parallel",),
            vmem_limit_bytes=_TILED_VMEM_LIMIT),
    )(lbs_weights_t, A_flat, v_posed_planes)


# --- rot6d -> rotmat, lane-dense layout (rows of length M=BT*24 on lanes) ---------
def _rot6d_kernel(a1_ref, a2_ref, o_ref):
    a1 = a1_ref[...]                    # (3, M)
    a2 = a2_ref[...]                    # (3, M)
    eps2 = 1e-24                        # (F.normalize eps=1e-12)^2
    x0, x1, x2 = a1[0:1], a1[1:2], a1[2:3]
    y0, y1, y2 = a2[0:1], a2[1:2], a2[2:3]
    inv1 = jax.lax.rsqrt(jnp.maximum(x0 * x0 + x1 * x1 + x2 * x2, eps2))
    b10, b11, b12 = x0 * inv1, x1 * inv1, x2 * inv1
    dot = b10 * y0 + b11 * y1 + b12 * y2
    u0 = y0 - dot * b10
    u1 = y1 - dot * b11
    u2 = y2 - dot * b12
    inv2 = jax.lax.rsqrt(jnp.maximum(u0 * u0 + u1 * u1 + u2 * u2, eps2))
    b20, b21, b22 = u0 * inv2, u1 * inv2, u2 * inv2
    # b3 = cross(b1, b2); columns of R are (b1, b2, b3) -> SPIN semantics
    c0 = b11 * b22 - b12 * b21
    c1 = b12 * b20 - b10 * b22
    c2 = b10 * b21 - b11 * b20
    o_ref[0:1] = b10
    o_ref[1:2] = b20
    o_ref[2:3] = c0
    o_ref[3:4] = b11
    o_ref[4:5] = b21
    o_ref[5:6] = c1
    o_ref[6:7] = b12
    o_ref[7:8] = b22
    o_ref[8:9] = c2


def pallas_rot6d_to_rotmat(x):
    """x:[N, 144] (24 * 6D reps) -> rotation matrices [N*24, 3, 3]."""
    x = x.reshape(-1, 3, 2)            # matches torch x.view(-1, 3, 2)
    M = x.shape[0]
    a1_t = jnp.transpose(x[:, :, 0])   # (3, M)  tiny transposes, plain JAX
    a2_t = jnp.transpose(x[:, :, 1])
    flat = pl.pallas_call(
        _rot6d_kernel,
        out_shape=jax.ShapeDtypeStruct((9, M), jnp.float32),
        grid=(1,),
        in_specs=[pl.BlockSpec((3, M), lambda i: (0, 0)),
                  pl.BlockSpec((3, M), lambda i: (0, 0))],
        out_specs=pl.BlockSpec((9, M), lambda i: (0, 0)),
    )(a1_t, a2_t)
    return jnp.transpose(flat).reshape(M, 3, 3)


# ----------------------------- plain-JAX glue pieces ------------------------------
def rotation_matrix_to_quaternion(R, eps=1e-6):
    # kornia / SPIN implementation, masks as float multiplications.
    rt = jnp.transpose(R, (0, 2, 1))
    m = lambda i, j: rt[:, i, j]
    mask_d2 = (m(2, 2) < eps)
    mask_d0_d1 = (m(0, 0) > m(1, 1))
    mask_d0_nd1 = (m(0, 0) < -m(1, 1))

    t0 = 1.0 + m(0, 0) - m(1, 1) - m(2, 2)
    q0 = jnp.stack([m(1, 2) - m(2, 1), t0, m(0, 1) + m(1, 0), m(2, 0) + m(0, 2)], -1)
    t1 = 1.0 - m(0, 0) + m(1, 1) - m(2, 2)
    q1 = jnp.stack([m(2, 0) - m(0, 2), m(0, 1) + m(1, 0), t1, m(1, 2) + m(2, 1)], -1)
    t2 = 1.0 - m(0, 0) - m(1, 1) + m(2, 2)
    q2 = jnp.stack([m(0, 1) - m(1, 0), m(2, 0) + m(0, 2), m(1, 2) + m(2, 1), t2], -1)
    t3 = 1.0 + m(0, 0) + m(1, 1) + m(2, 2)
    q3 = jnp.stack([t3, m(1, 2) - m(2, 1), m(2, 0) - m(0, 2), m(0, 1) - m(1, 0)], -1)

    c0 = (mask_d2 & mask_d0_d1).astype(R.dtype)[:, None]
    c1 = (mask_d2 & (~mask_d0_d1)).astype(R.dtype)[:, None]
    c2 = ((~mask_d2) & mask_d0_nd1).astype(R.dtype)[:, None]
    c3 = ((~mask_d2) & (~mask_d0_nd1)).astype(R.dtype)[:, None]
    q = q0 * c0 + q1 * c1 + q2 * c2 + q3 * c3
    denom = jnp.sqrt(t0[:, None] * c0 + t1[:, None] * c1 + t2[:, None] * c2 + t3[:, None] * c3)
    return q / denom * 0.5


def quaternion_to_angle_axis(q):
    q1, q2, q3 = q[:, 1], q[:, 2], q[:, 3]
    sin_sq = q1 * q1 + q2 * q2 + q3 * q3
    sin_t = jnp.sqrt(sin_sq)
    cos_t = q[:, 0]
    two_theta = 2.0 * jnp.where(cos_t < 0.0,
                                jnp.arctan2(-sin_t, -cos_t),
                                jnp.arctan2(sin_t, cos_t))
    k_pos = two_theta / jnp.where(sin_t > 0.0, sin_t, 1.0)
    k = jnp.where(sin_sq > 0.0, k_pos, 2.0)
    aa = jnp.stack([q1 * k, q2 * k, q3 * k], -1)
    return jnp.nan_to_num(aa)


def rotation_matrix_to_angle_axis(R):
    return quaternion_to_angle_axis(rotation_matrix_to_quaternion(R))


def batch_rigid_transform(rot_mats, joints, parents):
    # Kinematic chain batched per tree level (9 levels) instead of 23 serial matmuls.
    N, K = joints.shape[:2]
    parent_idx = jnp.array(parents[1:])
    rel_joints = joints.at[:, 1:].add(-joints[:, parent_idx])
    rot_and_t = jnp.concatenate([rot_mats, rel_joints[..., None]], axis=-1)         # (N,K,3,4)
    bottom = jnp.broadcast_to(jnp.array([0.0, 0.0, 0.0, 1.0], jnp.float32), (N, K, 1, 4))
    tm = jnp.concatenate([rot_and_t, bottom], axis=-2)                              # (N,K,4,4)
    transforms = tm                                       # root global == local at index 0
    for level in SMPL_LEVELS[1:]:
        idx = jnp.array(level)
        par = jnp.array([parents[i] for i in level])
        res = jnp.matmul(transforms[:, par], tm[:, idx])                            # (N,L,4,4)
        transforms = transforms.at[:, idx].set(res)
    t_j = jnp.einsum('nkij,nkj->nki', transforms[..., :3], joints)
    return transforms.at[..., 3].add(-t_j)                                          # relative A


def smpl_lbs(betas, rot_mats, p):
    # TODO(synk): real SMPL loads learned template/blendshape/skinning params from files;
    # deterministic synthetic parameters of the same structure are used here
    # (stored coordinate-major / vertex-padded so the kernels stay lane-dense).
    N = betas.shape[0]
    ident = jnp.eye(3, dtype=jnp.float32)
    pose_feature = (rot_mats[:, 1:] - ident).reshape(N, 23 * 9)

    # rest-pose joints via the pre-contracted regressor (v_shaped path eliminated).
    joints = p['J_template'][None] + jnp.dot(betas, p['shapedirs_J']).reshape(N, 24, 3)

    # fused blend shapes: v_posed = v_template + [betas | pose_feature] @ blenddirs
    x = jnp.concatenate([betas, pose_feature], axis=1)
    pad = p['blenddirs_cm'].shape[0] - x.shape[1]
    if pad:
        x = jnp.pad(x, ((0, 0), (0, pad)))
    x = x.astype(p['blenddirs_cm'].dtype)
    v_posed_cm = pallas_blend_posed(x, p['blenddirs_cm'], p['v_template_cm'])       # (N, 3*VP)

    A = batch_rigid_transform(rot_mats, joints, SMPL_PARENTS)                       # (N,24,4,4)

    VP = v_posed_cm.shape[1] // 3
    vp_planes = jnp.transpose(v_posed_cm.reshape(N, 3, VP), (1, 0, 2))              # (3, N, VP)
    verts_planes = pallas_skinning(p['lbs_weights_t'], A, vp_planes, scale=1000.0)
    return verts_planes                                                             # (3,N,VP), mm


def _mesh_template_cond(p):
    """fc_mesh_temp branch.  Depends only on parameters -> computed once (B-independent)."""
    Jn, D = NUM_JOINTS, DIFF_DIM
    mt_rows = jnp.transpose(p['mesh_template'][0]).reshape(15, MESH_IN)    # (15, MESH_IN)
    h = pallas_linear(mt_rows, p['w_mt'], p['b_mt'], act='gelu')           # (15, D)
    # Conv1d(15 -> J, kernel 1): out[j, d] = sum_c W[j, c] h[c, d] + b[j]
    # computed as (h.T @ W.T + b) with the J axis zero-padded to 128 lanes.
    mt_out = pallas_linear(jnp.transpose(h), p['w_conv_pad'], p['b_conv_pad'],
                           act='gelu')                                     # (D, 128)
    return jnp.transpose(mt_out[:, :Jn])                                   # (J, D)


# ----------------------------- full forward ---------------------------------------
def smpl_regressor_forward(params, feat):
    B, T, J, C = feat.shape
    BT = B * T
    D = DIFF_DIM

    # fc_ds: Linear(dim_rep, diff_dim) + ReLU
    fp = pallas_linear(feat.reshape(B * T * J, C), params['w_ds'], params['b_ds'], act='relu')

    # TODO(synk): DiffMesh_Process definition is not provided; stand-in is a residual
    # add of the (batch-independent) mesh-template conditioning with loss_diff = 0.
    # Being linear/batch-independent it is folded exactly into the heads bias.
    mesh_cond = _mesh_template_cond(params)                                # (J, D)
    mesh_bias = jnp.dot(mesh_cond.reshape(1, J * D), params['w_heads'])[0] # (HEADS_PAD,)
    loss_diff = jnp.float32(0.0)

    flat = fp.reshape(BT, J * D)

    # fused pose + shape heads (init_pose / init_shape folded into the bias at init;
    # output padded to 256 lanes for a dense store).
    heads = pallas_linear(flat, params['w_heads'], params['b_heads'] + mesh_bias,
                          act='none')                                               # (BT, 256)
    pred_pose = heads[:, :PARAM_POSE_DIM]                                           # (BT, 144)
    # shape head is linear, so AdaptiveAvgPool over T commutes with the projection
    pred_shape = jnp.mean(heads[:, PARAM_POSE_DIM:PARAM_POSE_DIM + 10].reshape(B, T, 10),
                          axis=1)                                                   # (B, 10)
    pred_shape_bt = jnp.repeat(pred_shape, T, axis=0)                               # (BT, 10)

    # rot6d -> rotation matrices (lane-dense kernel)
    pred_rotmat = pallas_rot6d_to_rotmat(pred_pose).reshape(BT, 24, 3, 3)

    # SMPL (pose2rot=False) -> vertices in mm, as coordinate planes (3, BT, VP)
    verts_planes = smpl_lbs(pred_shape_bt, pred_rotmat, params)
    VP = verts_planes.shape[2]
    pred_vertices = jnp.transpose(verts_planes, (1, 2, 0))[:, :NUM_VERTS]  # (BT, V, 3)

    # H36M joint regression as one lane-dense matmul [3*BT, VP] @ [VP, 128-padded]
    jh = pallas_matmul(verts_planes.reshape(3 * BT, VP), params['J_regressor_h36m_t_pad'])
    pred_joints = jnp.transpose(jh[:, :17].reshape(3, BT, 17), (1, 2, 0))  # (BT, 17, 3)

    # rotation matrices -> axis-angle
    pose_aa = rotation_matrix_to_angle_axis(pred_rotmat.reshape(-1, 3, 3)).reshape(-1, 72)

    theta = jnp.concatenate([pose_aa, pred_shape_bt], axis=1)              # (BT, 82)
    return [{'theta': theta, 'verts': pred_vertices, 'kp_3d': pred_joints,
             'loss_diff': loss_diff}]


# ----------------------------- deterministic parameter init ------------------------
def init_params(key):
    ks = jax.random.split(key, 20)
    uni = lambda k, shape, s: jax.random.uniform(k, shape, jnp.float32, -s, s)
    C, D, Jn, V = DIM_REP, DIFF_DIM, NUM_JOINTS, NUM_VERTS
    VP = ((V + 127) // 128) * 128          # pad vertex axis to a lane multiple (exact: zeros)
    JD = Jn * D
    p = {}
    p['w_ds'] = uni(ks[0], (C, D), 1.0 / np.sqrt(C))
    p['b_ds'] = uni(ks[1], (D,), 1.0 / np.sqrt(C))
    p['w_mt'] = uni(ks[2], (MESH_IN, D), 1.0 / np.sqrt(MESH_IN))
    p['b_mt'] = uni(ks[3], (D,), 1.0 / np.sqrt(MESH_IN))
    # Conv1d(15 -> J, 1) weights, stored transposed and zero-padded to 128 output lanes.
    w_conv = uni(ks[4], (15, Jn), 1.0 / np.sqrt(15))
    b_conv = uni(ks[5], (Jn,), 1.0 / np.sqrt(15))
    p['w_conv_pad'] = jnp.pad(w_conv, ((0, 0), (0, 128 - Jn)))
    p['b_conv_pad'] = jnp.pad(b_conv, (0, 128 - Jn))
    # pose / shape heads fused into one [JD, 256]-padded matmul; init_pose / init_shape
    # (mean parameters) folded into the bias at init time (exact linear algebra).
    w_pose = uni(ks[6], (JD, PARAM_POSE_DIM), 0.01 * np.sqrt(6.0 / (JD + PARAM_POSE_DIM)))
    b_pose = uni(ks[7], (PARAM_POSE_DIM,), 1.0 / np.sqrt(JD))
    w_shape = uni(ks[8], (JD, 10), 0.01 * np.sqrt(6.0 / (JD + 10)))
    b_shape = uni(ks[9], (10,), 1.0 / np.sqrt(JD))
    init_pose = jnp.tile(jnp.array([1., 0., 0., 1., 0., 0.], jnp.float32), 24)   # identity 6D
    init_shape = 0.1 * jax.random.normal(ks[10], (10,), jnp.float32)
    w_heads = jnp.zeros((JD, HEADS_PAD), jnp.float32)
    w_heads = w_heads.at[:, :PARAM_POSE_DIM].set(w_pose)
    w_heads = w_heads.at[:, PARAM_POSE_DIM:PARAM_POSE_DIM + 10].set(w_shape)
    b_heads = jnp.zeros((HEADS_PAD,), jnp.float32)
    b_heads = b_heads.at[:PARAM_POSE_DIM].set(b_pose + init_pose)
    b_heads = b_heads.at[PARAM_POSE_DIM:PARAM_POSE_DIM + 10].set(b_shape + init_shape)
    p['w_heads'] = w_heads
    p['b_heads'] = b_heads
    p['mesh_template'] = 0.1 * jax.random.normal(ks[11], (1, V, 3), jnp.float32)

    # --- synthetic SMPL parameters (coordinate-major, vertex-padded to VP) ----------
    v_template = 0.2 * jax.random.normal(ks[12], (3, V), jnp.float32)
    shapedirs = 0.01 * jax.random.normal(ks[13], (10, 3, V), jnp.float32)
    posedirs = 0.001 * jax.random.normal(ks[14], (23 * 9, 3, V), jnp.float32)
    J_reg = jax.nn.softmax(jax.random.normal(ks[15], (24, V), jnp.float32), axis=-1)
    lbs_w = jax.nn.softmax(4.0 * jax.random.normal(ks[16], (V, 24), jnp.float32), axis=-1)
    J_reg_h36m = jax.nn.softmax(jax.random.normal(ks[17], (17, V), jnp.float32), axis=-1)

    # pre-contract the 24-joint regressor -> removes the v_shaped path entirely (exact)
    p['J_template'] = jnp.einsum('kv,cv->kc', J_reg, v_template)                      # (24, 3)
    p['shapedirs_J'] = jnp.einsum('bcv,kv->bkc', shapedirs, J_reg).reshape(10, 72)    # (10, 72)

    # zero-pad V -> VP (zero blend dirs / lbs weights / regressor columns keep it exact)
    padV = lambda a: jnp.pad(a, [(0, 0)] * (a.ndim - 1) + [(0, VP - V)])
    v_template_p = padV(v_template)
    shapedirs_p = padV(shapedirs)
    posedirs_p = padV(posedirs)

    p['v_template_cm'] = v_template_p.reshape(1, 3 * VP)
    blenddirs = jnp.concatenate(
        [shapedirs_p.reshape(10, 3 * VP),
         posedirs_p.reshape(23 * 9, 3 * VP),
         jnp.zeros((BLEND_K_PAD - 217, 3 * VP), jnp.float32)], axis=0)                # (224, 3VP)
    p['blenddirs_cm'] = blenddirs.astype(jnp.bfloat16)      # streamed weight -> bf16, f32 acc
    p['lbs_weights_t'] = padV(jnp.transpose(lbs_w)).astype(jnp.bfloat16)              # (24, VP)
    jh_t = jnp.transpose(padV(J_reg_h36m))                                            # (VP, 17)
    p['J_regressor_h36m_t_pad'] = jnp.pad(jh_t, ((0, 0), (0, 128 - 17)))  # lane-dense output
    return p


if __name__ == "__main__":
    key = jax.random.PRNGKey(0)
    k_params, k_feat = jax.random.split(key)
    B, T, J, C = 2, 8, NUM_JOINTS, DIM_REP          # clip_len = 8
    params = init_params(k_params)
    feat = jax.random.normal(k_feat, (B, T, J, C), jnp.float32)

    fwd = jax.jit(smpl_regressor_forward)
    out = fwd(params, feat)
    theta = jax.block_until_ready(out[0]['theta'])
    verts = jax.block_until_ready(out[0]['verts'])
    kp3d = jax.block_until_ready(out[0]['kp_3d'])

    assert theta.shape == (B * T, 72 + 10)
    assert verts.shape == (B * T, NUM_VERTS, 3)
    assert kp3d.shape == (B * T, 17, 3)
    assert bool(jnp.all(jnp.isfinite(theta))) and bool(jnp.all(jnp.isfinite(verts)))
    assert bool(jnp.all(jnp.isfinite(kp3d)))
    print("KERNEL_OK")
</pallas_src>

<mosaic_0001>
module attributes {stable_mosaic.version = 11 : i64} {
  func.func @_linear_kernel(%arg0: i32, %arg1: memref<272x64xf32, #tpu.memory_space<vmem>>, %arg2: memref<64x128xf32, #tpu.memory_space<vmem>>, %arg3: memref<1x128xf32, #tpu.memory_space<vmem>>, %arg4: memref<272x128xf32, #tpu.memory_space<vmem>>) attributes {dimension_semantics = [#tpu.dimension_semantics<arbitrary>], iteration_bounds = array<i64: 1>, scalar_prefetch = 0 : i64, scratch_operands = 0 : i64, tpu.core_type = #tpu.core_type<tc>, window_params = [{pipeline_mode = #tpu.pipeline_mode<synchronous>, transform_indices = @transform_0, window_bounds = array<i64: 272, 64>}, {pipeline_mode = #tpu.pipeline_mode<synchronous>, transform_indices = @transform_1, window_bounds = array<i64: 64, 128>}, {pipeline_mode = #tpu.pipeline_mode<synchronous>, transform_indices = @transform_2, window_bounds = array<i64: 1, 128>}, {pipeline_mode = #tpu.pipeline_mode<synchronous>, transform_indices = @transform_3, window_bounds = array<i64: 272, 128>}]} {
    %c0 = arith.constant 0 : index
    %c0_0 = arith.constant 0 : index
    %0 = vector.load %arg1[%c0, %c0_0] : memref<272x64xf32, #tpu.memory_space<vmem>>, vector<272x64xf32>
    %c0_1 = arith.constant 0 : index
    %c0_2 = arith.constant 0 : index
    %1 = vector.load %arg2[%c0_1, %c0_2] : memref<64x128xf32, #tpu.memory_space<vmem>>, vector<64x128xf32>
    %cst = arith.constant dense<0.000000e+00> : vector<272x128xf32>
    %2 = tpu.matmul %0, %1, %cst {dimension_numbers = #tpu.dot_dimension_numbers<[1], [0], [0], [1], [0, 0, 1, 1], [], []>} : vector<272x64xf32>, vector<64x128xf32>, vector<272x128xf32> -> vector<272x128xf32>
    %c0_3 = arith.constant 0 : index
    %c0_4 = arith.constant 0 : index
    %3 = vector.load %arg3[%c0_3, %c0_4] : memref<1x128xf32, #tpu.memory_space<vmem>>, vector<1x128xf32>
    %4 = vector.broadcast %3 : vector<1x128xf32> to vector<272x128xf32>
    %5 = arith.addf %2, %4 : vector<272x128xf32>
    %cst_5 = arith.constant 0.000000e+00 : f32
    %6 = vector.broadcast %cst_5 : f32 to vector<272x128xf32>
    %7 = arith.maximumf %5, %6 : vector<272x128xf32>
    %c0_6 = arith.constant 0 : index
    %c0_7 = arith.constant 0 : index
    %8 = vector.load %arg4[%c0_6, %c0_7] : memref<272x128xf32, #tpu.memory_space<vmem>>, vector<272x128xf32>
    tpu.vector_store %arg4[%c0_6, %c0_7], %7 {strides = array<i32>} : memref<272x128xf32, #tpu.memory_space<vmem>>, vector<272x128xf32>,
    return
  }
  func.func @transform_0(%arg0: i32) -> (i32, i32) {
    %c0_i32 = arith.constant 0 : i32
    %c0_i32_0 = arith.constant 0 : i32
    %c0_i32_1 = arith.constant 0 : i32
    return %c0_i32, %c0_i32_0 : i32, i32
  }
  func.func @transform_1(%arg0: i32) -> (i32, i32) {
    %c0_i32 = arith.constant 0 : i32
    %c0_i32_0 = arith.constant 0 : i32
    %c0_i32_1 = arith.constant 0 : i32
    return %c0_i32, %c0_i32_0 : i32, i32
  }
  func.func @transform_2(%arg0: i32) -> (i32, i32) {
    %c0_i32 = arith.constant 0 : i32
    %c0_i32_0 = arith.constant 0 : i32
    %c0_i32_1 = arith.constant 0 : i32
    return %c0_i32, %c0_i32_0 : i32, i32
  }
  func.func @transform_3(%arg0: i32) -> (i32, i32) {
    %c0_i32 = arith.constant 0 : i32
    %c0_i32_0 = arith.constant 0 : i32
    %c0_i32_1 = arith.constant 0 : i32
    return %c0_i32, %c0_i32_0 : i32, i32
  }
}

module attributes {stable_mosaic.version = 11 : i64} {
  func.func @_linear_kernel(%arg0: i32, %arg1: memref<15x128xf32, #tpu.memory_space<vmem>>, %arg2: memref<128x128xf32, #tpu.memory_space<vmem>>, %arg3: memref<1x128xf32, #tpu.memory_space<vmem>>, %arg4: memref<15x128xf32, #tpu.memory_space<vmem>>) attributes {dimension_semantics = [#tpu.dimension_semantics<arbitrary>], iteration_bounds = array<i64: 1>, scalar_prefetch = 0 : i64, scratch_operands = 0 : i64, tpu.core_type = #tpu.core_type<tc>, window_params = [{pipeline_mode = #tpu.pipeline_mode<synchronous>, transform_indices = @transform_0, window_bounds = array<i64: 15, 128>}, {pipeline_mode = #tpu.pipeline_mode<synchronous>, transform_indices = @transform_1, window_bounds = array<i64: 128, 128>}, {pipeline_mode = #tpu.pipeline_mode<synchronous>, transform_indices = @transform_2, window_bounds = array<i64: 1, 128>}, {pipeline_mode = #tpu.pipeline_mode<synchronous>, transform_indices = @transform_3, window_bounds = array<i64: 15, 128>}]} {
    %c0 = arith.constant 0 : index
    %c0_0 = arith.constant 0 : index
    %0 = vector.load %arg1[%c0, %c0_0] : memref<15x128xf32, #tpu.memory_space<vmem>>, vector<15x128xf32>
    %c0_1 = arith.constant 0 : index
    %c0_2 = arith.constant 0 : index
    %1 = vector.load %arg2[%c0_1, %c0_2] : memref<128x128xf32, #tpu.memory_space<vmem>>, vector<128x128xf32>
    %cst = arith.constant dense<0.000000e+00> : vector<15x128xf32>
    %2 = tpu.matmul %0, %1, %cst {dimension_numbers = #tpu.dot_dimension_numbers<[1], [0], [0], [1], [0, 0, 1, 1], [], []>} : vector<15x128xf32>, vector<128x128xf32>, vector<15x128xf32> -> vector<15x128xf32>
    %c0_3 = arith.constant 0 : index
    %c0_4 = arith.constant 0 : index
    %3 = vector.load %arg3[%c0_3, %c0_4] : memref<1x128xf32, #tpu.memory_space<vmem>>, vector<1x128xf32>
    %4 = vector.broadcast %3 : vector<1x128xf32> to vector<15x128xf32>
    %5 = arith.addf %2, %4 : vector<15x128xf32>
    %cst_5 = arith.constant 5.000000e-01 : f32
    %6 = vector.broadcast %cst_5 : f32 to vector<15x128xf32>
    %7 = arith.mulf %6, %5 : vector<15x128xf32>
    %cst_6 = arith.constant 4.471500e-02 : f32
    %8 = vector.broadcast %cst_6 : f32 to vector<15x128xf32>
    %9 = arith.mulf %8, %5 : vector<15x128xf32>
    %10 = arith.mulf %9, %5 : vector<15x128xf32>
    %11 = arith.mulf %10, %5 : vector<15x128xf32>
    %12 = arith.addf %5, %11 : vector<15x128xf32>
    %cst_7 = arith.constant 0.797884583 : f32
    %13 = vector.broadcast %cst_7 : f32 to vector<15x128xf32>
    %14 = arith.mulf %13, %12 : vector<15x128xf32>
    %15 = math.tanh %14 : vector<15x128xf32>
    %cst_8 = arith.constant 1.000000e+00 : f32
    %16 = vector.broadcast %cst_8 : f32 to vector<15x128xf32>
    %17 = arith.addf %16, %15 : vector<15x128xf32>
    %18 = arith.mulf %7, %17 : vector<15x128xf32>
    %c0_9 = arith.constant 0 : index
    %c0_10 = arith.constant 0 : index
    %19 = vector.load %arg4[%c0_9, %c0_10] : memref<15x128xf32, #tpu.memory_space<vmem>>, vector<15x128xf32>
    tpu.vector_store %arg4[%c0_9, %c0_10], %18 {strides = array<i32>} : memref<15x128xf32, #tpu.memory_space<vmem>>, vector<15x128xf32>,
    return
  }
  func.func @transform_0(%arg0: i32) -> (i32, i32) {
    %c0_i32 = arith.constant 0 : i32
    %c0_i32_0 = arith.constant 0 : i32
    %c0_i32_1 = arith.constant 0 : i32
    return %c0_i32, %c0_i32_0 : i32, i32
  }
  func.func @transform_1(%arg0: i32) -> (i32, i32) {
    %c0_i32 = arith.constant 0 : i32
    %c0_i32_0 = arith.constant 0 : i32
    %c0_i32_1 = arith.constant 0 : i32
    return %c0_i32, %c0_i32_0 : i32, i32
  }
  func.func @transform_2(%arg0: i32) -> (i32, i32) {
    %c0_i32 = arith.constant 0 : i32
    %c0_i32_0 = arith.constant 0 : i32
    %c0_i32_1 = arith.constant 0 : i32
    return %c0_i32, %c0_i32_0 : i32, i32
  }
  func.func @transform_3(%arg0: i32) -> (i32, i32) {
    %c0_i32 = arith.constant 0 : i32
    %c0_i32_0 = arith.constant 0 : i32
    %c0_i32_1 = arith.constant 0 : i32
    return %c0_i32, %c0_i32_0 : i32, i32
  }
}

module attributes {stable_mosaic.version = 11 : i64} {
  func.func @_linear_kernel(%arg0: i32, %arg1: memref<128x15xf32, #tpu.memory_space<vmem>>, %arg2: memref<15x128xf32, #tpu.memory_space<vmem>>, %arg3: memref<1x128xf32, #tpu.memory_space<vmem>>, %arg4: memref<128x128xf32, #tpu.memory_space<vmem>>) attributes {dimension_semantics = [#tpu.dimension_semantics<arbitrary>], iteration_bounds = array<i64: 1>, scalar_prefetch = 0 : i64, scratch_operands = 0 : i64, tpu.core_type = #tpu.core_type<tc>, window_params = [{pipeline_mode = #tpu.pipeline_mode<synchronous>, transform_indices = @transform_0, window_bounds = array<i64: 128, 15>}, {pipeline_mode = #tpu.pipeline_mode<synchronous>, transform_indices = @transform_1, window_bounds = array<i64: 15, 128>}, {pipeline_mode = #tpu.pipeline_mode<synchronous>, transform_indices = @transform_2, window_bounds = array<i64: 1, 128>}, {pipeline_mode = #tpu.pipeline_mode<synchronous>, transform_indices = @transform_3, window_bounds = array<i64: 128, 128>}]} {
    %c0 = arith.constant 0 : index
    %c0_0 = arith.constant 0 : index
    %0 = vector.load %arg1[%c0, %c0_0] : memref<128x15xf32, #tpu.memory_space<vmem>>, vector<128x15xf32>
    %c0_1 = arith.constant 0 : index
    %c0_2 = arith.constant 0 : index
    %1 = vector.load %arg2[%c0_1, %c0_2] : memref<15x128xf32, #tpu.memory_space<vmem>>, vector<15x128xf32>
    %cst = arith.constant dense<0.000000e+00> : vector<128x128xf32>
    %2 = tpu.matmul %0, %1, %cst {dimension_numbers = #tpu.dot_dimension_numbers<[1], [0], [0], [1], [0, 0, 1, 1], [], []>} : vector<128x15xf32>, vector<15x128xf32>, vector<128x128xf32> -> vector<128x128xf32>
    %c0_3 = arith.constant 0 : index
    %c0_4 = arith.constant 0 : index
    %3 = vector.load %arg3[%c0_3, %c0_4] : memref<1x128xf32, #tpu.memory_space<vmem>>, vector<1x128xf32>
    %4 = vector.broadcast %3 : vector<1x128xf32> to vector<128x128xf32>
    %5 = arith.addf %2, %4 : vector<128x128xf32>
    %cst_5 = arith.constant 5.000000e-01 : f32
    %6 = vector.broadcast %cst_5 : f32 to vector<128x128xf32>
    %7 = arith.mulf %6, %5 : vector<128x128xf32>
    %cst_6 = arith.constant 4.471500e-02 : f32
    %8 = vector.broadcast %cst_6 : f32 to vector<128x128xf32>
    %9 = arith.mulf %8, %5 : vector<128x128xf32>
    %10 = arith.mulf %9, %5 : vector<128x128xf32>
    %11 = arith.mulf %10, %5 : vector<128x128xf32>
    %12 = arith.addf %5, %11 : vector<128x128xf32>
    %cst_7 = arith.constant 0.797884583 : f32
    %13 = vector.broadcast %cst_7 : f32 to vector<128x128xf32>
    %14 = arith.mulf %13, %12 : vector<128x128xf32>
    %15 = math.tanh %14 : vector<128x128xf32>
    %cst_8 = arith.constant 1.000000e+00 : f32
    %16 = vector.broadcast %cst_8 : f32 to vector<128x128xf32>
    %17 = arith.addf %16, %15 : vector<128x128xf32>
    %18 = arith.mulf %7, %17 : vector<128x128xf32>
    %c0_9 = arith.constant 0 : index
    %c0_10 = arith.constant 0 : index
    %19 = vector.load %arg4[%c0_9, %c0_10] : memref<128x128xf32, #tpu.memory_space<vmem>>, vector<128x128xf32>
    tpu.vector_store %arg4[%c0_9, %c0_10], %18 {strides = array<i32>} : memref<128x128xf32, #tpu.memory_space<vmem>>, vector<128x128xf32>,
    return
  }
  func.func @transform_0(%arg0: i32) -> (i32, i32) {
    %c0_i32 = arith.constant 0 : i32
    %c0_i32_0 = arith.constant 0 : i32
    %c0_i32_1 = arith.constant 0 : i32
    return %c0_i32, %c0_i32_0 : i32, i32
  }
  func.func @transform_1(%arg0: i32) -> (i32, i32) {
    %c0_i32 = arith.constant 0 : i32
    %c0_i32_0 = arith.constant 0 : i32
    %c0_i32_1 = arith.constant 0 : i32
    return %c0_i32, %c0_i32_0 : i32, i32
  }
  func.func @transform_2(%arg0: i32) -> (i32, i32) {
    %c0_i32 = arith.constant 0 : i32
    %c0_i32_0 = arith.constant 0 : i32
    %c0_i32_1 = arith.constant 0 : i32
    return %c0_i32, %c0_i32_0 : i32, i32
  }
  func.func @transform_3(%arg0: i32) -> (i32, i32) {
    %c0_i32 = arith.constant 0 : i32
    %c0_i32_0 = arith.constant 0 : i32
    %c0_i32_1 = arith.constant 0 : i32
    return %c0_i32, %c0_i32_0 : i32, i32
  }
}

module attributes {stable_mosaic.version = 11 : i64} {
  func.func @_linear_kernel(%arg0: i32, %arg1: memref<16x2176xf32, #tpu.memory_space<vmem>>, %arg2: memref<2176x256xf32, #tpu.memory_space<vmem>>, %arg3: memref<1x256xf32, #tpu.memory_space<vmem>>, %arg4: memref<16x256xf32, #tpu.memory_space<vmem>>) attributes {dimension_semantics = [#tpu.dimension_semantics<arbitrary>], iteration_bounds = array<i64: 1>, scalar_prefetch = 0 : i64, scratch_operands = 0 : i64, tpu.core_type = #tpu.core_type<tc>, window_params = [{pipeline_mode = #tpu.pipeline_mode<synchronous>, transform_indices = @transform_0, window_bounds = array<i64: 16, 2176>}, {pipeline_mode = #tpu.pipeline_mode<synchronous>, transform_indices = @transform_1, window_bounds = array<i64: 2176, 256>}, {pipeline_mode = #tpu.pipeline_mode<synchronous>, transform_indices = @transform_2, window_bounds = array<i64: 1, 256>}, {pipeline_mode = #tpu.pipeline_mode<synchronous>, transform_indices = @transform_3, window_bounds = array<i64: 16, 256>}]} {
    %c0 = arith.constant 0 : index
    %c0_0 = arith.constant 0 : index
    %0 = vector.load %arg1[%c0, %c0_0] : memref<16x2176xf32, #tpu.memory_space<vmem>>, vector<16x2176xf32>
    %c0_1 = arith.constant 0 : index
    %c0_2 = arith.constant 0 : index
    %1 = vector.load %arg2[%c0_1, %c0_2] : memref<2176x256xf32, #tpu.memory_space<vmem>>, vector<2176x256xf32>
    %cst = arith.constant dense<0.000000e+00> : vector<16x256xf32>
    %2 = tpu.matmul %0, %1, %cst {dimension_numbers = #tpu.dot_dimension_numbers<[1], [0], [0], [1], [0, 0, 1, 1], [], []>} : vector<16x2176xf32>, vector<2176x256xf32>, vector<16x256xf32> -> vector<16x256xf32>
    %c0_3 = arith.constant 0 : index
    %c0_4 = arith.constant 0 : index
    %3 = vector.load %arg3[%c0_3, %c0_4] : memref<1x256xf32, #tpu.memory_space<vmem>>, vector<1x256xf32>
    %4 = vector.broadcast %3 : vector<1x256xf32> to vector<16x256xf32>
    %5 = arith.addf %2, %4 : vector<16x256xf32>
    %c0_5 = arith.constant 0 : index
    %c0_6 = arith.constant 0 : index
    %6 = vector.load %arg4[%c0_5, %c0_6] : memref<16x256xf32, #tpu.memory_space<vmem>>, vector<16x256xf32>
    tpu.vector_store %arg4[%c0_5, %c0_6], %5 {strides = array<i32>} : memref<16x256xf32, #tpu.memory_space<vmem>>, vector<16x256xf32>,
    return
  }
  func.func @transform_0(%arg0: i32) -> (i32, i32) {
    %c0_i32 = arith.constant 0 : i32
    %c0_i32_0 = arith.constant 0 : i32
    %c0_i32_1 = arith.constant 0 : i32
    return %c0_i32, %c0_i32_0 : i32, i32
  }
  func.func @transform_1(%arg0: i32) -> (i32, i32) {
    %c0_i32 = arith.constant 0 : i32
    %c0_i32_0 = arith.constant 0 : i32
    %c0_i32_1 = arith.constant 0 : i32
    return %c0_i32, %c0_i32_0 : i32, i32
  }
  func.func @transform_2(%arg0: i32) -> (i32, i32) {
    %c0_i32 = arith.constant 0 : i32
    %c0_i32_0 = arith.constant 0 : i32
    %c0_i32_1 = arith.constant 0 : i32
    return %c0_i32, %c0_i32_0 : i32, i32
  }
  func.func @transform_3(%arg0: i32) -> (i32, i32) {
    %c0_i32 = arith.constant 0 : i32
    %c0_i32_0 = arith.constant 0 : i32
    %c0_i32_1 = arith.constant 0 : i32
    return %c0_i32, %c0_i32_0 : i32, i32
  }
}

module attributes {stable_mosaic.version = 11 : i64} {
  func.func @_rot6d_kernel(%arg0: i32, %arg1: memref<3x384xf32, #tpu.memory_space<vmem>>, %arg2: memref<3x384xf32, #tpu.memory_space<vmem>>, %arg3: memref<9x384xf32, #tpu.memory_space<vmem>>) attributes {dimension_semantics = [#tpu.dimension_semantics<arbitrary>], iteration_bounds = array<i64: 1>, scalar_prefetch = 0 : i64, scratch_operands = 0 : i64, tpu.core_type = #tpu.core_type<tc>, window_params = [{pipeline_mode = #tpu.pipeline_mode<synchronous>, transform_indices = @transform_0, window_bounds = array<i64: 3, 384>}, {pipeline_mode = #tpu.pipeline_mode<synchronous>, transform_indices = @transform_1, window_bounds = array<i64: 3, 384>}, {pipeline_mode = #tpu.pipeline_mode<synchronous>, transform_indices = @transform_2, window_bounds = array<i64: 9, 384>}]} {
    %c0 = arith.constant 0 : index
    %c0_0 = arith.constant 0 : index
    %0 = vector.load %arg1[%c0, %c0_0] : memref<3x384xf32, #tpu.memory_space<vmem>>, vector<3x384xf32>
    %c0_1 = arith.constant 0 : index
    %c0_2 = arith.constant 0 : index
    %1 = vector.load %arg2[%c0_1, %c0_2] : memref<3x384xf32, #tpu.memory_space<vmem>>, vector<3x384xf32>
    %2 = vector.extract_strided_slice %0 {offsets = [0, 0], sizes = [1, 384], strides = [1, 1]} : vector<3x384xf32> to vector<1x384xf32>
    %3 = vector.extract_strided_slice %0 {offsets = [1, 0], sizes = [1, 384], strides = [1, 1]} : vector<3x384xf32> to vector<1x384xf32>
    %4 = vector.extract_strided_slice %0 {offsets = [2, 0], sizes = [1, 384], strides = [1, 1]} : vector<3x384xf32> to vector<1x384xf32>
    %5 = vector.extract_strided_slice %1 {offsets = [0, 0], sizes = [1, 384], strides = [1, 1]} : vector<3x384xf32> to vector<1x384xf32>
    %6 = vector.extract_strided_slice %1 {offsets = [1, 0], sizes = [1, 384], strides = [1, 1]} : vector<3x384xf32> to vector<1x384xf32>
    %7 = vector.extract_strided_slice %1 {offsets = [2, 0], sizes = [1, 384], strides = [1, 1]} : vector<3x384xf32> to vector<1x384xf32>
    %8 = arith.mulf %2, %2 : vector<1x384xf32>
    %9 = arith.mulf %3, %3 : vector<1x384xf32>
    %10 = arith.addf %8, %9 : vector<1x384xf32>
    %11 = arith.mulf %4, %4 : vector<1x384xf32>
    %12 = arith.addf %10, %11 : vector<1x384xf32>
    %cst = arith.constant 1.000000e-24 : f32
    %13 = vector.broadcast %cst : f32 to vector<1x384xf32>
    %14 = arith.maximumf %12, %13 : vector<1x384xf32>
    %15 = math.rsqrt %14 : vector<1x384xf32>
    %16 = arith.mulf %2, %15 : vector<1x384xf32>
    %17 = arith.mulf %3, %15 : vector<1x384xf32>
    %18 = arith.mulf %4, %15 : vector<1x384xf32>
    %19 = arith.mulf %16, %5 : vector<1x384xf32>
    %20 = arith.mulf %17, %6 : vector<1x384xf32>
    %21 = arith.addf %19, %20 : vector<1x384xf32>
    %22 = arith.mulf %18, %7 : vector<1x384xf32>
    %23 = arith.addf %21, %22 : vector<1x384xf32>
    %24 = arith.mulf %23, %16 : vector<1x384xf32>
    %25 = arith.subf %5, %24 : vector<1x384xf32>
    %26 = arith.mulf %23, %17 : vector<1x384xf32>
    %27 = arith.subf %6, %26 : vector<1x384xf32>
    %28 = arith.mulf %23, %18 : vector<1x384xf32>
    %29 = arith.subf %7, %28 : vector<1x384xf32>
    %30 = arith.mulf %25, %25 : vector<1x384xf32>
    %31 = arith.mulf %27, %27 : vector<1x384xf32>
    %32 = arith.addf %30, %31 : vector<1x384xf32>
    %33 = arith.mulf %29, %29 : vector<1x384xf32>
    %34 = arith.addf %32, %33 : vector<1x384xf32>
    %cst_3 = arith.constant 1.000000e-24 : f32
    %35 = vector.broadcast %cst_3 : f32 to vector<1x384xf32>
    %36 = arith.maximumf %34, %35 : vector<1x384xf32>
    %37 = math.rsqrt %36 : vector<1x384xf32>
    %38 = arith.mulf %25, %37 : vector<1x384xf32>
    %39 = arith.mulf %27, %37 : vector<1x384xf32>
    %40 = arith.mulf %29, %37 : vector<1x384xf32>
    %41 = arith.mulf %17, %40 : vector<1x384xf32>
    %42 = arith.mulf %18, %39 : vector<1x384xf32>
    %43 = arith.subf %41, %42 : vector<1x384xf32>
    %44 = arith.mulf %18, %38 : vector<1x384xf32>
    %45 = arith.mulf %16, %40 : vector<1x384xf32>
    %46 = arith.subf %44, %45 : vector<1x384xf32>
    %47 = arith.mulf %16, %39 : vector<1x384xf32>
    %48 = arith.mulf %17, %38 : vector<1x384xf32>
    %49 = arith.subf %47, %48 : vector<1x384xf32>
    %c0_4 = arith.constant 0 : index
    %c0_5 = arith.constant 0 : index
    %50 = vector.load %arg3[%c0_4, %c0_5] : memref<9x384xf32, #tpu.memory_space<vmem>>, vector<1x384xf32>
    tpu.vector_store %arg3[%c0_4, %c0_5], %16 {strides = array<i32>} : memref<9x384xf32, #tpu.memory_space<vmem>>, vector<1x384xf32>,
    %c1 = arith.constant 1 : index
    %c0_6 = arith.constant 0 : index
    %51 = vector.load %arg3[%c1, %c0_6] : memref<9x384xf32, #tpu.memory_space<vmem>>, vector<1x384xf32>
    tpu.vector_store %arg3[%c1, %c0_6], %38 {strides = array<i32>} : memref<9x384xf32, #tpu.memory_space<vmem>>, vector<1x384xf32>,
    %c2 = arith.constant 2 : index
    %c0_7 = arith.constant 0 : index
    %52 = vector.load %arg3[%c2, %c0_7] : memref<9x384xf32, #tpu.memory_space<vmem>>, vector<1x384xf32>
    tpu.vector_store %arg3[%c2, %c0_7], %43 {strides = array<i32>} : memref<9x384xf32, #tpu.memory_space<vmem>>, vector<1x384xf32>,
    %c3 = arith.constant 3 : index
    %c0_8 = arith.constant 0 : index
    %53 = vector.load %arg3[%c3, %c0_8] : memref<9x384xf32, #tpu.memory_space<vmem>>, vector<1x384xf32>
    tpu.vector_store %arg3[%c3, %c0_8], %17 {strides = array<i32>} : memref<9x384xf32, #tpu.memory_space<vmem>>, vector<1x384xf32>,
    %c4 = arith.constant 4 : index
    %c0_9 = arith.constant 0 : index
    %54 = vector.load %arg3[%c4, %c0_9] : memref<9x384xf32, #tpu.memory_space<vmem>>, vector<1x384xf32>
    tpu.vector_store %arg3[%c4, %c0_9], %39 {strides = array<i32>} : memref<9x384xf32, #tpu.memory_space<vmem>>, vector<1x384xf32>,
    %c5 = arith.constant 5 : index
    %c0_10 = arith.constant 0 : index
    %55 = vector.load %arg3[%c5, %c0_10] : memref<9x384xf32, #tpu.memory_space<vmem>>, vector<1x384xf32>
    tpu.vector_store %arg3[%c5, %c0_10], %46 {strides = array<i32>} : memref<9x384xf32, #tpu.memory_space<vmem>>, vector<1x384xf32>,
    %c6 = arith.constant 6 : index
    %c0_11 = arith.constant 0 : index
    %56 = vector.load %arg3[%c6, %c0_11] : memref<9x384xf32, #tpu.memory_space<vmem>>, vector<1x384xf32>
    tpu.vector_store %arg3[%c6, %c0_11], %18 {strides = array<i32>} : memref<9x384xf32, #tpu.memory_space<vmem>>, vector<1x384xf32>,
    %c7 = arith.constant 7 : index
    %c0_12 = arith.constant 0 : index
    %57 = vector.load %arg3[%c7, %c0_12] : memref<9x384xf32, #tpu.memory_space<vmem>>, vector<1x384xf32>
    tpu.vector_store %arg3[%c7, %c0_12], %40 {strides = array<i32>} : memref<9x384xf32, #tpu.memory_space<vmem>>, vector<1x384xf32>,
    %c8 = arith.constant 8 : index
    %c0_13 = arith.constant 0 : index
    %58 = vector.load %arg3[%c8, %c0_13] : memref<9x384xf32, #tpu.memory_space<vmem>>, vector<1x384xf32>
    tpu.vector_store %arg3[%c8, %c0_13], %49 {strides = array<i32>} : memref<9x384xf32, #tpu.memory_space<vmem>>, vector<1x384xf32>,
    return
  }
  func.func @transform_0(%arg0: i32) -> (i32, i32) {
    %c0_i32 = arith.constant 0 : i32
    %c0_i32_0 = arith.constant 0 : i32
    %c0_i32_1 = arith.constant 0 : i32
    return %c0_i32, %c0_i32_0 : i32, i32
  }
  func.func @transform_1(%arg0: i32) -> (i32, i32) {
    %c0_i32 = arith.constant 0 : i32
    %c0_i32_0 = arith.constant 0 : i32
    %c0_i32_1 = arith.constant 0 : i32
    return %c0_i32, %c0_i32_0 : i32, i32
  }
  func.func @transform_2(%arg0: i32) -> (i32, i32) {
    %c0_i32 = arith.constant 0 : i32
    %c0_i32_0 = arith.constant 0 : i32
    %c0_i32_1 = arith.constant 0 : i32
    return %c0_i32, %c0_i32_0 : i32, i32
  }
}

module attributes {stable_mosaic.version = 11 : i64} {
  func.func @_matmul_kernel(%arg0: i32, %arg1: memref<48x640xf32, #tpu.memory_space<vmem>>, %arg2: memref<640x128xf32, #tpu.memory_space<vmem>>, %arg3: memref<48x128xf32, #tpu.memory_space<vmem>>) attributes {dimension_semantics = [#tpu.dimension_semantics<arbitrary>], iteration_bounds = array<i64: 1>, scalar_prefetch = 0 : i64, scratch_operands = 0 : i64, tpu.core_type = #tpu.core_type<tc>, window_params = [{pipeline_mode = #tpu.pipeline_mode<synchronous>, transform_indices = @transform_0, window_bounds = array<i64: 48, 640>}, {pipeline_mode = #tpu.pipeline_mode<synchronous>, transform_indices = @transform_1, window_bounds = array<i64: 640, 128>}, {pipeline_mode = #tpu.pipeline_mode<synchronous>, transform_indices = @transform_2, window_bounds = array<i64: 48, 128>}]} {
    %c0 = arith.constant 0 : index
    %c0_0 = arith.constant 0 : index
    %0 = vector.load %arg1[%c0, %c0_0] : memref<48x640xf32, #tpu.memory_space<vmem>>, vector<48x640xf32>
    %c0_1 = arith.constant 0 : index
    %c0_2 = arith.constant 0 : index
    %1 = vector.load %arg2[%c0_1, %c0_2] : memref<640x128xf32, #tpu.memory_space<vmem>>, vector<640x128xf32>
    %cst = arith.constant dense<0.000000e+00> : vector<48x128xf32>
    %2 = tpu.matmul %0, %1, %cst {dimension_numbers = #tpu.dot_dimension_numbers<[1], [0], [0], [1], [0, 0, 1, 1], [], []>} : vector<48x640xf32>, vector<640x128xf32>, vector<48x128xf32> -> vector<48x128xf32>
    %c0_3 = arith.constant 0 : index
    %c0_4 = arith.constant 0 : index
    %3 = vector.load %arg3[%c0_3, %c0_4] : memref<48x128xf32, #tpu.memory_space<vmem>>, vector<48x128xf32>
    tpu.vector_store %arg3[%c0_3, %c0_4], %2 {strides = array<i32>} : memref<48x128xf32, #tpu.memory_space<vmem>>, vector<48x128xf32>,
    return
  }
  func.func @transform_0(%arg0: i32) -> (i32, i32) {
    %c0_i32 = arith.constant 0 : i32
    %c0_i32_0 = arith.constant 0 : i32
    %c0_i32_1 = arith.constant 0 : i32
    return %c0_i32, %c0_i32_0 : i32, i32
  }
  func.func @transform_1(%arg0: i32) -> (i32, i32) {
    %c0_i32 = arith.constant 0 : i32
    %c0_i32_0 = arith.constant 0 : i32
    %c0_i32_1 = arith.constant 0 : i32
    return %c0_i32, %c0_i32_0 : i32, i32
  }
  func.func @transform_2(%arg0: i32) -> (i32, i32) {
    %c0_i32 = arith.constant 0 : i32
    %c0_i32_0 = arith.constant 0 : i32
    %c0_i32_1 = arith.constant 0 : i32
    return %c0_i32, %c0_i32_0 : i32, i32
  }
}

module attributes {stable_mosaic.version = 11 : i64} {
  func.func @_skin_kernel(%arg0: i32, %arg1: memref<24x128xbf16, #tpu.memory_space<vmem>>, %arg2: memref<192x24xbf16, #tpu.memory_space<vmem>>, %arg3: memref<3x16x128xf32, #tpu.memory_space<vmem>>, %arg4: memref<3x16x128xf32, #tpu.memory_space<vmem>>) attributes {dimension_semantics = [#tpu.dimension_semantics<parallel>], iteration_bounds = array<i64: 5>, scalar_prefetch = 0 : i64, scratch_operands = 0 : i64, tpu.core_type = #tpu.core_type<tc>, window_params = [{transform_indices = @transform_0, window_bounds = array<i64: 24, 128>}, {pipeline_mode = #tpu.pipeline_mode<synchronous>, transform_indices = @transform_1, window_bounds = array<i64: 192, 24>}, {transform_indices = @transform_2, window_bounds = array<i64: 3, 16, 128>}, {transform_indices = @transform_3, window_bounds = array<i64: 3, 16, 128>}]} {
    %c0 = arith.constant 0 : index
    %c0_0 = arith.constant 0 : index
    %0 = vector.load %arg2[%c0, %c0_0] : memref<192x24xbf16, #tpu.memory_space<vmem>>, vector<192x24xbf16>
    %c0_1 = arith.constant 0 : index
    %c0_2 = arith.constant 0 : index
    %1 = vector.load %arg1[%c0_1, %c0_2] : memref<24x128xbf16, #tpu.memory_space<vmem>>, vector<24x128xbf16>
    %cst = arith.constant dense<0.000000e+00> : vector<192x128xf32>
    %2 = tpu.matmul %0, %1, %cst {dimension_numbers = #tpu.dot_dimension_numbers<[1], [0], [0], [1], [0, 0, 1, 1], [], []>} : vector<192x24xbf16>, vector<24x128xbf16>, vector<192x128xf32> -> vector<192x128xf32>
    %c0_3 = arith.constant 0 : index
    %c0_4 = arith.constant 0 : index
    %c0_5 = arith.constant 0 : index
    %3 = vector.load %arg3[%c0_3, %c0_4, %c0_5] : memref<3x16x128xf32, #tpu.memory_space<vmem>>, vector<1x16x128xf32>
    %4 = vector.shape_cast %3 : vector<1x16x128xf32> to vector<16x128xf32>
    %c1 = arith.constant 1 : index
    %c0_6 = arith.constant 0 : index
    %c0_7 = arith.constant 0 : index
    %5 = vector.load %arg3[%c1, %c0_6, %c0_7] : memref<3x16x128xf32, #tpu.memory_space<vmem>>, vector<1x16x128xf32>
    %6 = vector.shape_cast %5 : vector<1x16x128xf32> to vector<16x128xf32>
    %c2 = arith.constant 2 : index
    %c0_8 = arith.constant 0 : index
    %c0_9 = arith.constant 0 : index
    %7 = vector.load %arg3[%c2, %c0_8, %c0_9] : memref<3x16x128xf32, #tpu.memory_space<vmem>>, vector<1x16x128xf32>
    %8 = vector.shape_cast %7 : vector<1x16x128xf32> to vector<16x128xf32>
    %9 = vector.extract_strided_slice %2 {offsets = [0, 0], sizes = [16, 128], strides = [1, 1]} : vector<192x128xf32> to vector<16x128xf32>
    %10 = vector.extract_strided_slice %2 {offsets = [16, 0], sizes = [16, 128], strides = [1, 1]} : vector<192x128xf32> to vector<16x128xf32>
    %11 = vector.extract_strided_slice %2 {offsets = [32, 0], sizes = [16, 128], strides = [1, 1]} : vector<192x128xf32> to vector<16x128xf32>
    %12 = vector.extract_strided_slice %2 {offsets = [48, 0], sizes = [16, 128], strides = [1, 1]} : vector<192x128xf32> to vector<16x128xf32>
    %13 = arith.mulf %9, %4 : vector<16x128xf32>
    %14 = arith.mulf %10, %6 : vector<16x128xf32>
    %15 = arith.addf %13, %14 : vector<16x128xf32>
    %16 = arith.mulf %11, %8 : vector<16x128xf32>
    %17 = arith.addf %15, %16 : vector<16x128xf32>
    %18 = arith.addf %17, %12 : vector<16x128xf32>
    %c0_10 = arith.constant 0 : index
    %c0_11 = arith.constant 0 : index
    %c0_12 = arith.constant 0 : index
    %19 = vector.load %arg4[%c0_10, %c0_11, %c0_12] : memref<3x16x128xf32, #tpu.memory_space<vmem>>, vector<1x16x128xf32>
    %20 = vector.shape_cast %19 : vector<1x16x128xf32> to vector<16x128xf32>
    %21 = vector.shape_cast %18 : vector<16x128xf32> to vector<1x16x128xf32>
    tpu.vector_store %arg4[%c0_10, %c0_11, %c0_12], %21 {strides = array<i32>} : memref<3x16x128xf32, #tpu.memory_space<vmem>>, vector<1x16x128xf32>,
    %22 = vector.extract_strided_slice %2 {offsets = [64, 0], sizes = [16, 128], strides = [1, 1]} : vector<192x128xf32> to vector<16x128xf32>
    %23 = vector.extract_strided_slice %2 {offsets = [80, 0], sizes = [16, 128], strides = [1, 1]} : vector<192x128xf32> to vector<16x128xf32>
    %24 = vector.extract_strided_slice %2 {offsets = [96, 0], sizes = [16, 128], strides = [1, 1]} : vector<192x128xf32> to vector<16x128xf32>
    %25 = vector.extract_strided_slice %2 {offsets = [112, 0], sizes = [16, 128], strides = [1, 1]} : vector<192x128xf32> to vector<16x128xf32>
    %26 = arith.mulf %22, %4 : vector<16x128xf32>
    %27 = arith.mulf %23, %6 : vector<16x128xf32>
    %28 = arith.addf %26, %27 : vector<16x128xf32>
    %29 = arith.mulf %24, %8 : vector<16x128xf32>
    %30 = arith.addf %28, %29 : vector<16x128xf32>
    %31 = arith.addf %30, %25 : vector<16x128xf32>
    %c1_13 = arith.constant 1 : index
    %c0_14 = arith.constant 0 : index
    %c0_15 = arith.constant 0 : index
    %32 = vector.load %arg4[%c1_13, %c0_14, %c0_15] : memref<3x16x128xf32, #tpu.memory_space<vmem>>, vector<1x16x128xf32>
    %33 = vector.shape_cast %32 : vector<1x16x128xf32> to vector<16x128xf32>
    %34 = vector.shape_cast %31 : vector<16x128xf32> to vector<1x16x128xf32>
    tpu.vector_store %arg4[%c1_13, %c0_14, %c0_15], %34 {strides = array<i32>} : memref<3x16x128xf32, #tpu.memory_space<vmem>>, vector<1x16x128xf32>,
    %35 = vector.extract_strided_slice %2 {offsets = [128, 0], sizes = [16, 128], strides = [1, 1]} : vector<192x128xf32> to vector<16x128xf32>
    %36 = vector.extract_strided_slice %2 {offsets = [144, 0], sizes = [16, 128], strides = [1, 1]} : vector<192x128xf32> to vector<16x128xf32>
    %37 = vector.extract_strided_slice %2 {offsets = [160, 0], sizes = [16, 128], strides = [1, 1]} : vector<192x128xf32> to vector<16x128xf32>
    %38 = vector.extract_strided_slice %2 {offsets = [176, 0], sizes = [16, 128], strides = [1, 1]} : vector<192x128xf32> to vector<16x128xf32>
    %39 = arith.mulf %35, %4 : vector<16x128xf32>
    %40 = arith.mulf %36, %6 : vector<16x128xf32>
    %41 = arith.addf %39, %40 : vector<16x128xf32>
    %42 = arith.mulf %37, %8 : vector<16x128xf32>
    %43 = arith.addf %41, %42 : vector<16x128xf32>
    %44 = arith.addf %43, %38 : vector<16x128xf32>
    %c2_16 = arith.constant 2 : index
    %c0_17 = arith.constant 0 : index
    %c0_18 = arith.constant 0 : index
    %45 = vector.load %arg4[%c2_16, %c0_17, %c0_18] : memref<3x16x128xf32, #tpu.memory_space<vmem>>, vector<1x16x128xf32>
    %46 = vector.shape_cast %45 : vector<1x16x128xf32> to vector<16x128xf32>
    %47 = vector.shape_cast %44 : vector<16x128xf32> to vector<1x16x128xf32>
    tpu.vector_store %arg4[%c2_16, %c0_17, %c0_18], %47 {strides = array<i32>} : memref<3x16x128xf32, #tpu.memory_space<vmem>>, vector<1x16x128xf32>,
    return
  }
  func.func @transform_0(%arg0: i32) -> (i32, i32) {
    %c0_i32 = arith.constant 0 : i32
    %c0_i32_0 = arith.constant 0 : i32
    return %c0_i32, %arg0 : i32, i32
  }
  func.func @transform_1(%arg0: i32) -> (i32, i32) {
    %c0_i32 = arith.constant 0 : i32
    %c0_i32_0 = arith.constant 0 : i32
    %c0_i32_1 = arith.constant 0 : i32
    return %c0_i32, %c0_i32_0 : i32, i32
  }
  func.func @transform_2(%arg0: i32) -> (i32, i32, i32) {
    %c0_i32 = arith.constant 0 : i32
    %c0_i32_0 = arith.constant 0 : i32
    %c0_i32_1 = arith.constant 0 : i32
    return %c0_i32, %c0_i32_0, %arg0 : i32, i32, i32
  }
  func.func @transform_3(%arg0: i32) -> (i32, i32, i32) {
    %c0_i32 = arith.constant 0 : i32
    %c0_i32_0 = arith.constant 0 : i32
    %c0_i32_1 = arith.constant 0 : i32
    return %c0_i32, %c0_i32_0, %arg0 : i32, i32, i32
  }
}

module attributes {stable_mosaic.version = 11 : i64} {
  func.func @_posed_kernel(%arg0: i32, %arg1: memref<16x224xbf16, #tpu.memory_space<vmem>>, %arg2: memref<224x640xbf16, #tpu.memory_space<vmem>>, %arg3: memref<1x640xf32, #tpu.memory_space<vmem>>, %arg4: memref<16x640xf32, #tpu.memory_space<vmem>>) attributes {dimension_semantics = [#tpu.dimension_semantics<parallel>], iteration_bounds = array<i64: 3>, scalar_prefetch = 0 : i64, scratch_operands = 0 : i64, tpu.core_type = #tpu.core_type<tc>, window_params = [{pipeline_mode = #tpu.pipeline_mode<synchronous>, transform_indices = @transform_0, window_bounds = array<i64: 16, 224>}, {transform_indices = @transform_1, window_bounds = array<i64: 224, 640>}, {transform_indices = @transform_2, window_bounds = array<i64: 1, 640>}, {transform_indices = @transform_3, window_bounds = array<i64: 16, 640>}]} {
    %c0 = arith.constant 0 : index
    %c0_0 = arith.constant 0 : index
    %0 = vector.load %arg3[%c0, %c0_0] : memref<1x640xf32, #tpu.memory_space<vmem>>, vector<1x640xf32>
    %c0_1 = arith.constant 0 : index
    %c0_2 = arith.constant 0 : index
    %1 = vector.load %arg1[%c0_1, %c0_2] : memref<16x224xbf16, #tpu.memory_space<vmem>>, vector<16x224xbf16>
    %c0_3 = arith.constant 0 : index
    %c0_4 = arith.constant 0 : index
    %2 = vector.load %arg2[%c0_3, %c0_4] : memref<224x640xbf16, #tpu.memory_space<vmem>>, vector<224x640xbf16>
    %cst = arith.constant dense<0.000000e+00> : vector<16x640xf32>
    %3 = tpu.matmul %1, %2, %cst {dimension_numbers = #tpu.dot_dimension_numbers<[1], [0], [0], [1], [0, 0, 1, 1], [], []>} : vector<16x224xbf16>, vector<224x640xbf16>, vector<16x640xf32> -> vector<16x640xf32>
    %4 = vector.broadcast %0 : vector<1x640xf32> to vector<16x640xf32>
    %5 = arith.addf %4, %3 : vector<16x640xf32>
    %c0_5 = arith.constant 0 : index
    %c0_6 = arith.constant 0 : index
    %6 = vector.load %arg4[%c0_5, %c0_6] : memref<16x640xf32, #tpu.memory_space<vmem>>, vector<16x640xf32>
    tpu.vector_store %arg4[%c0_5, %c0_6], %5 {strides = array<i32>} : memref<16x640xf32, #tpu.memory_space<vmem>>, vector<16x640xf32>,
    return
  }
  func.func @transform_0(%arg0: i32) -> (i32, i32) {
    %c0_i32 = arith.constant 0 : i32
    %c0_i32_0 = arith.constant 0 : i32
    %c0_i32_1 = arith.constant 0 : i32
    return %c0_i32, %c0_i32_0 : i32, i32
  }
  func.func @transform_1(%arg0: i32) -> (i32, i32) {
    %c0_i32 = arith.constant 0 : i32
    %c0_i32_0 = arith.constant 0 : i32
    return %c0_i32, %arg0 : i32, i32
  }
  func.func @transform_2(%arg0: i32) -> (i32, i32) {
    %c0_i32 = arith.constant 0 : i32
    %c0_i32_0 = arith.constant 0 : i32
    return %c0_i32, %arg0 : i32, i32
  }
  func.func @transform_3(%arg0: i32) -> (i32, i32) {
    %c0_i32 = arith.constant 0 : i32
    %c0_i32_0 = arith.constant 0 : i32
    return %c0_i32, %arg0 : i32, i32
  }
}

</mosaic_0001>

<bundles_post_ra>
// kernel: smpl_regressor_forward.8
= control target key start
LH: loop header
LB: loop body
LE: loop exit
PB: predicated region body
PF: predicated region fallthrough
CT: control target
= control target key end

     0   :  { %8 = vsyncpa [#allocation3], 0  ;;  %s1043_s0 = inlined_call_operand.vmem [shape: f32[272,64], index: 0, kind: input, shape index: {}]   ;;  %s1044_s1 = inlined_call_operand.hbm [shape: f32[64,128], index: 1, kind: input, shape index: {}]   ;;  %s1045_s2 = inlined_call_operand.hbm [shape: f32[1,128], index: 2, kind: input, shape index: {}]   ;;  %s1046_s3 = inlined_call_operand.vmem [shape: f32[272,128], index: 3, kind: output, shape index: {}]  }
   0x1   :  { %9 = vsyncpa [#allocation5], 0  ;;  %s721_s12 = smov [#allocation2]   ;;  %s673_s16 = scalar_lea.hbm %s1044_s1, 1024 }
   0x2   :  { %s17_s13 = sshll.u32 %s721_s12, 4  ;;  %p674_p0 = scmp.ne.s32.totalorder %s1044_s1, %s673_s16  ;;  %s18_s13 = int_to_ptr.vmem [resolvable:$true] %s17_s13 }
   0x3   :  { %p677_p1 = scmp.lt.u32.totalorder %s673_s16, %s1044_s1 }
   0x5   :  { %p679_p2 = pnand %p677_p1, %p674_p0 }
   0x7   :  { %682 = shalt.err (!%p679_p2)
}
   0x8   :  { %s683_s21 = scalar_lea.vmem %s18_s13, 1024  ;;  %p688_p4 = scmp.lt.s32.totalorder %s18_s13, %s18_s13 }
   0x9   :  { %p684_p3 = scmp.ne.s32.totalorder %s18_s13, %s683_s21  ;;  %p689_p5 = scmp.lt.s32.totalorder %s683_s21, %s683_s21 }
   0xb   :  { %p690_p6 = por %p689_p5, %p688_p4 }
   0xd   :  { %p691_p7 = pnand %p690_p6, %p684_p3 }
   0xf   :  { %694 = shalt.err (!%p691_p7)
}
  0x10   :  { %s722_s22 = smov 128   ;;  %s723_s23 = smov 8  }
  0x11   :  { %23 = dma.hbm_to_vmem [thread:$0]  %s1044_s1, 1024, %s18_s13, [#allocation3], %s722_s22, %s722_s22, %s723_s23  }
  0x12   :  { %s724_s26 = smov [#allocation4]   ;;  %s695_s30 = scalar_lea.hbm %s1045_s2, 16 }
  0x13   :  { %s30_s27 = sshll.u32 %s724_s26, 4  ;;  %p696_p8 = scmp.ne.s32.totalorder %s1045_s2, %s695_s30  ;;  %s31_s27 = int_to_ptr.vmem [resolvable:$true] %s30_s27 }
  0x14   :  { %p699_p9 = scmp.lt.u32.totalorder %s695_s30, %s1045_s2 }
  0x16   :  { %p701_p10 = pnand %p699_p9, %p696_p8 }
  0x18   :  { %704 = shalt.err (!%p701_p10)
}
  0x19   :  { %s705_s8 = scalar_lea.vmem %s31_s27, 16  ;;  %s709_s1 = scalar_lea.vmem %s31_s27, 32 }
  0x1a   :  { %p706_p11 = scmp.ne.s32.totalorder %s31_s27, %s705_s8  ;;  %p710_p12 = scmp.lt.s32.totalorder %s31_s27, %s31_s27 }
  0x1b   :  { %p711_p13 = scmp.lt.s32.totalorder %s709_s1, %s705_s8 }
  0x1d   :  { %p712_p0 = por %p711_p13, %p710_p12 }
  0x1f   :  { %p713_p1 = pnand %p712_p0, %p706_p11 }
  0x21   :  { %716 = shalt.err (!%p713_p1)
}
  0x22   :  { %33 = dma.hbm_to_vmem [thread:$0]  %s1045_s2, 16, %s31_s27, [#allocation5]  }
  0x23   :  { %717 = dma.done.wait [#allocation3], 1024  }
  0x24   :  { %718 = vsyncadd [#allocation3], 4294966272 }
  0x25   :  { %719 = dma.done.wait [#allocation5], 16  }
  0x26   :  { %720 = vsyncadd [#allocation5], 4294967280  ;;  %v74_v0 = vld [vmem:[#allocation2] sm:$0xff]  ;;  %v75_v1 = vld [vmem:[#allocation2 + $0x8] sm:$0xff]  ;;  %vm89_vm0 = vcmask 523264  }
  0x27   :  { %v76_v2 = vld [vmem:[#allocation2 + $0x10] sm:$0xff]  ;;  %v645_v3 = vpack.c.bf16 %v75_v1, %v74_v0  ;;  %v77_v4 = vld [vmem:[#allocation2 + $0x18] sm:$0xff]  ;;  %v78_v6 = vld [vmem:[#allocation2 + $0x20] sm:$0xff] }
  0x28   :  { %v649_v5 = vpack.c.bf16 %v77_v4, %v76_v2  ;;  %v79_v7 = vld [vmem:[#allocation2 + $0x28] sm:$0xff]  ;;  %v40_v8 = vld [vmem:[%s1043_s0] sm:$0xff]  ;;  %v58_v9 = vld [vmem:[%s1043_s0 + $0x90] sm:$0xff] }
  0x29   :  { %646 = vmatprep.subr.bf16.mxu0 %v645_v3  ;;  %661 = vmatprep.subr.bf16.mxu1 %v645_v3  ;;  %v653_v10 = vpack.c.bf16 %v79_v7, %v78_v6  ;;  %v80_v11 = vld [vmem:[#allocation2 + $0x30] sm:$0xff]  ;;  %v81_v12 = vld [vmem:[#allocation2 + $0x38] sm:$0xff]  ;;  %v41_v14 = vld [vmem:[%s1043_s0 + $0x8] sm:$0xff] }
  0x2a   :  { %648 = vmatpush3.bf16.msra.mxu0 %v645_v3  ;;  %665 = vmatpush3.bf16.msra.mxu1 %v645_v3  ;;  %v657_v13 = vpack.c.bf16 %v81_v12, %v80_v11  ;;  %v59_v15 = vld [vmem:[%s1043_s0 + $0x98] sm:$0xff]  ;;  %v42_v16 = vld [vmem:[%s1043_s0 + $0x10] sm:$0xff]  ;;  %v60_v17 = vld [vmem:[%s1043_s0 + $0xa0] sm:$0xff] }
  0x2b   :  { %650 = vmatprep.subr.bf16.mxu0 %v649_v5  ;;  %662 = vmatprep.subr.bf16.mxu1 %v649_v5  ;;  %v43_v18 = vld [vmem:[%s1043_s0 + $0x18] sm:$0xff]  ;;  %v61_v19 = vld [vmem:[%s1043_s0 + $0xa8] sm:$0xff]  ;;  %v44_v20 = vld [vmem:[%s1043_s0 + $0x20] sm:$0xff] }
  0x2c   :  { %594 = vmatprep.mubr.msk.f32.mxu0 %vm89_vm0, %v40_v8  ;;  %621 = vmatprep.mubr.msk.f32.mxu1 %vm89_vm0, %v58_v9  ;;  %v62_v21 = vld [vmem:[%s1043_s0 + $0xb0] sm:$0xff]  ;;  %v45_v22 = vld [vmem:[%s1043_s0 + $0x28] sm:$0xff]  ;;  %v63_v23 = vld [vmem:[%s1043_s0 + $0xb8] sm:$0xff] }
  0x2d   :  { %v46_v24 = vld [vmem:[%s1043_s0 + $0x30] sm:$0xff]  ;;  %v64_v25 = vld [vmem:[%s1043_s0 + $0xc0] sm:$0xff]  ;;  %v47_v26 = vld [vmem:[%s1043_s0 + $0x38] sm:$0xff] }
  0x2e   :  { %652 = vmatpush3.bf16.msra.mxu0 %v649_v5  ;;  %666 = vmatpush3.bf16.msra.mxu1 %v649_v5  ;;  %v65_v27 = vld [vmem:[%s1043_s0 + $0xc8] sm:$0xff]  ;;  %v48_v28 = vld [vmem:[%s1043_s0 + $0x40] sm:$0xff]  ;;  %v66_v29 = vld [vmem:[%s1043_s0 + $0xd0] sm:$0xff] }
  0x2f   :  { %654 = vmatprep.subr.bf16.mxu0 %v653_v10  ;;  %663 = vmatprep.subr.bf16.mxu1 %v653_v10  ;;  %v49_v30 = vld [vmem:[%s1043_s0 + $0x48] sm:$0xff]  ;;  %v67_v31 = vld [vmem:[%s1043_s0 + $0xd8] sm:$0xff]  ;;  %v50_v32 = vld [vmem:[%s1043_s0 + $0x50] sm:$0xff] }
  0x30   :  { %v68_v33 = vld [vmem:[%s1043_s0 + $0xe0] sm:$0xff]  ;;  %v51_v34 = vld [vmem:[%s1043_s0 + $0x58] sm:$0xff]  ;;  %v69_v35 = vld [vmem:[%s1043_s0 + $0xe8] sm:$0xff] }
  0x31   :  { %v52_v36 = vld [vmem:[%s1043_s0 + $0x60] sm:$0xff]  ;;  %v70_v37 = vld [vmem:[%s1043_s0 + $0xf0] sm:$0xff]  ;;  %v53_v38 = vld [vmem:[%s1043_s0 + $0x68] sm:$0xff] }
  0x32   :  { %656 = vmatpush3.bf16.msra.mxu0 %v653_v10  ;;  %667 = vmatpush3.bf16.msra.mxu1 %v653_v10  ;;  %v71_v39 = vld [vmem:[%s1043_s0 + $0xf8] sm:$0xff]  ;;  %v54_v40 = vld [vmem:[%s1043_s0 + $0x70] sm:$0xff]  ;;  %v72_v41 = vld [vmem:[%s1043_s0 + $0x100] sm:$0xff] }
  0x33   :  { %658 = vmatprep.subr.bf16.mxu0 %v657_v13  ;;  %664 = vmatprep.subr.bf16.mxu1 %v657_v13  ;;  %v55_v42 = vld [vmem:[%s1043_s0 + $0x78] sm:$0xff]  ;;  %v73_v43 = vld [vmem:[%s1043_s0 + $0x108] sm:$0xff]  ;;  %v56_v44 = vld [vmem:[%s1043_s0 + $0x80] sm:$0xff] }
  0x34   :  { %v57_v45 = vld [vmem:[%s1043_s0 + $0x88] sm:$0xff]  ;;  %v905_v46 = vld [vmem:[#allocation4] ss:$0 sm:$0xff] }
  0x36   :  { %660 = vmatpush3.bf16.msra.mxu0 %v657_v13  ;;  %668 = vmatpush3.bf16.msra.mxu1 %v657_v13 }
  0x39   :  { %595 = vmatmul.mubr.msk.f32.vlgmr.msra.gmra.mrb[0].mxu0 %vm89_vm0, %v41_v14  ;;  %622 = vmatmul.mubr.msk.f32.vlgmr.msra.gmra.mrb[0].mxu1 %vm89_vm0, %v59_v15 }
  0x3a   :  { %597 = vmatprep.mubr.msk.f32.mxu0 %vm89_vm0, %v42_v16  ;;  %624 = vmatprep.mubr.msk.f32.mxu1 %vm89_vm0, %v60_v17 }
  0x3d   :  { %598 = vmatmul.mubr.msk.f32.gmra.mrb[2].mxu0 %vm89_vm0, %v43_v18  ;;  %625 = vmatmul.mubr.msk.f32.gmra.mrb[2].mxu1 %vm89_vm0, %v61_v19 }
  0x3e   :  { %600 = vmatprep.mubr.msk.f32.mxu0 %vm89_vm0, %v44_v20  ;;  %627 = vmatprep.mubr.msk.f32.mxu1 %vm89_vm0, %v62_v21 }
  0x41   :  { %601 = vmatmul.mubr.msk.f32.gmra.mrb[4].mxu0 %vm89_vm0, %v45_v22  ;;  %628 = vmatmul.mubr.msk.f32.gmra.mrb[4].mxu1 %vm89_vm0, %v63_v23 }
  0x42   :  { %603 = vmatprep.mubr.msk.f32.mxu0 %vm89_vm0, %v46_v24  ;;  %630 = vmatprep.mubr.msk.f32.mxu1 %vm89_vm0, %v64_v25 }
  0x45   :  { %604 = vmatmul.mubr.msk.f32.gmra.mrb[6].mxu0 %vm89_vm0, %v47_v26  ;;  %631 = vmatmul.mubr.msk.f32.gmra.mrb[6].mxu1 %vm89_vm0, %v65_v27 }
  0x46   :  { %606 = vmatprep.mubr.msk.f32.mxu0 %vm89_vm0, %v48_v28  ;;  %633 = vmatprep.mubr.msk.f32.mxu1 %vm89_vm0, %v66_v29 }
  0x49   :  { %607 = vmatmul.mubr.msk.f32.gmra.mrb[8].mxu0 %vm89_vm0, %v49_v30  ;;  %634 = vmatmul.mubr.msk.f32.gmra.mrb[8].mxu1 %vm89_vm0, %v67_v31 }
  0x4a   :  { %609 = vmatprep.mubr.msk.f32.mxu0 %vm89_vm0, %v50_v32  ;;  %636 = vmatprep.mubr.msk.f32.mxu1 %vm89_vm0, %v68_v33 }
  0x4d   :  { %610 = vmatmul.mubr.msk.f32.gmra.mrb[10].mxu0 %vm89_vm0, %v51_v34  ;;  %637 = vmatmul.mubr.msk.f32.gmra.mrb[10].mxu1 %vm89_vm0, %v69_v35 }
  0x4e   :  { %612 = vmatprep.mubr.msk.f32.mxu0 %vm89_vm0, %v52_v36  ;;  %639 = vmatprep.mubr.msk.f32.mxu1 %vm89_vm0, %v70_v37 }
  0x51   :  { %613 = vmatmul.mubr.msk.f32.gmra.mrb[12].mxu0 %vm89_vm0, %v53_v38  ;;  %640 = vmatmul.mubr.msk.f32.gmra.mrb[12].mxu1 %vm89_vm0, %v71_v39 }
  0x52   :  { %615 = vmatprep.mubr.msk.f32.mxu0 %vm89_vm0, %v54_v40  ;;  %642 = vmatprep.mubr.msk.f32.mxu1 %vm89_vm0, %v72_v41 }
  0x55   :  { %616 = vmatmul.mubr.msk.f32.gmra.mrb[14].mxu0 %vm89_vm0, %v55_v42  ;;  %643 = vmatmul.mubr.msk.f32.gmra.mrb[14].mxu1 %vm89_vm0, %v73_v43 }
  0x56   :  { %618 = vmatprep.mubr.msk.f32.mxu0 %vm89_vm0, %v56_v44 }
  0x59   :  { %619 = vmatmul.mubr.msk.f32.gmra.mrb[16].mxu0 %vm89_vm0, %v57_v45 }
 0x10c   :  { %v596_v47 = vpop.f32.mrb[0].mxu0  ;;  %v623_v48 = vpop.f32.mrb[0].mxu1 }
 0x10d   :  { %v264_v49 = vadd.f32 %v596_v47, %v905_v46  ;;  %v258_v50 = vpop.f32.mrb[1].mxu0  ;;  %v354_v51 = vadd.f32 %v623_v48, %v905_v46  ;;  %v348_v52 = vpop.f32.mrb[1].mxu1 }
 0x10e   :  { %v259_v53 = vadd.f32 %v905_v46, %v258_v50  ;;  %v349_v54 = vadd.f32 %v905_v46, %v348_v52 }
 0x10f   :  { %v428_v55 = vmax.f32 %v264_v49, 0.0  ;;  %v446_v56 = vmax.f32 %v354_v51, 0.0 }
 0x110   :  { %v427_v57 = vmax.f32 %v259_v53, 0.0  ;;  %v599_v58 = vpop.f32.mrb[2].mxu0  ;;  %v445_v59 = vmax.f32 %v349_v54, 0.0  ;;  %v626_v60 = vpop.f32.mrb[2].mxu1 }
 0x111   :  { %462 = vst [vmem:[%s1046_s3 + $0x8] sm:$0xff] %v428_v55  ;;  %480 = vst [vmem:[%s1046_s3 + $0x98] sm:$0xff] %v446_v56  ;;  %v274_v61 = vadd.f32 %v599_v58, %v905_v46  ;;  %v268_v62 = vpop.f32.mrb[3].mxu0  ;;  %v364_v63 = vadd.f32 %v626_v60, %v905_v46  ;;  %v358_v0 = vpop.f32.mrb[3].mxu1 }
 0x112   :  { %461 = vst [vmem:[%s1046_s3] sm:$0xff] %v427_v57  ;;  %479 = vst [vmem:[%s1046_s3 + $0x90] sm:$0xff] %v445_v59  ;;  %v269_v1 = vadd.f32 %v905_v46, %v268_v62  ;;  %v359_v2 = vadd.f32 %v905_v46, %v358_v0 }
 0x113   :  { %v430_v3 = vmax.f32 %v274_v61, 0.0  ;;  %v448_v4 = vmax.f32 %v364_v63, 0.0 }
 0x114   :  { %v429_v5 = vmax.f32 %v269_v1, 0.0  ;;  %v602_v6 = vpop.f32.mrb[4].mxu0  ;;  %v447_v7 = vmax.f32 %v359_v2, 0.0  ;;  %v629_v8 = vpop.f32.mrb[4].mxu1 }
 0x115   :  { %464 = vst [vmem:[%s1046_s3 + $0x18] sm:$0xff] %v430_v3  ;;  %482 = vst [vmem:[%s1046_s3 + $0xa8] sm:$0xff] %v448_v4  ;;  %v284_v9 = vadd.f32 %v602_v6, %v905_v46  ;;  %v278_v10 = vpop.f32.mrb[5].mxu0  ;;  %v374_v11 = vadd.f32 %v629_v8, %v905_v46  ;;  %v368_v12 = vpop.f32.mrb[5].mxu1 }
 0x116   :  { %463 = vst [vmem:[%s1046_s3 + $0x10] sm:$0xff] %v429_v5  ;;  %481 = vst [vmem:[%s1046_s3 + $0xa0] sm:$0xff] %v447_v7  ;;  %v279_v13 = vadd.f32 %v905_v46, %v278_v10  ;;  %v369_v14 = vadd.f32 %v905_v46, %v368_v12 }
 0x117   :  { %v432_v15 = vmax.f32 %v284_v9, 0.0  ;;  %v450_v16 = vmax.f32 %v374_v11, 0.0 }
 0x118   :  { %v431_v17 = vmax.f32 %v279_v13, 0.0  ;;  %v605_v18 = vpop.f32.mrb[6].mxu0  ;;  %v449_v19 = vmax.f32 %v369_v14, 0.0  ;;  %v632_v20 = vpop.f32.mrb[6].mxu1 }
 0x119   :  { %466 = vst [vmem:[%s1046_s3 + $0x28] sm:$0xff] %v432_v15  ;;  %484 = vst [vmem:[%s1046_s3 + $0xb8] sm:$0xff] %v450_v16  ;;  %v294_v21 = vadd.f32 %v605_v18, %v905_v46  ;;  %v288_v22 = vpop.f32.mrb[7].mxu0  ;;  %v384_v23 = vadd.f32 %v632_v20, %v905_v46  ;;  %v378_v24 = vpop.f32.mrb[7].mxu1 }
 0x11a   :  { %465 = vst [vmem:[%s1046_s3 + $0x20] sm:$0xff] %v431_v17  ;;  %483 = vst [vmem:[%s1046_s3 + $0xb0] sm:$0xff] %v449_v19  ;;  %v289_v25 = vadd.f32 %v905_v46, %v288_v22  ;;  %v379_v26 = vadd.f32 %v905_v46, %v378_v24 }
 0x11b   :  { %v434_v27 = vmax.f32 %v294_v21, 0.0  ;;  %v452_v28 = vmax.f32 %v384_v23, 0.0 }
 0x11c   :  { %v433_v29 = vmax.f32 %v289_v25, 0.0  ;;  %v608_v30 = vpop.f32.mrb[8].mxu0  ;;  %v451_v31 = vmax.f32 %v379_v26, 0.0  ;;  %v635_v32 = vpop.f32.mrb[8].mxu1 }
 0x11d   :  { %468 = vst [vmem:[%s1046_s3 + $0x38] sm:$0xff] %v434_v27  ;;  %486 = vst [vmem:[%s1046_s3 + $0xc8] sm:$0xff] %v452_v28  ;;  %v304_v33 = vadd.f32 %v608_v30, %v905_v46  ;;  %v298_v34 = vpop.f32.mrb[9].mxu0  ;;  %v394_v35 = vadd.f32 %v635_v32, %v905_v46  ;;  %v388_v36 = vpop.f32.mrb[9].mxu1 }
 0x11e   :  { %467 = vst [vmem:[%s1046_s3 + $0x30] sm:$0xff] %v433_v29  ;;  %485 = vst [vmem:[%s1046_s3 + $0xc0] sm:$0xff] %v451_v31  ;;  %v299_v37 = vadd.f32 %v905_v46, %v298_v34  ;;  %v389_v38 = vadd.f32 %v905_v46, %v388_v36 }
 0x11f   :  { %v436_v39 = vmax.f32 %v304_v33, 0.0  ;;  %v454_v40 = vmax.f32 %v394_v35, 0.0 }
 0x120   :  { %v435_v41 = vmax.f32 %v299_v37, 0.0  ;;  %v611_v42 = vpop.f32.mrb[10].mxu0  ;;  %v453_v43 = vmax.f32 %v389_v38, 0.0  ;;  %v638_v44 = vpop.f32.mrb[10].mxu1 }
 0x121   :  { %470 = vst [vmem:[%s1046_s3 + $0x48] sm:$0xff] %v436_v39  ;;  %488 = vst [vmem:[%s1046_s3 + $0xd8] sm:$0xff] %v454_v40  ;;  %v314_v45 = vadd.f32 %v611_v42, %v905_v46  ;;  %v308_v47 = vpop.f32.mrb[11].mxu0  ;;  %v404_v48 = vadd.f32 %v638_v44, %v905_v46  ;;  %v398_v49 = vpop.f32.mrb[11].mxu1 }
 0x122   :  { %469 = vst [vmem:[%s1046_s3 + $0x40] sm:$0xff] %v435_v41  ;;  %487 = vst [vmem:[%s1046_s3 + $0xd0] sm:$0xff] %v453_v43  ;;  %v309_v50 = vadd.f32 %v905_v46, %v308_v47  ;;  %v399_v51 = vadd.f32 %v905_v46, %v398_v49 }
 0x123   :  { %v438_v52 = vmax.f32 %v314_v45, 0.0  ;;  %v456_v53 = vmax.f32 %v404_v48, 0.0 }
 0x124   :  { %v437_v54 = vmax.f32 %v309_v50, 0.0  ;;  %v614_v55 = vpop.f32.mrb[12].mxu0  ;;  %v455_v56 = vmax.f32 %v399_v51, 0.0  ;;  %v641_v57 = vpop.f32.mrb[12].mxu1 }
 0x125   :  { %472 = vst [vmem:[%s1046_s3 + $0x58] sm:$0xff] %v438_v52  ;;  %490 = vst [vmem:[%s1046_s3 + $0xe8] sm:$0xff] %v456_v53  ;;  %v324_v58 = vadd.f32 %v614_v55, %v905_v46  ;;  %v318_v59 = vpop.f32.mrb[13].mxu0  ;;  %v414_v60 = vadd.f32 %v641_v57, %v905_v46  ;;  %v408_v61 = vpop.f32.mrb[13].mxu1 }
 0x126   :  { %471 = vst [vmem:[%s1046_s3 + $0x50] sm:$0xff] %v437_v54  ;;  %489 = vst [vmem:[%s1046_s3 + $0xe0] sm:$0xff] %v455_v56  ;;  %v319_v62 = vadd.f32 %v905_v46, %v318_v59  ;;  %v409_v63 = vadd.f32 %v905_v46, %v408_v61 }
 0x127   :  { %v440_v0 = vmax.f32 %v324_v58, 0.0  ;;  %v458_v1 = vmax.f32 %v414_v60, 0.0 }
 0x128   :  { %v439_v2 = vmax.f32 %v319_v62, 0.0  ;;  %v617_v3 = vpop.f32.mrb[14].mxu0  ;;  %v457_v4 = vmax.f32 %v409_v63, 0.0  ;;  %v644_v5 = vpop.f32.mrb[14].mxu1 }
 0x129   :  { %474 = vst [vmem:[%s1046_s3 + $0x68] sm:$0xff] %v440_v0  ;;  %492 = vst [vmem:[%s1046_s3 + $0xf8] sm:$0xff] %v458_v1  ;;  %v334_v6 = vadd.f32 %v617_v3, %v905_v46  ;;  %v328_v7 = vpop.f32.mrb[15].mxu0  ;;  %v424_v8 = vadd.f32 %v644_v5, %v905_v46  ;;  %v418_v9 = vpop.f32.mrb[15].mxu1 }
 0x12a   :  { %473 = vst [vmem:[%s1046_s3 + $0x60] sm:$0xff] %v439_v2  ;;  %491 = vst [vmem:[%s1046_s3 + $0xf0] sm:$0xff] %v457_v4  ;;  %v329_v10 = vadd.f32 %v905_v46, %v328_v7  ;;  %v419_v11 = vadd.f32 %v905_v46, %v418_v9 }
 0x12b   :  { %v442_v12 = vmax.f32 %v334_v6, 0.0  ;;  %v460_v13 = vmax.f32 %v424_v8, 0.0 }
 0x12c   :  { %v441_v14 = vmax.f32 %v329_v10, 0.0  ;;  %v620_v15 = vpop.f32.mrb[16].mxu0  ;;  %v459_v16 = vmax.f32 %v419_v11, 0.0 }
 0x12d   :  { %476 = vst [vmem:[%s1046_s3 + $0x78] sm:$0xff] %v442_v12  ;;  %494 = vst [vmem:[%s1046_s3 + $0x108] sm:$0xff] %v460_v13  ;;  %v344_v17 = vadd.f32 %v620_v15, %v905_v46  ;;  %v338_v18 = vpop.f32.mrb[17].mxu0 }
 0x12e   :  { %475 = vst [vmem:[%s1046_s3 + $0x70] sm:$0xff] %v441_v14  ;;  %493 = vst [vmem:[%s1046_s3 + $0x100] sm:$0xff] %v459_v16  ;;  %v339_v19 = vadd.f32 %v905_v46, %v338_v18 }
 0x12f   :  { %v444_v20 = vmax.f32 %v344_v17, 0.0 }
 0x130   :  { %v443_v21 = vmax.f32 %v339_v19, 0.0 }
 0x131   :  { %478 = vst [vmem:[%s1046_s3 + $0x88] sm:$0xff] %v444_v20 }
 0x132   :  { %477 = vst [vmem:[%s1046_s3 + $0x80] sm:$0xff] %v443_v21 }
 0x133   :  { %499 = vsyncpa [#allocation3], 1 }
 0x134   :  { %500 = vsyncpa [#allocation5], 1 }

// kernel: smpl_regressor_forward.9
= control target key start
LH: loop header
LB: loop body
LE: loop exit
PB: predicated region body
PF: predicated region fallthrough
CT: control target
= control target key end

     0   :  { %8 = vsyncpa [#allocation3], 0  ;;  %s368_s0 = inlined_call_operand.vmem [shape: f32[15,128], index: 0, kind: input, shape index: {}]   ;;  %s369_s1 = inlined_call_operand.hbm [shape: f32[128,128], index: 1, kind: input, shape index: {}]   ;;  %s370_s2 = inlined_call_operand.hbm [shape: f32[1,128], index: 2, kind: input, shape index: {}]   ;;  %s371_s3 = inlined_call_operand.vmem [shape: f32[15,128], index: 3, kind: output, shape index: {}]  }
   0x1   :  { %9 = vsyncpa [#allocation5], 0  ;;  %s308_s12 = smov [#allocation2]   ;;  %s260_s16 = scalar_lea.hbm %s369_s1, 2048 }
   0x2   :  { %s17_s13 = sshll.u32 %s308_s12, 4  ;;  %p261_p0 = scmp.ne.s32.totalorder %s369_s1, %s260_s16  ;;  %s18_s13 = int_to_ptr.vmem [resolvable:$true] %s17_s13 }
   0x3   :  { %p264_p1 = scmp.lt.u32.totalorder %s260_s16, %s369_s1 }
   0x5   :  { %p266_p2 = pnand %p264_p1, %p261_p0 }
   0x7   :  { %269 = shalt.err (!%p266_p2)
}
   0x8   :  { %s270_s21 = scalar_lea.vmem %s18_s13, 2048  ;;  %p275_p4 = scmp.lt.s32.totalorder %s18_s13, %s18_s13 }
   0x9   :  { %p271_p3 = scmp.ne.s32.totalorder %s18_s13, %s270_s21  ;;  %p276_p5 = scmp.lt.s32.totalorder %s270_s21, %s270_s21 }
   0xb   :  { %p277_p6 = por %p276_p5, %p275_p4 }
   0xd   :  { %p278_p7 = pnand %p277_p6, %p271_p3 }
   0xf   :  { %281 = shalt.err (!%p278_p7)
}
  0x10   :  { %s309_s22 = smov 128   ;;  %s310_s23 = smov 8  }
  0x11   :  { %23 = dma.hbm_to_vmem [thread:$0]  %s369_s1, 2048, %s18_s13, [#allocation3], %s309_s22, %s309_s22, %s310_s23  }
  0x12   :  { %s311_s26 = smov [#allocation4]   ;;  %s282_s30 = scalar_lea.hbm %s370_s2, 16 }
  0x13   :  { %s30_s27 = sshll.u32 %s311_s26, 4  ;;  %p283_p8 = scmp.ne.s32.totalorder %s370_s2, %s282_s30  ;;  %s31_s27 = int_to_ptr.vmem [resolvable:$true] %s30_s27 }
  0x14   :  { %p286_p9 = scmp.lt.u32.totalorder %s282_s30, %s370_s2 }
  0x16   :  { %p288_p10 = pnand %p286_p9, %p283_p8 }
  0x18   :  { %291 = shalt.err (!%p288_p10)
}
  0x19   :  { %s292_s8 = scalar_lea.vmem %s31_s27, 16  ;;  %s296_s1 = scalar_lea.vmem %s31_s27, 32 }
  0x1a   :  { %p293_p11 = scmp.ne.s32.totalorder %s31_s27, %s292_s8  ;;  %p297_p12 = scmp.lt.s32.totalorder %s31_s27, %s31_s27 }
  0x1b   :  { %p298_p13 = scmp.lt.s32.totalorder %s296_s1, %s292_s8 }
  0x1d   :  { %p299_p0 = por %p298_p13, %p297_p12 }
  0x1f   :  { %p300_p1 = pnand %p299_p0, %p293_p11 }
  0x21   :  { %303 = shalt.err (!%p300_p1)
}
  0x22   :  { %33 = dma.hbm_to_vmem [thread:$0]  %s370_s2, 16, %s31_s27, [#allocation5]  }
  0x23   :  { %304 = dma.done.wait [#allocation3], 2048  }
  0x24   :  { %305 = vsyncadd [#allocation3], 4294965248 }
  0x25   :  { %306 = dma.done.wait [#allocation5], 16  }
  0x26   :  { %307 = vsyncadd [#allocation5], 4294967280  ;;  %v42_v0 = vld [vmem:[#allocation2] sm:$0xff]  ;;  %v43_v1 = vld [vmem:[#allocation2 + $0x8] sm:$0xff] }
  0x27   :  { %v44_v2 = vld [vmem:[#allocation2 + $0x10] sm:$0xff]  ;;  %v220_v3 = vpack.c.bf16 %v43_v1, %v42_v0  ;;  %v45_v4 = vld [vmem:[#allocation2 + $0x18] sm:$0xff]  ;;  %v46_v6 = vld [vmem:[#allocation2 + $0x20] sm:$0xff] }
  0x28   :  { %v224_v5 = vpack.c.bf16 %v45_v4, %v44_v2  ;;  %v47_v7 = vld [vmem:[#allocation2 + $0x28] sm:$0xff]  ;;  %v40_v9 = vld [vmem:[%s368_s0] sm:$0xff]  ;;  %v48_v10 = vld [vmem:[#allocation2 + $0x30] sm:$0xff] }
  0x29   :  { %221 = vmatprep.subr.bf16.mxu0 %v220_v3  ;;  %v228_v8 = vpack.c.bf16 %v47_v7, %v46_v6  ;;  %v49_v11 = vld [vmem:[#allocation2 + $0x38] sm:$0xff]  ;;  %217 = vmatprep.mubr.f32.mxu0 %v40_v9  ;;  %v50_v13 = vld [vmem:[#allocation2 + $0x40] sm:$0xff]  ;;  %v51_v14 = vld [vmem:[#allocation2 + $0x48] sm:$0xff] }
  0x2a   :  { %223 = vmatpush3.bf16.msra.mxu0 %v220_v3  ;;  %v232_v12 = vpack.c.bf16 %v49_v11, %v48_v10  ;;  %v236_v15 = vpack.c.bf16 %v51_v14, %v50_v13  ;;  %v52_v16 = vld [vmem:[#allocation2 + $0x50] sm:$0xff]  ;;  %v53_v17 = vld [vmem:[#allocation2 + $0x58] sm:$0xff]  ;;  %v54_v19 = vld [vmem:[#allocation2 + $0x60] sm:$0xff] }
  0x2b   :  { %225 = vmatprep.subr.bf16.mxu0 %v224_v5  ;;  %v240_v18 = vpack.c.bf16 %v53_v17, %v52_v16  ;;  %v55_v20 = vld [vmem:[#allocation2 + $0x68] sm:$0xff]  ;;  %v56_v22 = vld [vmem:[#allocation2 + $0x70] sm:$0xff]  ;;  %v57_v23 = vld [vmem:[#allocation2 + $0x78] sm:$0xff] }
  0x2c   :  { %v244_v21 = vpack.c.bf16 %v55_v20, %v54_v19  ;;  %v248_v24 = vpack.c.bf16 %v57_v23, %v56_v22  ;;  %v41_v25 = vld [vmem:[%s368_s0 + $0x8] sm:$0x7f]  ;;  %v166_v26 = vld [vmem:[#allocation4] ss:$0 sm:$0xff] }
  0x2e   :  { %227 = vmatpush3.bf16.msra.mxu0 %v224_v5 }
  0x2f   :  { %229 = vmatprep.subr.bf16.mxu0 %v228_v8 }
  0x32   :  { %231 = vmatpush3.bf16.msra.mxu0 %v228_v8 }
  0x33   :  { %233 = vmatprep.subr.bf16.mxu0 %v232_v12 }
  0x36   :  { %235 = vmatpush3.bf16.msra.mxu0 %v232_v12 }
  0x37   :  { %237 = vmatprep.subr.bf16.mxu0 %v236_v15 }
  0x3a   :  { %239 = vmatpush3.bf16.msra.mxu0 %v236_v15 }
  0x3b   :  { %241 = vmatprep.subr.bf16.mxu0 %v240_v18 }
  0x3e   :  { %243 = vmatpush3.bf16.msra.mxu0 %v240_v18 }
  0x3f   :  { %245 = vmatprep.subr.bf16.mxu0 %v244_v21 }
  0x42   :  { %247 = vmatpush3.bf16.msra.mxu0 %v244_v21 }
  0x43   :  { %249 = vmatprep.subr.bf16.mxu0 %v248_v24 }
  0x46   :  { %251 = vmatpush3.bf16.msra.mxu0 %v248_v24 }
  0x49   :  { %218 = vmatmul.mubr.f32.vlgmr.msra.gmra.mrb[0].mxu0 %v41_v25 }
 0x11c   :  { %v219_v27 = vpop.f32.mrb[0].mxu0 }
 0x11d   :  { %v137_v28 = vadd.f32 %v219_v27, %v166_v26  ;;  %v131_v29 = vpop.f32.mrb[1].mxu0 }
 0x11e   :  { %v132_v30 = vadd.f32 %v166_v26, %v131_v29 }
 0x11f   :  { %v143_v31 = vmul.f32 0.044715, %v137_v28  ;;  %v141_v43 = vmul.f32 0.5, %v137_v28 }
 0x120   :  { %v142_v32 = vmul.f32 0.044715, %v132_v30  ;;  %v140_v45 = vmul.f32 0.5, %v132_v30 }
 0x121   :  { %v145_v33 = vmul.f32 %v143_v31, %v137_v28 }
 0x122   :  { %v144_v34 = vmul.f32 %v142_v32, %v132_v30 }
 0x123   :  { %v147_v35 = vmul.f32 %v145_v33, %v137_v28 }
 0x124   :  { %v146_v36 = vmul.f32 %v144_v34, %v132_v30 }
 0x125   :  { %v149_v37 = vadd.f32 %v147_v35, %v137_v28 }
 0x126   :  { %v148_v38 = vadd.f32 %v146_v36, %v132_v30 }
 0x127   :  { %v151_v39 = vmul.f32 0.7978846, %v149_v37 }
 0x128   :  { %v150_v40 = vmul.f32 0.7978846, %v148_v38 }
 0x129   :  { %256 = vtanh.f32 %v151_v39 }
 0x12a   :  { %258 = vtanh.f32 %v150_v40 }
 0x133   :  { %v257_v41 = vpop.eup %256 }
 0x134   :  { %v259_v42 = vpop.eup %258  ;;  %v155_v44 = vadd.f32 1.0, %v257_v41 }
 0x135   :  { %v154_v46 = vadd.f32 1.0, %v259_v42 }
 0x136   :  { %v157_v47 = vmul.f32 %v155_v44, %v141_v43 }
 0x137   :  { %v156_v48 = vmul.f32 %v154_v46, %v140_v45 }
 0x138   :  { %159 = vst [vmem:[%s371_s3 + $0x8] sm:$0x7f] %v157_v47 }
 0x139   :  { %158 = vst [vmem:[%s371_s3] sm:$0xff] %v156_v48 }
 0x13a   :  { %164 = vsyncpa [#allocation3], 1 }
 0x13b   :  { %165 = vsyncpa [#allocation5], 1 }

// kernel: smpl_regressor_forward.10
= control target key start
LH: loop header
LB: loop body
LE: loop exit
PB: predicated region body
PF: predicated region fallthrough
CT: control target
= control target key end

     0   :  { %8 = vsyncpa [#allocation3], 0  ;;  %s866_s0 = inlined_call_operand.vmem [shape: f32[128,15], index: 0, kind: input, shape index: {}]   ;;  %s867_s1 = inlined_call_operand.hbm [shape: f32[15,128], index: 1, kind: input, shape index: {}]   ;;  %s868_s2 = inlined_call_operand.hbm [shape: f32[1,128], index: 2, kind: input, shape index: {}]   ;;  %s869_s3 = inlined_call_operand.vmem [shape: f32[128,128], index: 3, kind: output, shape index: {}]  }
   0x1   :  { %9 = vsyncpa [#allocation5], 0  ;;  %s586_s12 = smov [#allocation2]   ;;  %s538_s16 = scalar_lea.hbm %s867_s1, 256 }
   0x2   :  { %s17_s13 = sshll.u32 %s586_s12, 4  ;;  %p539_p0 = scmp.ne.s32.totalorder %s867_s1, %s538_s16  ;;  %s18_s13 = int_to_ptr.vmem [resolvable:$true] %s17_s13 }
   0x3   :  { %p542_p1 = scmp.lt.u32.totalorder %s538_s16, %s867_s1 }
   0x5   :  { %p544_p2 = pnand %p542_p1, %p539_p0 }
   0x7   :  { %547 = shalt.err (!%p544_p2)
}
   0x8   :  { %s548_s21 = scalar_lea.vmem %s18_s13, 256  ;;  %p553_p4 = scmp.lt.s32.totalorder %s18_s13, %s18_s13 }
   0x9   :  { %p549_p3 = scmp.ne.s32.totalorder %s18_s13, %s548_s21  ;;  %p554_p5 = scmp.lt.s32.totalorder %s548_s21, %s548_s21 }
   0xb   :  { %p555_p6 = por %p554_p5, %p553_p4 }
   0xd   :  { %p556_p7 = pnand %p555_p6, %p549_p3 }
   0xf   :  { %559 = shalt.err (!%p556_p7)
}
  0x10   :  { %s587_s22 = smov 128   ;;  %s588_s23 = smov 8  }
  0x11   :  { %23 = dma.hbm_to_vmem [thread:$0]  %s867_s1, 256, %s18_s13, [#allocation3], %s587_s22, %s587_s22, %s588_s23  }
  0x12   :  { %s589_s26 = smov [#allocation4]   ;;  %s560_s30 = scalar_lea.hbm %s868_s2, 16 }
  0x13   :  { %s30_s27 = sshll.u32 %s589_s26, 4  ;;  %p561_p8 = scmp.ne.s32.totalorder %s868_s2, %s560_s30  ;;  %s31_s27 = int_to_ptr.vmem [resolvable:$true] %s30_s27 }
  0x14   :  { %p564_p9 = scmp.lt.u32.totalorder %s560_s30, %s868_s2 }
  0x16   :  { %p566_p10 = pnand %p564_p9, %p561_p8 }
  0x18   :  { %569 = shalt.err (!%p566_p10)
}
  0x19   :  { %s570_s8 = scalar_lea.vmem %s31_s27, 16  ;;  %s574_s1 = scalar_lea.vmem %s31_s27, 32 }
  0x1a   :  { %p571_p11 = scmp.ne.s32.totalorder %s31_s27, %s570_s8  ;;  %p575_p12 = scmp.lt.s32.totalorder %s31_s27, %s31_s27 }
  0x1b   :  { %p576_p13 = scmp.lt.s32.totalorder %s574_s1, %s570_s8 }
  0x1d   :  { %p577_p0 = por %p576_p13, %p575_p12 }
  0x1f   :  { %p578_p1 = pnand %p577_p0, %p571_p11 }
  0x21   :  { %581 = shalt.err (!%p578_p1)
}
  0x22   :  { %33 = dma.hbm_to_vmem [thread:$0]  %s868_s2, 16, %s31_s27, [#allocation5]  }
  0x23   :  { %582 = dma.done.wait [#allocation3], 256  }
  0x24   :  { %583 = vsyncadd [#allocation3], 4294967040 }
  0x25   :  { %584 = dma.done.wait [#allocation5], 16  }
  0x26   :  { %585 = vsyncadd [#allocation5], 4294967280  ;;  %vm114_vm0 = vcmask 1046528   ;;  %vm65_vm1 = vcmask 121856   ;;  %vm590_vm2 = vmmov 1   ;;  %v56_v0 = vld [vmem:[#allocation2] sm:$0xff] }
  0x27   :  { %vm494_vm3 = vmpackc.low %vm114_vm0, %vm590_vm2  ;;  %v57_v1 = vld [vmem:[#allocation2 + $0x8] sm:$0x7f]  ;;  %v40_v2 = vld [vmem:[%s866_s0] sm:$0xff] }
  0x28   :  { %v493_v3 = vpack.c.bf16 %v57_v1, %v56_v0  ;;  %469 = vmatprep.mubr.msk.f32.mxu0 %vm65_vm1, %v40_v2  ;;  %v48_v4 = vld [vmem:[%s866_s0 + $0x40] sm:$0xff]  ;;  %v41_v5 = vld [vmem:[%s866_s0 + $0x8] sm:$0xff]  ;;  %v42_v7 = vld [vmem:[%s866_s0 + $0x10] sm:$0xff] }
  0x29   :  { %481 = vmatprep.mubr.msk.f32.mxu1 %vm65_vm1, %v48_v4  ;;  %v49_v6 = vld [vmem:[%s866_s0 + $0x48] sm:$0xff]  ;;  %v50_v8 = vld [vmem:[%s866_s0 + $0x50] sm:$0xff]  ;;  %v43_v9 = vld [vmem:[%s866_s0 + $0x18] sm:$0xff] }
  0x2a   :  { %495 = vmatprep.subr.msk.bf16.mxu0 %vm494_vm3, %v493_v3  ;;  %499 = vmatprep.subr.msk.bf16.mxu1 %vm494_vm3, %v493_v3  ;;  %v51_v10 = vld [vmem:[%s866_s0 + $0x58] sm:$0xff]  ;;  %v44_v11 = vld [vmem:[%s866_s0 + $0x20] sm:$0xff]  ;;  %v45_v13 = vld [vmem:[%s866_s0 + $0x28] sm:$0xff] }
  0x2b   :  { %498 = vmatpush3.bf16.msk.msra.mxu0 %vm494_vm3, %v493_v3  ;;  %500 = vmatpush3.bf16.msk.msra.mxu1 %vm494_vm3, %v493_v3  ;;  %v52_v12 = vld [vmem:[%s866_s0 + $0x60] sm:$0xff]  ;;  %v53_v14 = vld [vmem:[%s866_s0 + $0x68] sm:$0xff]  ;;  %v46_v15 = vld [vmem:[%s866_s0 + $0x30] sm:$0xff] }
  0x2c   :  { %v54_v16 = vld [vmem:[%s866_s0 + $0x70] sm:$0xff]  ;;  %v47_v17 = vld [vmem:[%s866_s0 + $0x38] sm:$0xff] }
  0x2d   :  { %v55_v18 = vld [vmem:[%s866_s0 + $0x78] sm:$0xff]  ;;  %v699_v19 = vld [vmem:[#allocation4] ss:$0 sm:$0xff] }
  0x2e   :  { %470 = vmatmul.mubr.msk.f32.vlgmr.msra.gmra.mrb[0].mxu0 %vm65_vm1, %v41_v5  ;;  %482 = vmatmul.mubr.msk.f32.vlgmr.msra.gmra.mrb[0].mxu1 %vm65_vm1, %v49_v6 }
  0x2f   :  { %472 = vmatprep.mubr.msk.f32.mxu0 %vm65_vm1, %v42_v7  ;;  %484 = vmatprep.mubr.msk.f32.mxu1 %vm65_vm1, %v50_v8 }
  0x32   :  { %473 = vmatmul.mubr.msk.f32.gmra.mrb[2].mxu0 %vm65_vm1, %v43_v9  ;;  %485 = vmatmul.mubr.msk.f32.gmra.mrb[2].mxu1 %vm65_vm1, %v51_v10 }
  0x33   :  { %475 = vmatprep.mubr.msk.f32.mxu0 %vm65_vm1, %v44_v11  ;;  %487 = vmatprep.mubr.msk.f32.mxu1 %vm65_vm1, %v52_v12 }
  0x36   :  { %476 = vmatmul.mubr.msk.f32.gmra.mrb[4].mxu0 %vm65_vm1, %v45_v13  ;;  %488 = vmatmul.mubr.msk.f32.gmra.mrb[4].mxu1 %vm65_vm1, %v53_v14 }
  0x37   :  { %478 = vmatprep.mubr.msk.f32.mxu0 %vm65_vm1, %v46_v15  ;;  %490 = vmatprep.mubr.msk.f32.mxu1 %vm65_vm1, %v54_v16 }
  0x3a   :  { %479 = vmatmul.mubr.msk.f32.gmra.mrb[6].mxu0 %vm65_vm1, %v47_v17  ;;  %491 = vmatmul.mubr.msk.f32.gmra.mrb[6].mxu1 %vm65_vm1, %v55_v18 }
 0x101   :  { %v471_v20 = vpop.f32.mrb[0].mxu0  ;;  %v483_v21 = vpop.f32.mrb[0].mxu1 }
 0x102   :  { %v190_v22 = vadd.f32 %v471_v20, %v699_v19  ;;  %v230_v23 = vadd.f32 %v483_v21, %v699_v19  ;;  %v184_v24 = vpop.f32.mrb[1].mxu0  ;;  %v224_v25 = vpop.f32.mrb[1].mxu1 }
 0x103   :  { %v704_v26 = vadd.f32 %v699_v19, %v184_v24  ;;  %v707_v27 = vadd.f32 %v699_v19, %v224_v25 }
 0x104   :  { %v280_v28 = vmul.f32 0.044715, %v190_v22  ;;  %v288_v29 = vmul.f32 0.044715, %v230_v23  ;;  %v264_v15 = vmul.f32 0.5, %v190_v22  ;;  %v272_v18 = vmul.f32 0.5, %v230_v23 }
 0x105   :  { %v279_v30 = vmul.f32 0.044715, %v704_v26  ;;  %v287_v31 = vmul.f32 0.044715, %v707_v27  ;;  %v474_v34 = vpop.f32.mrb[2].mxu0  ;;  %v486_v35 = vpop.f32.mrb[2].mxu1 }
 0x106   :  { %v296_v32 = vmul.f32 %v280_v28, %v190_v22  ;;  %v304_v33 = vmul.f32 %v288_v29, %v230_v23  ;;  %v714_v38 = vadd.f32 %v474_v34, %v699_v19  ;;  %v717_v39 = vadd.f32 %v486_v35, %v699_v19  ;;  %v194_v40 = vpop.f32.mrb[3].mxu0  ;;  %v234_v41 = vpop.f32.mrb[3].mxu1 }
 0x107   :  { %v295_v36 = vmul.f32 %v279_v30, %v704_v26  ;;  %v303_v37 = vmul.f32 %v287_v31, %v707_v27  ;;  %v720_v44 = vadd.f32 %v699_v19, %v194_v40  ;;  %v727_v53 = vadd.f32 %v699_v19, %v234_v41 }
 0x108   :  { %v312_v42 = vmul.f32 %v296_v32, %v190_v22  ;;  %v320_v43 = vmul.f32 %v304_v33, %v230_v23  ;;  %v282_v47 = vmul.f32 0.044715, %v714_v38  ;;  %v290_v52 = vmul.f32 0.044715, %v717_v39 }
 0x109   :  { %v311_v45 = vmul.f32 %v295_v36, %v704_v26  ;;  %v319_v46 = vmul.f32 %v303_v37, %v707_v27  ;;  %v477_v48 = vpop.f32.mrb[4].mxu0  ;;  %v489_v49 = vpop.f32.mrb[4].mxu1  ;;  %v281_v62 = vmul.f32 0.044715, %v720_v44  ;;  %v289_v5 = vmul.f32 0.044715, %v727_v53 }
 0x10a   :  { %v328_v50 = vadd.f32 %v312_v42, %v190_v22  ;;  %v336_v51 = vadd.f32 %v320_v43, %v230_v23  ;;  %v204_v54 = vpop.f32.mrb[5].mxu0  ;;  %v244_v55 = vpop.f32.mrb[5].mxu1  ;;  %v298_v58 = vmul.f32 %v282_v47, %v714_v38  ;;  %v306_v61 = vmul.f32 %v290_v52, %v717_v39 }
 0x10b   :  { %v327_v56 = vadd.f32 %v311_v45, %v704_v26  ;;  %v335_v57 = vadd.f32 %v319_v46, %v707_v27  ;;  %v297_v4 = vmul.f32 %v281_v62, %v720_v44  ;;  %v740_v9 = vadd.f32 %v477_v48, %v699_v19 }
 0x10c   :  { %v344_v59 = vmul.f32 0.7978846, %v328_v50  ;;  %v352_v60 = vmul.f32 0.7978846, %v336_v51  ;;  %v314_v1 = vmul.f32 %v298_v58, %v714_v38  ;;  %v322_v3 = vmul.f32 %v306_v61, %v717_v39 }
 0x10d   :  { %v343_v63 = vmul.f32 0.7978846, %v327_v56  ;;  %v351_v0 = vmul.f32 0.7978846, %v335_v57  ;;  %v480_v2 = vpop.f32.mrb[6].mxu0  ;;  %v492_v6 = vpop.f32.mrb[6].mxu1  ;;  %v743_v10 = vadd.f32 %v489_v49, %v699_v19  ;;  %v313_v13 = vmul.f32 %v297_v4, %v720_v44 }
 0x10e   :  { %506 = vtanh.f32 %v344_v59  ;;  %v214_v7 = vpop.f32.mrb[7].mxu0  ;;  %v330_v8 = vadd.f32 %v314_v1, %v714_v38  ;;  %v745_v11 = vpop.f32.mrb[7].mxu1  ;;  %v338_v12 = vadd.f32 %v322_v3, %v717_v39  ;;  %v305_v14 = vmul.f32 %v289_v5, %v727_v53 }
 0x10f   :  { %508 = vtanh.f32 %v352_v60  ;;  %v284_v17 = vmul.f32 0.044715, %v740_v9  ;;  %v329_v21 = vadd.f32 %v313_v13, %v720_v44  ;;  %v292_v28 = vmul.f32 0.044715, %v743_v10 }
 0x110   :  { %510 = vtanh.f32 %v343_v63  ;;  %v346_v16 = vmul.f32 0.7978846, %v330_v8  ;;  %v354_v20 = vmul.f32 0.7978846, %v338_v12  ;;  %v321_v24 = vmul.f32 %v305_v14, %v727_v53 }
 0x111   :  { %512 = vtanh.f32 %v351_v0  ;;  %v300_v25 = vmul.f32 %v284_v17, %v740_v9  ;;  %v756_v29 = vadd.f32 %v699_v19, %v204_v54  ;;  %v345_v22 = vmul.f32 0.7978846, %v329_v21 }
 0x112   :  { %514 = vtanh.f32 %v346_v16  ;;  %v337_v30 = vadd.f32 %v321_v24, %v727_v53  ;;  %v760_v31 = vadd.f32 %v699_v19, %v244_v55  ;;  %v263_v23 = vmul.f32 0.5, %v704_v26 }
 0x113   :  { %516 = vtanh.f32 %v354_v20  ;;  %v316_v32 = vmul.f32 %v300_v25, %v740_v9  ;;  %v308_v33 = vmul.f32 %v292_v28, %v743_v10  ;;  %v283_v34 = vmul.f32 0.044715, %v756_v29 }
 0x114   :  { %v271_v35 = vmul.f32 0.5, %v707_v27  ;;  %518 = vtanh.f32 %v345_v22  ;;  %v353_v36 = vmul.f32 0.7978846, %v337_v30  ;;  %v291_v37 = vmul.f32 0.044715, %v760_v31 }
 0x115   :  { %v332_v40 = vadd.f32 %v316_v32, %v740_v9  ;;  %v324_v41 = vmul.f32 %v308_v33, %v743_v10  ;;  %v299_v42 = vmul.f32 %v283_v34, %v756_v29  ;;  %v772_v26 = vadd.f32 %v480_v2, %v699_v19 }
 0x116   :  { %v266_v45 = vmul.f32 0.5, %v714_v38  ;;  %520 = vtanh.f32 %v353_v36  ;;  %v307_v46 = vmul.f32 %v291_v37, %v760_v31  ;;  %v777_v27 = vadd.f32 %v492_v6, %v699_v19 }
 0x117   :  { %v348_v49 = vmul.f32 0.7978846, %v332_v40  ;;  %v340_v50 = vadd.f32 %v324_v41, %v743_v10  ;;  %v315_v51 = vmul.f32 %v299_v42, %v756_v29  ;;  %v286_v56 = vmul.f32 0.044715, %v772_v26 }
 0x118   :  { %v507_v43 = vpop.eup %506  ;;  %v323_v55 = vmul.f32 %v307_v46, %v760_v31  ;;  %v784_v38 = vadd.f32 %v699_v19, %v214_v7  ;;  %v274_v3 = vmul.f32 0.5, %v717_v39  ;;  %v265_v14 = vmul.f32 0.5, %v720_v44 }
 0x119   :  { %v509_v47 = vpop.eup %508  ;;  %v376_v48 = vadd.f32 1.0, %v507_v43  ;;  %522 = vtanh.f32 %v348_v49  ;;  %v356_v60 = vmul.f32 0.7978846, %v340_v50  ;;  %v331_v63 = vadd.f32 %v315_v51, %v756_v29 }
 0x11a   :  { %v511_v52 = vpop.eup %510  ;;  %v384_v54 = vadd.f32 1.0, %v509_v47  ;;  %v339_v0 = vadd.f32 %v323_v55, %v760_v31  ;;  %v302_v4 = vmul.f32 %v286_v56, %v772_v26  ;;  %v808_v20 = vadd.f32 %v699_v19, %v745_v11 }
 0x11b   :  { %v513_v57 = vpop.eup %512  ;;  %v392_v58 = vmul.f32 %v376_v48, %v264_v15  ;;  %v375_v59 = vadd.f32 1.0, %v511_v52  ;;  %524 = vtanh.f32 %v356_v60  ;;  %v347_v8 = vmul.f32 0.7978846, %v331_v63 }
 0x11c   :  { %v400_v61 = vmul.f32 %v384_v54, %v272_v18  ;;  %v383_v62 = vadd.f32 1.0, %v513_v57  ;;  %v515_v1 = vpop.eup %514  ;;  %v355_v12 = vmul.f32 0.7978846, %v339_v0  ;;  %v318_v39 = vmul.f32 %v302_v4, %v772_v26 }
 0x11d   :  { %408 = vst [vmem:[%s869_s3 + $0x8] sm:$0xff] %v392_v58  ;;  %v391_v2 = vmul.f32 %v375_v59, %v263_v23  ;;  %v517_v5 = vpop.eup %516  ;;  %v378_v7 = vadd.f32 1.0, %v515_v1  ;;  %v294_v15 = vmul.f32 0.044715, %v777_v27  ;;  %526 = vtanh.f32 %v347_v8 }
 0x11e   :  { %416 = vst [vmem:[%s869_s3 + $0x48] sm:$0xff] %v400_v61  ;;  %v399_v6 = vmul.f32 %v383_v62, %v271_v35  ;;  %v386_v13 = vadd.f32 1.0, %v517_v5  ;;  %v519_v16 = vpop.eup %518  ;;  %v285_v18 = vmul.f32 0.044715, %v784_v38  ;;  %528 = vtanh.f32 %v355_v12 }
 0x11f   :  { %407 = vst [vmem:[%s869_s3] sm:$0xff] %v391_v2  ;;  %v394_v17 = vmul.f32 %v378_v7, %v266_v45  ;;  %v377_v24 = vadd.f32 1.0, %v519_v16  ;;  %v334_v44 = vadd.f32 %v318_v39, %v772_v26  ;;  %v310_v28 = vmul.f32 %v294_v15, %v777_v27 }
 0x120   :  { %415 = vst [vmem:[%s869_s3 + $0x40] sm:$0xff] %v399_v6  ;;  %v402_v21 = vmul.f32 %v386_v13, %v274_v3  ;;  %v521_v25 = vpop.eup %520  ;;  %v301_v22 = vmul.f32 %v285_v18, %v784_v38  ;;  %v293_v30 = vmul.f32 0.044715, %v808_v20  ;;  %v273_v11 = vmul.f32 0.5, %v727_v53 }
 0x121   :  { %410 = vst [vmem:[%s869_s3 + $0x18] sm:$0xff] %v394_v17  ;;  %v393_v19 = vmul.f32 %v377_v24, %v265_v14  ;;  %v385_v23 = vadd.f32 1.0, %v521_v25  ;;  %v350_v32 = vmul.f32 0.7978846, %v334_v44  ;;  %v326_v33 = vmul.f32 %v310_v28, %v777_v27 }
 0x122   :  { %418 = vst [vmem:[%s869_s3 + $0x58] sm:$0xff] %v402_v21  ;;  %v317_v34 = vmul.f32 %v301_v22, %v784_v38  ;;  %v309_v35 = vmul.f32 %v293_v30, %v808_v20  ;;  %v268_v40 = vmul.f32 0.5, %v740_v9  ;;  %v276_v46 = vmul.f32 0.5, %v743_v10 }
 0x123   :  { %v523_v36 = vpop.eup %522  ;;  %409 = vst [vmem:[%s869_s3 + $0x10] sm:$0xff] %v393_v19  ;;  %v401_v37 = vmul.f32 %v385_v23, %v273_v11  ;;  %530 = vtanh.f32 %v350_v32  ;;  %v342_v53 = vadd.f32 %v326_v33, %v777_v27  ;;  %v267_v55 = vmul.f32 0.5, %v756_v29 }
 0x124   :  { %v380_v41 = vadd.f32 1.0, %v523_v36  ;;  %v333_v42 = vadd.f32 %v317_v34, %v784_v38  ;;  %v325_v43 = vmul.f32 %v309_v35, %v808_v20  ;;  %v275_v10 = vmul.f32 0.5, %v760_v31 }
 0x125   :  { %v525_v45 = vpop.eup %524  ;;  %417 = vst [vmem:[%s869_s3 + $0x50] sm:$0xff] %v401_v37  ;;  %v358_v49 = vmul.f32 0.7978846, %v342_v53  ;;  %v270_v29 = vmul.f32 0.5, %v772_v26  ;;  %v278_v1 = vmul.f32 0.5, %v777_v27  ;;  %v269_v3 = vmul.f32 0.5, %v784_v38 }
 0x126   :  { %v396_v47 = vmul.f32 %v380_v41, %v268_v40  ;;  %v388_v48 = vadd.f32 1.0, %v525_v45  ;;  %v349_v50 = vmul.f32 0.7978846, %v333_v42  ;;  %v341_v9 = vadd.f32 %v325_v43, %v808_v20 }
 0x127   :  { %v527_v51 = vpop.eup %526  ;;  %532 = vtanh.f32 %v358_v49  ;;  %v277_v8 = vmul.f32 0.5, %v808_v20 }
 0x128   :  { %412 = vst [vmem:[%s869_s3 + $0x28] sm:$0xff] %v396_v47  ;;  %v404_v52 = vmul.f32 %v388_v48, %v276_v46  ;;  %v529_v54 = vpop.eup %528  ;;  %v379_v56 = vadd.f32 1.0, %v527_v51  ;;  %534 = vtanh.f32 %v349_v50  ;;  %v357_v57 = vmul.f32 0.7978846, %v341_v9 }
 0x129   :  { %v387_v58 = vadd.f32 1.0, %v529_v54 }
 0x12a   :  { %420 = vst [vmem:[%s869_s3 + $0x68] sm:$0xff] %v404_v52  ;;  %v395_v59 = vmul.f32 %v379_v56, %v267_v55  ;;  %536 = vtanh.f32 %v357_v57 }
 0x12b   :  { %v403_v60 = vmul.f32 %v387_v58, %v275_v10 }
 0x12c   :  { %411 = vst [vmem:[%s869_s3 + $0x20] sm:$0xff] %v395_v59 }
 0x12d   :  { %v531_v61 = vpop.eup %530  ;;  %419 = vst [vmem:[%s869_s3 + $0x60] sm:$0xff] %v403_v60 }
 0x12e   :  { %v382_v62 = vadd.f32 1.0, %v531_v61 }
 0x130   :  { %v398_v63 = vmul.f32 %v382_v62, %v270_v29 }
 0x131   :  { %v533_v0 = vpop.eup %532 }
 0x132   :  { %414 = vst [vmem:[%s869_s3 + $0x38] sm:$0xff] %v398_v63  ;;  %v535_v31 = vpop.eup %534  ;;  %v390_v2 = vadd.f32 1.0, %v533_v0 }
 0x133   :  { %v381_v4 = vadd.f32 1.0, %v535_v31 }
 0x134   :  { %v537_v5 = vpop.eup %536  ;;  %v406_v6 = vmul.f32 %v390_v2, %v278_v1 }
 0x135   :  { %v397_v7 = vmul.f32 %v381_v4, %v269_v3  ;;  %v389_v26 = vadd.f32 1.0, %v537_v5 }
 0x136   :  { %422 = vst [vmem:[%s869_s3 + $0x78] sm:$0xff] %v406_v6 }
 0x137   :  { %413 = vst [vmem:[%s869_s3 + $0x30] sm:$0xff] %v397_v7  ;;  %v405_v12 = vmul.f32 %v389_v26, %v277_v8 }
 0x139   :  { %421 = vst [vmem:[%s869_s3 + $0x70] sm:$0xff] %v405_v12 }
 0x13a   :  { %427 = vsyncpa [#allocation3], 1 }
 0x13b   :  { %428 = vsyncpa [#allocation5], 1 }

// kernel: smpl_regressor_forward.11
= control target key start
LH: loop header
LB: loop body
LE: loop exit
PB: predicated region body
PF: predicated region fallthrough
CT: control target
= control target key end

     0   :  { %s3672_s1 = inlined_call_operand.vmem [shape: f32[2176,256], index: 1, kind: input, shape index: {}]   ;;  %s3673_s0 = inlined_call_operand.vmem [shape: f32[16,2176], index: 0, kind: input, shape index: {}]   ;;  %s3674_s2 = inlined_call_operand.vmem [shape: f32[1,256], index: 2, kind: input, shape index: {}]   ;;  %s3675_s3 = inlined_call_operand.vmem [shape: f32[16,256], index: 3, kind: output, shape index: {}]  }
   0x1   :  { %v49_v0 = vld [vmem:[%s3672_s1 + $0x8] sm:$0xff]  ;;  %v51_v1 = vld [vmem:[%s3672_s1 + $0x18] sm:$0xff]  ;;  %v48_v5 = vld [vmem:[%s3672_s1] sm:$0xff] }
   0x2   :  { %v305_v2 = vld [vmem:[%s3672_s1 + $0x808] sm:$0xff]  ;;  %v1305_v3 = vpack.c.bf16 %v51_v1, %v49_v0  ;;  %v307_v4 = vld [vmem:[%s3672_s1 + $0x818] sm:$0xff]  ;;  %v50_v6 = vld [vmem:[%s3672_s1 + $0x10] sm:$0xff] }
   0x3   :  { %v1561_v7 = vpack.c.bf16 %v307_v4, %v305_v2  ;;  %v1307_v8 = vpack.c.bf16 %v50_v6, %v48_v5  ;;  %v304_v9 = vld [vmem:[%s3672_s1 + $0x800] sm:$0xff]  ;;  %v306_v10 = vld [vmem:[%s3672_s1 + $0x810] sm:$0xff]  ;;  %v53_v11 = vld [vmem:[%s3672_s1 + $0x28] sm:$0xff] }
   0x4   :  { %1306 = vmatprep.subr.bf16.mxu1 %v1305_v3  ;;  %v1563_v12 = vpack.c.bf16 %v306_v10, %v304_v9  ;;  %v55_v13 = vld [vmem:[%s3672_s1 + $0x38] sm:$0xff]  ;;  %v309_v14 = vld [vmem:[%s3672_s1 + $0x828] sm:$0xff]  ;;  %v52_v18 = vld [vmem:[%s3672_s1 + $0x20] sm:$0xff] }
   0x5   :  { %v311_v15 = vld [vmem:[%s3672_s1 + $0x838] sm:$0xff]  ;;  %1562 = vmatprep.subr.bf16.mxu0 %v1561_v7  ;;  %1308 = vmatpush1.bf16.msra.mxu1 %v1307_v8  ;;  %v1309_v16 = vpack.c.bf16 %v55_v13, %v53_v11  ;;  %v54_v19 = vld [vmem:[%s3672_s1 + $0x30] sm:$0xff]  ;;  %v308_v20 = vld [vmem:[%s3672_s1 + $0x820] sm:$0xff] }
   0x6   :  { %v1565_v17 = vpack.c.bf16 %v311_v15, %v309_v14  ;;  %1564 = vmatpush1.bf16.msra.mxu0 %v1563_v12  ;;  %v1311_v21 = vpack.c.bf16 %v54_v19, %v52_v18  ;;  %v310_v22 = vld [vmem:[%s3672_s1 + $0x830] sm:$0xff]  ;;  %v57_v23 = vld [vmem:[%s3672_s1 + $0x48] sm:$0xff]  ;;  %v59_v24 = vld [vmem:[%s3672_s1 + $0x58] sm:$0xff] }
   0x7   :  { %1310 = vmatprep.subr.bf16.mxu1 %v1309_v16  ;;  %v1567_v25 = vpack.c.bf16 %v310_v22, %v308_v20  ;;  %v1313_v26 = vpack.c.bf16 %v59_v24, %v57_v23  ;;  %v313_v27 = vld [vmem:[%s3672_s1 + $0x848] sm:$0xff]  ;;  %v315_v28 = vld [vmem:[%s3672_s1 + $0x858] sm:$0xff]  ;;  %v56_v29 = vld [vmem:[%s3672_s1 + $0x40] sm:$0xff] }
   0x8   :  { %1566 = vmatprep.subr.bf16.mxu0 %v1565_v17  ;;  %v1569_v30 = vpack.c.bf16 %v315_v28, %v313_v27  ;;  %v58_v31 = vld [vmem:[%s3672_s1 + $0x50] sm:$0xff]  ;;  %v312_v32 = vld [vmem:[%s3672_s1 + $0x840] sm:$0xff]  ;;  %v61_v35 = vld [vmem:[%s3672_s1 + $0x68] sm:$0xff] }
   0x9   :  { %v314_v33 = vld [vmem:[%s3672_s1 + $0x850] sm:$0xff]  ;;  %1312 = vmatpush1.bf16.msra.mxu1 %v1311_v21  ;;  %v1315_v34 = vpack.c.bf16 %v58_v31, %v56_v29  ;;  %v63_v36 = vld [vmem:[%s3672_s1 + $0x78] sm:$0xff]  ;;  %v317_v37 = vld [vmem:[%s3672_s1 + $0x868] sm:$0xff] }
   0xa   :  { %1568 = vmatpush1.bf16.msra.mxu0 %v1567_v25  ;;  %1314 = vmatprep.subr.bf16.mxu1 %v1313_v26  ;;  %v1571_v38 = vpack.c.bf16 %v314_v33, %v312_v32  ;;  %v1317_v39 = vpack.c.bf16 %v63_v36, %v61_v35  ;;  %v319_v40 = vld [vmem:[%s3672_s1 + $0x878] sm:$0xff]  ;;  %v60_v41 = vld [vmem:[%s3672_s1 + $0x60] sm:$0xff]  ;;  %v62_v42 = vld [vmem:[%s3672_s1 + $0x70] sm:$0xff] }
   0xb   :  { %1570 = vmatprep.subr.bf16.mxu0 %v1569_v30  ;;  %v1573_v43 = vpack.c.bf16 %v319_v40, %v317_v37  ;;  %v316_v44 = vld [vmem:[%s3672_s1 + $0x860] sm:$0xff]  ;;  %v318_v45 = vld [vmem:[%s3672_s1 + $0x870] sm:$0xff]  ;;  %v65_v46 = vld [vmem:[%s3672_s1 + $0x88] sm:$0xff]  ;;  %v1319_v50 = vpack.c.bf16 %v62_v42, %v60_v41 }
   0xc   :  { %v67_v47 = vld [vmem:[%s3672_s1 + $0x98] sm:$0xff]  ;;  %v321_v48 = vld [vmem:[%s3672_s1 + $0x888] sm:$0xff]  ;;  %v1575_v51 = vpack.c.bf16 %v318_v45, %v316_v44  ;;  %v64_v53 = vld [vmem:[%s3672_s1 + $0x80] sm:$0xff] }
   0xd   :  { %v323_v49 = vld [vmem:[%s3672_s1 + $0x898] sm:$0xff]  ;;  %1316 = vmatpush1.bf16.msra.mxu1 %v1315_v34  ;;  %v1321_v52 = vpack.c.bf16 %v67_v47, %v65_v46  ;;  %v66_v54 = vld [vmem:[%s3672_s1 + $0x90] sm:$0xff]  ;;  %v320_v55 = vld [vmem:[%s3672_s1 + $0x880] sm:$0xff] }
   0xe   :  { %1572 = vmatpush1.bf16.msra.mxu0 %v1571_v38  ;;  %1318 = vmatprep.subr.bf16.mxu1 %v1317_v39  ;;  %v1577_v56 = vpack.c.bf16 %v323_v49, %v321_v48  ;;  %v322_v57 = vld [vmem:[%s3672_s1 + $0x890] sm:$0xff]  ;;  %v69_v58 = vld [vmem:[%s3672_s1 + $0xa8] sm:$0xff]  ;;  %v71_v59 = vld [vmem:[%s3672_s1 + $0xb8] sm:$0xff]  ;;  %v1323_v62 = vpack.c.bf16 %v66_v54, %v64_v53 }
   0xf   :  { %1574 = vmatprep.subr.bf16.mxu0 %v1573_v43  ;;  %v325_v60 = vld [vmem:[%s3672_s1 + $0x8a8] sm:$0xff]  ;;  %v327_v61 = vld [vmem:[%s3672_s1 + $0x8b8] sm:$0xff]  ;;  %v1579_v63 = vpack.c.bf16 %v322_v57, %v320_v55  ;;  %v1325_v0 = vpack.c.bf16 %v71_v59, %v69_v58  ;;  %v68_v1 = vld [vmem:[%s3672_s1 + $0xa0] sm:$0xff] }
  0x10   :  { %v70_v2 = vld [vmem:[%s3672_s1 + $0xb0] sm:$0xff]  ;;  %v324_v3 = vld [vmem:[%s3672_s1 + $0x8a0] sm:$0xff]  ;;  %v1581_v4 = vpack.c.bf16 %v327_v61, %v325_v60  ;;  %v73_v6 = vld [vmem:[%s3672_s1 + $0xc8] sm:$0xff] }
  0x11   :  { %1320 = vmatpush1.bf16.msra.mxu1 %v1319_v50  ;;  %v326_v5 = vld [vmem:[%s3672_s1 + $0x8b0] sm:$0xff]  ;;  %v75_v7 = vld [vmem:[%s3672_s1 + $0xd8] sm:$0xff]  ;;  %v329_v8 = vld [vmem:[%s3672_s1 + $0x8c8] sm:$0xff]  ;;  %v1327_v10 = vpack.c.bf16 %v70_v2, %v68_v1 }
  0x12   :  { %1576 = vmatpush1.bf16.msra.mxu0 %v1575_v51  ;;  %1322 = vmatprep.subr.bf16.mxu1 %v1321_v52  ;;  %v331_v9 = vld [vmem:[%s3672_s1 + $0x8d8] sm:$0xff]  ;;  %v1583_v11 = vpack.c.bf16 %v326_v5, %v324_v3  ;;  %v1329_v12 = vpack.c.bf16 %v75_v7, %v73_v6  ;;  %v72_v13 = vld [vmem:[%s3672_s1 + $0xc0] sm:$0xff]  ;;  %v74_v14 = vld [vmem:[%s3672_s1 + $0xd0] sm:$0xff] }
  0x13   :  { %1578 = vmatprep.subr.bf16.mxu0 %v1577_v56  ;;  %v328_v15 = vld [vmem:[%s3672_s1 + $0x8c0] sm:$0xff]  ;;  %v1585_v16 = vpack.c.bf16 %v331_v9, %v329_v8  ;;  %v330_v17 = vld [vmem:[%s3672_s1 + $0x8d0] sm:$0xff]  ;;  %v77_v18 = vld [vmem:[%s3672_s1 + $0xe8] sm:$0xff]  ;;  %v1331_v22 = vpack.c.bf16 %v74_v14, %v72_v13 }
  0x14   :  { %v79_v19 = vld [vmem:[%s3672_s1 + $0xf8] sm:$0xff]  ;;  %v333_v20 = vld [vmem:[%s3672_s1 + $0x8e8] sm:$0xff]  ;;  %v1587_v23 = vpack.c.bf16 %v330_v17, %v328_v15  ;;  %v76_v25 = vld [vmem:[%s3672_s1 + $0xe0] sm:$0xff] }
  0x15   :  { %1324 = vmatpush1.bf16.msra.mxu1 %v1323_v62  ;;  %v335_v21 = vld [vmem:[%s3672_s1 + $0x8f8] sm:$0xff]  ;;  %v1333_v24 = vpack.c.bf16 %v79_v19, %v77_v18  ;;  %v78_v26 = vld [vmem:[%s3672_s1 + $0xf0] sm:$0xff]  ;;  %v332_v27 = vld [vmem:[%s3672_s1 + $0x8e0] sm:$0xff] }
  0x16   :  { %1580 = vmatpush1.bf16.msra.mxu0 %v1579_v63  ;;  %1326 = vmatprep.subr.bf16.mxu1 %v1325_v0  ;;  %v1589_v28 = vpack.c.bf16 %v335_v21, %v333_v20  ;;  %v334_v29 = vld [vmem:[%s3672_s1 + $0x8f0] sm:$0xff]  ;;  %v81_v30 = vld [vmem:[%s3672_s1 + $0x108] sm:$0xff]  ;;  %v83_v31 = vld [vmem:[%s3672_s1 + $0x118] sm:$0xff]  ;;  %v1335_v34 = vpack.c.bf16 %v78_v26, %v76_v25 }
  0x17   :  { %1582 = vmatprep.subr.bf16.mxu0 %v1581_v4  ;;  %v337_v32 = vld [vmem:[%s3672_s1 + $0x908] sm:$0xff]  ;;  %v339_v33 = vld [vmem:[%s3672_s1 + $0x918] sm:$0xff]  ;;  %v1591_v35 = vpack.c.bf16 %v334_v29, %v332_v27  ;;  %v1337_v36 = vpack.c.bf16 %v83_v31, %v81_v30  ;;  %v80_v37 = vld [vmem:[%s3672_s1 + $0x100] sm:$0xff] }
  0x18   :  { %v82_v38 = vld [vmem:[%s3672_s1 + $0x110] sm:$0xff]  ;;  %v336_v39 = vld [vmem:[%s3672_s1 + $0x900] sm:$0xff]  ;;  %v1593_v40 = vpack.c.bf16 %v339_v33, %v337_v32  ;;  %v85_v42 = vld [vmem:[%s3672_s1 + $0x128] sm:$0xff] }
  0x19   :  { %1328 = vmatpush1.bf16.msra.mxu1 %v1327_v10  ;;  %v338_v41 = vld [vmem:[%s3672_s1 + $0x910] sm:$0xff]  ;;  %v87_v43 = vld [vmem:[%s3672_s1 + $0x138] sm:$0xff]  ;;  %v341_v44 = vld [vmem:[%s3672_s1 + $0x928] sm:$0xff]  ;;  %v1339_v46 = vpack.c.bf16 %v82_v38, %v80_v37 }
  0x1a   :  { %1584 = vmatpush1.bf16.msra.mxu0 %v1583_v11  ;;  %1330 = vmatprep.subr.bf16.mxu1 %v1329_v12  ;;  %v343_v45 = vld [vmem:[%s3672_s1 + $0x938] sm:$0xff]  ;;  %v1595_v47 = vpack.c.bf16 %v338_v41, %v336_v39  ;;  %v1341_v48 = vpack.c.bf16 %v87_v43, %v85_v42  ;;  %v84_v49 = vld [vmem:[%s3672_s1 + $0x120] sm:$0xff]  ;;  %v86_v50 = vld [vmem:[%s3672_s1 + $0x130] sm:$0xff] }
  0x1b   :  { %1586 = vmatprep.subr.bf16.mxu0 %v1585_v16  ;;  %v340_v51 = vld [vmem:[%s3672_s1 + $0x920] sm:$0xff]  ;;  %v1597_v52 = vpack.c.bf16 %v343_v45, %v341_v44  ;;  %v342_v53 = vld [vmem:[%s3672_s1 + $0x930] sm:$0xff]  ;;  %v89_v54 = vld [vmem:[%s3672_s1 + $0x148] sm:$0xff]  ;;  %v1343_v58 = vpack.c.bf16 %v86_v50, %v84_v49 }
  0x1c   :  { %v91_v55 = vld [vmem:[%s3672_s1 + $0x158] sm:$0xff]  ;;  %v345_v56 = vld [vmem:[%s3672_s1 + $0x948] sm:$0xff]  ;;  %v1599_v59 = vpack.c.bf16 %v342_v53, %v340_v51  ;;  %v88_v61 = vld [vmem:[%s3672_s1 + $0x140] sm:$0xff] }
  0x1d   :  { %1332 = vmatpush1.bf16.msra.mxu1 %v1331_v22  ;;  %v347_v57 = vld [vmem:[%s3672_s1 + $0x958] sm:$0xff]  ;;  %v1345_v60 = vpack.c.bf16 %v91_v55, %v89_v54  ;;  %v90_v62 = vld [vmem:[%s3672_s1 + $0x150] sm:$0xff]  ;;  %v344_v63 = vld [vmem:[%s3672_s1 + $0x940] sm:$0xff] }
  0x1e   :  { %1588 = vmatpush1.bf16.msra.mxu0 %v1587_v23  ;;  %1334 = vmatprep.subr.bf16.mxu1 %v1333_v24  ;;  %v1601_v0 = vpack.c.bf16 %v347_v57, %v345_v56  ;;  %v346_v1 = vld [vmem:[%s3672_s1 + $0x950] sm:$0xff]  ;;  %v93_v2 = vld [vmem:[%s3672_s1 + $0x168] sm:$0xff]  ;;  %v95_v3 = vld [vmem:[%s3672_s1 + $0x178] sm:$0xff]  ;;  %v1347_v6 = vpack.c.bf16 %v90_v62, %v88_v61 }
  0x1f   :  { %1590 = vmatprep.subr.bf16.mxu0 %v1589_v28  ;;  %v349_v4 = vld [vmem:[%s3672_s1 + $0x968] sm:$0xff]  ;;  %v351_v5 = vld [vmem:[%s3672_s1 + $0x978] sm:$0xff]  ;;  %v92_v7 = vld [vmem:[%s3672_s1 + $0x160] sm:$0xff]  ;;  %v1603_v8 = vpack.c.bf16 %v346_v1, %v344_v63  ;;  %v1349_v9 = vpack.c.bf16 %v95_v3, %v93_v2 }
  0x20   :  { %v94_v10 = vld [vmem:[%s3672_s1 + $0x170] sm:$0xff]  ;;  %v348_v11 = vld [vmem:[%s3672_s1 + $0x960] sm:$0xff]  ;;  %v1605_v13 = vpack.c.bf16 %v351_v5, %v349_v4  ;;  %v97_v14 = vld [vmem:[%s3672_s1 + $0x188] sm:$0xff] }
  0x21   :  { %1336 = vmatpush1.bf16.msra.mxu1 %v1335_v34  ;;  %v350_v12 = vld [vmem:[%s3672_s1 + $0x970] sm:$0xff]  ;;  %v99_v15 = vld [vmem:[%s3672_s1 + $0x198] sm:$0xff]  ;;  %v15_v16 = vld [vmem:[%s3673_s0 + $0x8] sm:$0xff]  ;;  %v1351_v20 = vpack.c.bf16 %v94_v10, %v92_v7 }
  0x22   :  { %1592 = vmatpush1.bf16.msra.mxu0 %v1591_v35  ;;  %1338 = vmatprep.subr.bf16.mxu1 %v1337_v36  ;;  %v353_v17 = vld [vmem:[%s3672_s1 + $0x988] sm:$0xff]  ;;  %v355_v18 = vld [vmem:[%s3672_s1 + $0x998] sm:$0xff]  ;;  %v1607_v21 = vpack.c.bf16 %v350_v12, %v348_v11  ;;  %v1353_v22 = vpack.c.bf16 %v99_v15, %v97_v14  ;;  %v96_v23 = vld [vmem:[%s3672_s1 + $0x180] sm:$0xff] }
  0x23   :  { %1594 = vmatprep.subr.bf16.mxu0 %v1593_v40  ;;  %668 = vmatprep.mubr.f32.mxu1 %v15_v16  ;;  %v23_v19 = vld [vmem:[%s3673_s0 + $0x48] sm:$0xff]  ;;  %v98_v24 = vld [vmem:[%s3672_s1 + $0x190] sm:$0xff]  ;;  %v352_v25 = vld [vmem:[%s3672_s1 + $0x980] sm:$0xff]  ;;  %v1609_v26 = vpack.c.bf16 %v355_v18, %v353_v17 }
  0x24   :  { %976 = vmatprep.mubr.f32.mxu0 %v23_v19  ;;  %v354_v27 = vld [vmem:[%s3672_s1 + $0x990] sm:$0xff]  ;;  %v101_v28 = vld [vmem:[%s3672_s1 + $0x1a8] sm:$0xff]  ;;  %v103_v29 = vld [vmem:[%s3672_s1 + $0x1b8] sm:$0xff]  ;;  %v1355_v32 = vpack.c.bf16 %v98_v24, %v96_v23 }
  0x25   :  { %1340 = vmatpush1.bf16.msra.mxu1 %v1339_v46  ;;  %v357_v30 = vld [vmem:[%s3672_s1 + $0x9a8] sm:$0xff]  ;;  %v359_v31 = vld [vmem:[%s3672_s1 + $0x9b8] sm:$0xff]  ;;  %v1611_v33 = vpack.c.bf16 %v354_v27, %v352_v25  ;;  %v1357_v34 = vpack.c.bf16 %v103_v29, %v101_v28  ;;  %v100_v35 = vld [vmem:[%s3672_s1 + $0x1a0] sm:$0xff] }
  0x26   :  { %1596 = vmatpush1.bf16.msra.mxu0 %v1595_v47  ;;  %1342 = vmatprep.subr.bf16.mxu1 %v1341_v48  ;;  %v102_v36 = vld [vmem:[%s3672_s1 + $0x1b0] sm:$0xff]  ;;  %v356_v37 = vld [vmem:[%s3672_s1 + $0x9a0] sm:$0xff]  ;;  %v1613_v38 = vpack.c.bf16 %v359_v31, %v357_v30  ;;  %v105_v40 = vld [vmem:[%s3672_s1 + $0x1c8] sm:$0xff] }
  0x27   :  { %1598 = vmatprep.subr.bf16.mxu0 %v1597_v52  ;;  %v358_v39 = vld [vmem:[%s3672_s1 + $0x9b0] sm:$0xff]  ;;  %v107_v41 = vld [vmem:[%s3672_s1 + $0x1d8] sm:$0xff]  ;;  %v361_v42 = vld [vmem:[%s3672_s1 + $0x9c8] sm:$0xff]  ;;  %v1359_v44 = vpack.c.bf16 %v102_v36, %v100_v35 }
  0x28   :  { %v363_v43 = vld [vmem:[%s3672_s1 + $0x9d8] sm:$0xff]  ;;  %v1615_v45 = vpack.c.bf16 %v358_v39, %v356_v37  ;;  %v1361_v46 = vpack.c.bf16 %v107_v41, %v105_v40  ;;  %v104_v47 = vld [vmem:[%s3672_s1 + $0x1c0] sm:$0xff]  ;;  %v106_v48 = vld [vmem:[%s3672_s1 + $0x1d0] sm:$0xff] }
  0x29   :  { %1344 = vmatpush1.bf16.msra.mxu1 %v1343_v58  ;;  %v360_v49 = vld [vmem:[%s3672_s1 + $0x9c0] sm:$0xff]  ;;  %v1617_v50 = vpack.c.bf16 %v363_v43, %v361_v42  ;;  %v362_v51 = vld [vmem:[%s3672_s1 + $0x9d0] sm:$0xff]  ;;  %v109_v52 = vld [vmem:[%s3672_s1 + $0x1e8] sm:$0xff]  ;;  %v1363_v56 = vpack.c.bf16 %v106_v48, %v104_v47 }
  0x2a   :  { %1600 = vmatpush1.bf16.msra.mxu0 %v1599_v59  ;;  %1346 = vmatprep.subr.bf16.mxu1 %v1345_v60  ;;  %v111_v53 = vld [vmem:[%s3672_s1 + $0x1f8] sm:$0xff]  ;;  %v365_v54 = vld [vmem:[%s3672_s1 + $0x9e8] sm:$0xff]  ;;  %v1619_v57 = vpack.c.bf16 %v362_v51, %v360_v49  ;;  %v108_v59 = vld [vmem:[%s3672_s1 + $0x1e0] sm:$0xff] }
  0x2b   :  { %1602 = vmatprep.subr.bf16.mxu0 %v1601_v0  ;;  %v367_v55 = vld [vmem:[%s3672_s1 + $0x9f8] sm:$0xff]  ;;  %v1365_v58 = vpack.c.bf16 %v111_v53, %v109_v52  ;;  %v110_v60 = vld [vmem:[%s3672_s1 + $0x1f0] sm:$0xff]  ;;  %v364_v61 = vld [vmem:[%s3672_s1 + $0x9e0] sm:$0xff] }
  0x2c   :  { %v1621_v62 = vpack.c.bf16 %v367_v55, %v365_v54  ;;  %v366_v63 = vld [vmem:[%s3672_s1 + $0x9f0] sm:$0xff]  ;;  %v113_v0 = vld [vmem:[%s3672_s1 + $0x208] sm:$0xff]  ;;  %v115_v1 = vld [vmem:[%s3672_s1 + $0x218] sm:$0xff]  ;;  %v1367_v4 = vpack.c.bf16 %v110_v60, %v108_v59 }
  0x2d   :  { %1348 = vmatpush1.bf16.msra.mxu1 %v1347_v6  ;;  %v369_v2 = vld [vmem:[%s3672_s1 + $0xa08] sm:$0xff]  ;;  %v371_v3 = vld [vmem:[%s3672_s1 + $0xa18] sm:$0xff]  ;;  %v1623_v5 = vpack.c.bf16 %v366_v63, %v364_v61  ;;  %v1369_v6 = vpack.c.bf16 %v115_v1, %v113_v0  ;;  %v112_v7 = vld [vmem:[%s3672_s1 + $0x200] sm:$0xff] }
  0x2e   :  { %1604 = vmatpush1.bf16.msra.mxu0 %v1603_v8  ;;  %1350 = vmatprep.subr.bf16.mxu1 %v1349_v9  ;;  %v114_v8 = vld [vmem:[%s3672_s1 + $0x210] sm:$0xff]  ;;  %v368_v9 = vld [vmem:[%s3672_s1 + $0xa00] sm:$0xff]  ;;  %v1625_v10 = vpack.c.bf16 %v371_v3, %v369_v2  ;;  %v117_v12 = vld [vmem:[%s3672_s1 + $0x228] sm:$0xff] }
  0x2f   :  { %1606 = vmatprep.subr.bf16.mxu0 %v1605_v13  ;;  %v370_v11 = vld [vmem:[%s3672_s1 + $0xa10] sm:$0xff]  ;;  %v119_v13 = vld [vmem:[%s3672_s1 + $0x238] sm:$0xff]  ;;  %v373_v14 = vld [vmem:[%s3672_s1 + $0xa28] sm:$0xff]  ;;  %v1371_v17 = vpack.c.bf16 %v114_v8, %v112_v7 }
  0x30   :  { %v375_v15 = vld [vmem:[%s3672_s1 + $0xa38] sm:$0xff]  ;;  %v14_v16 = vld [vmem:[%s3673_s0] sm:$0xff]  ;;  %v1627_v19 = vpack.c.bf16 %v370_v11, %v368_v9  ;;  %v374_v25 = vld [vmem:[%s3672_s1 + $0xa30] sm:$0xff] }
  0x31   :  { %1352 = vmatpush1.bf16.msra.mxu1 %v1351_v20  ;;  %v22_v18 = vld [vmem:[%s3673_s0 + $0x40] sm:$0xff]  ;;  %v1373_v20 = vpack.c.bf16 %v119_v13, %v117_v12  ;;  %v1629_v24 = vpack.c.bf16 %v375_v15, %v373_v14  ;;  %v123_v27 = vld [vmem:[%s3672_s1 + $0x258] sm:$0xff]  ;;  %v377_v28 = vld [vmem:[%s3672_s1 + $0xa48] sm:$0xff] }
  0x32   :  { %1608 = vmatpush1.bf16.msra.mxu0 %v1607_v21  ;;  %1354 = vmatprep.subr.bf16.mxu1 %v1353_v22  ;;  %v116_v21 = vld [vmem:[%s3672_s1 + $0x220] sm:$0xff]  ;;  %v118_v22 = vld [vmem:[%s3672_s1 + $0x230] sm:$0xff]  ;;  %v379_v29 = vld [vmem:[%s3672_s1 + $0xa58] sm:$0xff] }
  0x33   :  { %1610 = vmatprep.subr.bf16.mxu0 %v1609_v26  ;;  %v372_v23 = vld [vmem:[%s3672_s1 + $0xa20] sm:$0xff]  ;;  %v121_v26 = vld [vmem:[%s3672_s1 + $0x248] sm:$0xff]  ;;  %v1375_v30 = vpack.c.bf16 %v118_v22, %v116_v21  ;;  %v1633_v36 = vpack.c.bf16 %v379_v29, %v377_v28  ;;  %v378_v37 = vld [vmem:[%s3672_s1 + $0xa50] sm:$0xff] }
  0x34   :  { %v1631_v31 = vpack.c.bf16 %v374_v25, %v372_v23  ;;  %v376_v35 = vld [vmem:[%s3672_s1 + $0xa40] sm:$0xff]  ;;  %v127_v39 = vld [vmem:[%s3672_s1 + $0x278] sm:$0xff]  ;;  %v381_v40 = vld [vmem:[%s3672_s1 + $0xa68] sm:$0xff] }
  0x35   :  { %1356 = vmatpush1.bf16.msra.mxu1 %v1355_v32  ;;  %v1377_v32 = vpack.c.bf16 %v123_v27, %v121_v26  ;;  %v383_v41 = vld [vmem:[%s3672_s1 + $0xa78] sm:$0xff]  ;;  %v1635_v43 = vpack.c.bf16 %v378_v37, %v376_v35  ;;  %v380_v47 = vld [vmem:[%s3672_s1 + $0xa60] sm:$0xff]  ;;  %v382_v49 = vld [vmem:[%s3672_s1 + $0xa70] sm:$0xff] }
  0x36   :  { %1612 = vmatpush1.bf16.msra.mxu0 %v1611_v33  ;;  %1358 = vmatprep.subr.bf16.mxu1 %v1357_v34  ;;  %v120_v33 = vld [vmem:[%s3672_s1 + $0x240] sm:$0xff]  ;;  %v122_v34 = vld [vmem:[%s3672_s1 + $0x250] sm:$0xff]  ;;  %v1637_v48 = vpack.c.bf16 %v383_v41, %v381_v40  ;;  %v131_v51 = vld [vmem:[%s3672_s1 + $0x298] sm:$0xff]  ;;  %v1639_v55 = vpack.c.bf16 %v382_v49, %v380_v47 }
  0x37   :  { %1614 = vmatprep.subr.bf16.mxu0 %v1613_v38  ;;  %v125_v38 = vld [vmem:[%s3672_s1 + $0x268] sm:$0xff]  ;;  %v1379_v42 = vpack.c.bf16 %v122_v34, %v120_v33  ;;  %v387_v53 = vld [vmem:[%s3672_s1 + $0xa98] sm:$0xff]  ;;  %v384_v59 = vld [vmem:[%s3672_s1 + $0xa80] sm:$0xff] }
  0x38   :  { %v385_v52 = vld [vmem:[%s3672_s1 + $0xa88] sm:$0xff]  ;;  %v386_v61 = vld [vmem:[%s3672_s1 + $0xa90] sm:$0xff]  ;;  %v135_v63 = vld [vmem:[%s3672_s1 + $0x2b8] sm:$0xff] }
  0x39   :  { %1360 = vmatpush1.bf16.msra.mxu1 %v1359_v44  ;;  %v1381_v44 = vpack.c.bf16 %v127_v39, %v125_v38  ;;  %v1641_v60 = vpack.c.bf16 %v387_v53, %v385_v52  ;;  %v389_v0 = vld [vmem:[%s3672_s1 + $0xaa8] sm:$0xff]  ;;  %v391_v1 = vld [vmem:[%s3672_s1 + $0xab8] sm:$0xff]  ;;  %v1643_v3 = vpack.c.bf16 %v386_v61, %v384_v59  ;;  %v388_v7 = vld [vmem:[%s3672_s1 + $0xaa0] sm:$0xff] }
  0x3a   :  { %1616 = vmatpush1.bf16.msra.mxu0 %v1615_v45  ;;  %1362 = vmatprep.subr.bf16.mxu1 %v1361_v46  ;;  %v124_v45 = vld [vmem:[%s3672_s1 + $0x260] sm:$0xff]  ;;  %v126_v46 = vld [vmem:[%s3672_s1 + $0x270] sm:$0xff]  ;;  %v1645_v8 = vpack.c.bf16 %v391_v1, %v389_v0  ;;  %v139_v11 = vld [vmem:[%s3672_s1 + $0x2d8] sm:$0xff] }
  0x3b   :  { %1618 = vmatprep.subr.bf16.mxu0 %v1617_v50  ;;  %v129_v50 = vld [vmem:[%s3672_s1 + $0x288] sm:$0xff]  ;;  %v1383_v54 = vpack.c.bf16 %v126_v46, %v124_v45  ;;  %v390_v9 = vld [vmem:[%s3672_s1 + $0xab0] sm:$0xff]  ;;  %v395_v13 = vld [vmem:[%s3672_s1 + $0xad8] sm:$0xff] }
  0x3c   :  { %v393_v12 = vld [vmem:[%s3672_s1 + $0xac8] sm:$0xff]  ;;  %v136_v15 = vld [vmem:[%s3672_s1 + $0x2c0] sm:$0xff]  ;;  %v394_v21 = vld [vmem:[%s3672_s1 + $0xad0] sm:$0xff] }
  0x3d   :  { %1364 = vmatpush1.bf16.msra.mxu1 %v1363_v56  ;;  %v1385_v56 = vpack.c.bf16 %v131_v51, %v129_v50  ;;  %v40_v22 = vld [vmem:[%s3673_s0 + $0xd0] sm:$0xff]  ;;  %v1649_v23 = vpack.c.bf16 %v395_v13, %v393_v12  ;;  %v143_v25 = vld [vmem:[%s3672_s1 + $0x2f8] sm:$0xff]  ;;  %v31_v26 = vld [vmem:[%s3673_s0 + $0x88] sm:$0xff] }
  0x3e   :  { %1620 = vmatpush1.bf16.msra.mxu0 %v1619_v57  ;;  %1366 = vmatprep.subr.bf16.mxu1 %v1365_v58  ;;  %v128_v57 = vld [vmem:[%s3672_s1 + $0x280] sm:$0xff]  ;;  %v130_v58 = vld [vmem:[%s3672_s1 + $0x290] sm:$0xff]  ;;  %v397_v27 = vld [vmem:[%s3672_s1 + $0xae8] sm:$0xff] }
  0x3f   :  { %1622 = vmatprep.subr.bf16.mxu0 %v1621_v62  ;;  %v133_v62 = vld [vmem:[%s3672_s1 + $0x2a8] sm:$0xff]  ;;  %v1387_v2 = vpack.c.bf16 %v130_v58, %v128_v57  ;;  %v399_v28 = vld [vmem:[%s3672_s1 + $0xaf8] sm:$0xff]  ;;  %v142_v35 = vld [vmem:[%s3672_s1 + $0x2f0] sm:$0xff] }
  0x40   :  { %v39_v29 = vld [vmem:[%s3673_s0 + $0xc8] sm:$0xff]  ;;  %v25_v37 = vld [vmem:[%s3673_s0 + $0x58] sm:$0xff]  ;;  %v1653_v38 = vpack.c.bf16 %v399_v28, %v397_v27  ;;  %v398_v39 = vld [vmem:[%s3672_s1 + $0xaf0] sm:$0xff] }
  0x41   :  { %1368 = vmatpush1.bf16.msra.mxu1 %v1367_v4  ;;  %v1389_v4 = vpack.c.bf16 %v135_v63, %v133_v62  ;;  %v145_v40 = vld [vmem:[%s3672_s1 + $0x308] sm:$0xff]  ;;  %v147_v41 = vld [vmem:[%s3672_s1 + $0x318] sm:$0xff]  ;;  %v144_v47 = vld [vmem:[%s3672_s1 + $0x300] sm:$0xff] }
  0x42   :  { %1624 = vmatpush1.bf16.msra.mxu0 %v1623_v5  ;;  %1370 = vmatprep.subr.bf16.mxu1 %v1369_v6  ;;  %v132_v5 = vld [vmem:[%s3672_s1 + $0x2a0] sm:$0xff]  ;;  %v134_v6 = vld [vmem:[%s3672_s1 + $0x2b0] sm:$0xff]  ;;  %v1401_v46 = vpack.c.bf16 %v147_v41, %v145_v40  ;;  %v149_v52 = vld [vmem:[%s3672_s1 + $0x328] sm:$0xff] }
  0x43   :  { %1626 = vmatprep.subr.bf16.mxu0 %v1625_v10  ;;  %v137_v10 = vld [vmem:[%s3672_s1 + $0x2c8] sm:$0xff]  ;;  %v1391_v14 = vpack.c.bf16 %v134_v6, %v132_v5  ;;  %v400_v49 = vld [vmem:[%s3672_s1 + $0xb00] sm:$0xff]  ;;  %v402_v51 = vld [vmem:[%s3672_s1 + $0xb10] sm:$0xff] }
  0x44   :  { %669 = vmatmul.mubr.f32.vlgmr.msra.gmra.mrb[0].mxu1 %v14_v16  ;;  %v138_v16 = vld [vmem:[%s3672_s1 + $0x2d0] sm:$0xff]  ;;  %v151_v53 = vld [vmem:[%s3672_s1 + $0x338] sm:$0xff]  ;;  %v1659_v57 = vpack.c.bf16 %v402_v51, %v400_v49  ;;  %v148_v59 = vld [vmem:[%s3672_s1 + $0x320] sm:$0xff] }
  0x45   :  { %1372 = vmatpush1.bf16.msra.mxu1 %v1371_v17  ;;  %977 = vmatmul.mubr.f32.vlgmr.msra.gmra.mrb[0].mxu0 %v22_v18  ;;  %v32_v17 = vld [vmem:[%s3673_s0 + $0x90] sm:$0xff]  ;;  %v1647_v18 = vpack.c.bf16 %v390_v9, %v388_v7  ;;  %v1405_v58 = vpack.c.bf16 %v151_v53, %v149_v52  ;;  %v404_v61 = vld [vmem:[%s3672_s1 + $0xb20] sm:$0xff]  ;;  %v153_v0 = vld [vmem:[%s3672_s1 + $0x348] sm:$0xff] }
  0x46   :  { %1628 = vmatpush1.bf16.msra.mxu0 %v1627_v19  ;;  %1374 = vmatprep.subr.bf16.mxu1 %v1373_v20  ;;  %v1393_v19 = vpack.c.bf16 %v139_v11, %v137_v10  ;;  %v392_v20 = vld [vmem:[%s3672_s1 + $0xac0] sm:$0xff]  ;;  %v406_v63 = vld [vmem:[%s3672_s1 + $0xb30] sm:$0xff]  ;;  %v155_v1 = vld [vmem:[%s3672_s1 + $0x358] sm:$0xff] }
  0x47   :  { %1630 = vmatprep.subr.bf16.mxu0 %v1629_v24  ;;  %v141_v24 = vld [vmem:[%s3672_s1 + $0x2e8] sm:$0xff]  ;;  %674 = vmatprep.mubr.f32.mxu1 %v32_v17  ;;  %v1651_v33 = vpack.c.bf16 %v394_v21, %v392_v20  ;;  %v1663_v5 = vpack.c.bf16 %v406_v63, %v404_v61  ;;  %v1409_v6 = vpack.c.bf16 %v155_v1, %v153_v0  ;;  %v152_v7 = vld [vmem:[%s3672_s1 + $0x340] sm:$0xff]  ;;  %v410_v11 = vld [vmem:[%s3672_s1 + $0xb50] sm:$0xff] }
  0x48   :  { %982 = vmatprep.mubr.f32.mxu0 %v40_v22  ;;  %675 = vmatmul.mubr.f32.gmra.mrb[2].mxu1 %v31_v26  ;;  %v1397_v34 = vpack.c.bf16 %v143_v25, %v141_v24  ;;  %v408_v9 = vld [vmem:[%s3672_s1 + $0xb40] sm:$0xff]  ;;  %v157_v12 = vld [vmem:[%s3672_s1 + $0x368] sm:$0xff]  ;;  %v159_v13 = vld [vmem:[%s3672_s1 + $0x378] sm:$0xff] }
  0x49   :  { %1376 = vmatpush1.bf16.msra.mxu1 %v1375_v30  ;;  %v1395_v30 = vpack.c.bf16 %v138_v16, %v136_v15  ;;  %983 = vmatmul.mubr.f32.gmra.mrb[2].mxu0 %v39_v29  ;;  %v415_v15 = vld [vmem:[%s3672_s1 + $0xb78] sm:$0xff]  ;;  %v1667_v17 = vpack.c.bf16 %v410_v11, %v408_v9  ;;  %v158_v20 = vld [vmem:[%s3672_s1 + $0x370] sm:$0xff]  ;;  %v412_v21 = vld [vmem:[%s3672_s1 + $0xb60] sm:$0xff] }
  0x4a   :  { %1632 = vmatpush1.bf16.msra.mxu0 %v1631_v31  ;;  %1378 = vmatprep.subr.bf16.mxu1 %v1377_v32  ;;  %v140_v31 = vld [vmem:[%s3672_s1 + $0x2e0] sm:$0xff]  ;;  %v17_v32 = vld [vmem:[%s3673_s0 + $0x18] sm:$0xff]  ;;  %v161_v24 = vld [vmem:[%s3672_s1 + $0x388] sm:$0xff] }
  0x4b   :  { %1634 = vmatprep.subr.bf16.mxu0 %v1633_v36  ;;  %v396_v36 = vld [vmem:[%s3672_s1 + $0xae0] sm:$0xff]  ;;  %745 = vmatprep.mubr.f32.mxu1 %v17_v32  ;;  %v163_v25 = vld [vmem:[%s3672_s1 + $0x398] sm:$0xff]  ;;  %v417_v26 = vld [vmem:[%s3672_s1 + $0xb88] sm:$0xff] }
  0x4c   :  { %1053 = vmatprep.mubr.f32.mxu0 %v25_v37  ;;  %v1655_v45 = vpack.c.bf16 %v398_v39, %v396_v36  ;;  %v419_v27 = vld [vmem:[%s3672_s1 + $0xb98] sm:$0xff]  ;;  %v162_v32 = vld [vmem:[%s3672_s1 + $0x390] sm:$0xff]  ;;  %v165_v36 = vld [vmem:[%s3672_s1 + $0x3a8] sm:$0xff] }
  0x4d   :  { %1380 = vmatpush1.bf16.msra.mxu1 %v1379_v42  ;;  %v401_v42 = vld [vmem:[%s3672_s1 + $0xb08] sm:$0xff]  ;;  %v167_v37 = vld [vmem:[%s3672_s1 + $0x3b8] sm:$0xff] }
  0x4e   :  { %1636 = vmatpush1.bf16.msra.mxu0 %v1635_v43  ;;  %1382 = vmatprep.subr.bf16.mxu1 %v1381_v44  ;;  %v403_v43 = vld [vmem:[%s3672_s1 + $0xb18] sm:$0xff]  ;;  %v1399_v44 = vpack.c.bf16 %v142_v35, %v140_v31  ;;  %v160_v31 = vld [vmem:[%s3672_s1 + $0x380] sm:$0xff]  ;;  %v418_v35 = vld [vmem:[%s3672_s1 + $0xb90] sm:$0xff] }
  0x4f   :  { %1638 = vmatprep.subr.bf16.mxu0 %v1637_v48  ;;  %v146_v48 = vld [vmem:[%s3672_s1 + $0x310] sm:$0xff]  ;;  %v1657_v50 = vpack.c.bf16 %v403_v43, %v401_v42  ;;  %v423_v39 = vld [vmem:[%s3672_s1 + $0xbb8] sm:$0xff]  ;;  %v1419_v40 = vpack.c.bf16 %v162_v32, %v160_v31  ;;  %v1421_v42 = vpack.c.bf16 %v167_v37, %v165_v36  ;;  %v164_v43 = vld [vmem:[%s3672_s1 + $0x3a0] sm:$0xff] }
  0x50   :  { %v171_v49 = vld [vmem:[%s3672_s1 + $0x3d8] sm:$0xff]  ;;  %v436_v31 = vld [vmem:[%s3672_s1 + $0xc20] sm:$0xff]  ;;  %v441_v36 = vld [vmem:[%s3672_s1 + $0xc48] sm:$0xff] }
  0x51   :  { %1384 = vmatpush1.bf16.msra.mxu1 %v1383_v54  ;;  %v405_v54 = vld [vmem:[%s3672_s1 + $0xb28] sm:$0xff]  ;;  %v427_v51 = vld [vmem:[%s3672_s1 + $0xbd8] sm:$0xff] }
  0x52   :  { %1640 = vmatpush1.bf16.msra.mxu0 %v1639_v55  ;;  %1386 = vmatprep.subr.bf16.mxu1 %v1385_v56  ;;  %v407_v55 = vld [vmem:[%s3672_s1 + $0xb38] sm:$0xff]  ;;  %v1403_v56 = vpack.c.bf16 %v146_v48, %v144_v47  ;;  %v422_v47 = vld [vmem:[%s3672_s1 + $0xbb0] sm:$0xff]  ;;  %v169_v48 = vld [vmem:[%s3672_s1 + $0x3c8] sm:$0xff] }
  0x53   :  { %1642 = vmatprep.subr.bf16.mxu0 %v1641_v60  ;;  %v150_v60 = vld [vmem:[%s3672_s1 + $0x330] sm:$0xff]  ;;  %v1661_v62 = vpack.c.bf16 %v407_v55, %v405_v54  ;;  %v1425_v54 = vpack.c.bf16 %v171_v49, %v169_v48  ;;  %v168_v55 = vld [vmem:[%s3672_s1 + $0x3c0] sm:$0xff]  ;;  %v175_v61 = vld [vmem:[%s3672_s1 + $0x3f8] sm:$0xff] }
  0x54   :  { %v431_v63 = vld [vmem:[%s3672_s1 + $0xbf8] sm:$0xff]  ;;  %v442_v49 = vld [vmem:[%s3672_s1 + $0xc50] sm:$0xff] }
  0x55   :  { %1388 = vmatpush1.bf16.msra.mxu1 %v1387_v2  ;;  %v409_v2 = vld [vmem:[%s3672_s1 + $0xb48] sm:$0xff]  ;;  %v179_v9 = vld [vmem:[%s3672_s1 + $0x418] sm:$0xff] }
  0x56   :  { %1644 = vmatpush1.bf16.msra.mxu0 %v1643_v3  ;;  %1390 = vmatprep.subr.bf16.mxu1 %v1389_v4  ;;  %v411_v3 = vld [vmem:[%s3672_s1 + $0xb58] sm:$0xff]  ;;  %v1407_v4 = vpack.c.bf16 %v150_v60, %v148_v59  ;;  %v426_v59 = vld [vmem:[%s3672_s1 + $0xbd0] sm:$0xff]  ;;  %v173_v60 = vld [vmem:[%s3672_s1 + $0x3e8] sm:$0xff] }
  0x57   :  { %1646 = vmatprep.subr.bf16.mxu0 %v1645_v8  ;;  %v154_v8 = vld [vmem:[%s3672_s1 + $0x350] sm:$0xff]  ;;  %v1665_v10 = vpack.c.bf16 %v411_v3, %v409_v2  ;;  %v1429_v2 = vpack.c.bf16 %v175_v61, %v173_v60  ;;  %v172_v3 = vld [vmem:[%s3672_s1 + $0x3e0] sm:$0xff]  ;;  %v435_v11 = vld [vmem:[%s3672_s1 + $0xc18] sm:$0xff] }
  0x58   :  { %v1411_v16 = vpack.c.bf16 %v154_v8, %v152_v7  ;;  %v430_v7 = vld [vmem:[%s3672_s1 + $0xbf0] sm:$0xff]  ;;  %v177_v8 = vld [vmem:[%s3672_s1 + $0x408] sm:$0xff]  ;;  %v443_v37 = vld [vmem:[%s3672_s1 + $0xc58] sm:$0xff] }
  0x59   :  { %1392 = vmatpush1.bf16.msra.mxu1 %v1391_v14  ;;  %v413_v14 = vld [vmem:[%s3672_s1 + $0xb68] sm:$0xff]  ;;  %v1697_v48 = vpack.c.bf16 %v443_v37, %v441_v36  ;;  %v190_v60 = vld [vmem:[%s3672_s1 + $0x470] sm:$0xff]  ;;  %v444_v61 = vld [vmem:[%s3672_s1 + $0xc60] sm:$0xff] }
  0x5a   :  { %1648 = vmatpush1.bf16.msra.mxu0 %v1647_v18  ;;  %1394 = vmatprep.subr.bf16.mxu1 %v1393_v19  ;;  %v1413_v18 = vpack.c.bf16 %v159_v13, %v157_v12  ;;  %v156_v19 = vld [vmem:[%s3672_s1 + $0x360] sm:$0xff]  ;;  %v1669_v22 = vpack.c.bf16 %v415_v15, %v413_v14  ;;  %v1433_v14 = vpack.c.bf16 %v179_v9, %v177_v8  ;;  %v194_v8 = vld [vmem:[%s3672_s1 + $0x490] sm:$0xff]  ;;  %v205_v36 = vld [vmem:[%s3672_s1 + $0x4e8] sm:$0xff] }
  0x5b   :  { %1650 = vmatprep.subr.bf16.mxu0 %v1649_v23  ;;  %v414_v23 = vld [vmem:[%s3672_s1 + $0xb70] sm:$0xff]  ;;  %v1415_v28 = vpack.c.bf16 %v158_v20, %v156_v19  ;;  %v176_v15 = vld [vmem:[%s3672_s1 + $0x400] sm:$0xff]  ;;  %v181_v20 = vld [vmem:[%s3672_s1 + $0x428] sm:$0xff] }
  0x5c   :  { %v1671_v29 = vpack.c.bf16 %v414_v23, %v412_v21  ;;  %v434_v19 = vld [vmem:[%s3672_s1 + $0xc10] sm:$0xff]  ;;  %v183_v21 = vld [vmem:[%s3672_s1 + $0x438] sm:$0xff]  ;;  %v448_v9 = vld [vmem:[%s3672_s1 + $0xc80] sm:$0xff] }
  0x5d   :  { %1396 = vmatpush1.bf16.msra.mxu1 %v1395_v30  ;;  %v1417_v30 = vpack.c.bf16 %v163_v25, %v161_v24  ;;  %v439_v23 = vld [vmem:[%s3672_s1 + $0xc38] sm:$0xff]  ;;  %v16_v24 = vld [vmem:[%s3673_s0 + $0x10] sm:$0xff] }
  0x5e   :  { %1652 = vmatpush1.bf16.msra.mxu0 %v1651_v33  ;;  %1398 = vmatprep.subr.bf16.mxu1 %v1397_v34  ;;  %v416_v33 = vld [vmem:[%s3672_s1 + $0xb80] sm:$0xff]  ;;  %v1673_v34 = vpack.c.bf16 %v419_v27, %v417_v26  ;;  %v24_v26 = vld [vmem:[%s3673_s0 + $0x50] sm:$0xff]  ;;  %v207_v37 = vld [vmem:[%s3672_s1 + $0x4f8] sm:$0xff] }
  0x5f   :  { %1654 = vmatprep.subr.bf16.mxu0 %v1653_v38  ;;  %v421_v38 = vld [vmem:[%s3672_s1 + $0xba8] sm:$0xff]  ;;  %v1675_v41 = vpack.c.bf16 %v418_v35, %v416_v33  ;;  %v438_v33 = vld [vmem:[%s3672_s1 + $0xc30] sm:$0xff]  ;;  %v187_v35 = vld [vmem:[%s3672_s1 + $0x458] sm:$0xff] }
  0x61   :  { %1400 = vmatpush1.bf16.msra.mxu1 %v1399_v44  ;;  %v166_v44 = vld [vmem:[%s3672_s1 + $0x3b0] sm:$0xff] }
  0x62   :  { %1656 = vmatpush1.bf16.msra.mxu0 %v1655_v45  ;;  %1402 = vmatprep.subr.bf16.mxu1 %v1401_v46  ;;  %v420_v45 = vld [vmem:[%s3672_s1 + $0xba0] sm:$0xff]  ;;  %v1677_v46 = vpack.c.bf16 %v423_v39, %v421_v38  ;;  %v1423_v52 = vpack.c.bf16 %v166_v44, %v164_v43  ;;  %v1695_v43 = vpack.c.bf16 %v438_v33, %v436_v31 }
  0x63   :  { %1658 = vmatprep.subr.bf16.mxu0 %v1657_v50  ;;  %v425_v50 = vld [vmem:[%s3672_s1 + $0xbc8] sm:$0xff]  ;;  %v1679_v53 = vpack.c.bf16 %v422_v47, %v420_v45  ;;  %v34_v38 = vld [vmem:[%s3673_s0 + $0xa0] sm:$0xff]  ;;  %v186_v45 = vld [vmem:[%s3672_s1 + $0x450] sm:$0xff] }
  0x64   :  { %v41_v47 = vld [vmem:[%s3673_s0 + $0xd8] sm:$0xff]  ;;  %v200_v31 = vld [vmem:[%s3672_s1 + $0x4c0] sm:$0xff] }
  0x65   :  { %1404 = vmatpush1.bf16.msra.mxu1 %v1403_v56  ;;  %v170_v56 = vld [vmem:[%s3672_s1 + $0x3d0] sm:$0xff]  ;;  %v456_v33 = vld [vmem:[%s3672_s1 + $0xcc0] sm:$0xff] }
  0x66   :  { %1660 = vmatpush1.bf16.msra.mxu0 %v1659_v57  ;;  %1406 = vmatprep.subr.bf16.mxu1 %v1405_v58  ;;  %v424_v57 = vld [vmem:[%s3672_s1 + $0xbc0] sm:$0xff]  ;;  %v1681_v58 = vpack.c.bf16 %v427_v51, %v425_v50  ;;  %v1427_v0 = vpack.c.bf16 %v170_v56, %v168_v55  ;;  %v189_v50 = vld [vmem:[%s3672_s1 + $0x468] sm:$0xff]  ;;  %v191_v51 = vld [vmem:[%s3672_s1 + $0x478] sm:$0xff] }
  0x67   :  { %1662 = vmatprep.subr.bf16.mxu0 %v1661_v62  ;;  %v429_v62 = vld [vmem:[%s3672_s1 + $0xbe8] sm:$0xff]  ;;  %v1683_v1 = vpack.c.bf16 %v426_v59, %v424_v57  ;;  %v188_v59 = vld [vmem:[%s3672_s1 + $0x460] sm:$0xff] }
  0x68   :  { %v27_v56 = vld [vmem:[%s3673_s0 + $0x68] sm:$0xff] }
  0x69   :  { %1408 = vmatpush1.bf16.msra.mxu1 %v1407_v4  ;;  %v174_v4 = vld [vmem:[%s3672_s1 + $0x3f0] sm:$0xff] }
  0x6a   :  { %1664 = vmatpush1.bf16.msra.mxu0 %v1663_v5  ;;  %1410 = vmatprep.subr.bf16.mxu1 %v1409_v6  ;;  %v428_v5 = vld [vmem:[%s3672_s1 + $0xbe0] sm:$0xff]  ;;  %v1685_v6 = vpack.c.bf16 %v431_v63, %v429_v62  ;;  %v1431_v12 = vpack.c.bf16 %v174_v4, %v172_v3  ;;  %v446_v63 = vld [vmem:[%s3672_s1 + $0xc70] sm:$0xff]  ;;  %v451_v3 = vld [vmem:[%s3672_s1 + $0xc98] sm:$0xff]  ;;  %v1447_v4 = vpack.c.bf16 %v190_v60, %v188_v59 }
  0x6b   :  { %1666 = vmatprep.subr.bf16.mxu0 %v1665_v10  ;;  %v433_v10 = vld [vmem:[%s3672_s1 + $0xc08] sm:$0xff]  ;;  %v1687_v13 = vpack.c.bf16 %v430_v7, %v428_v5  ;;  %v1703_v5 = vpack.c.bf16 %v446_v63, %v444_v61  ;;  %v192_v7 = vld [vmem:[%s3672_s1 + $0x480] sm:$0xff]  ;;  %v466_v59 = vld [vmem:[%s3672_s1 + $0xd10] sm:$0xff] }
  0x6c   :  { %v213_v60 = vld [vmem:[%s3672_s1 + $0x528] sm:$0xff]  ;;  %v215_v61 = vld [vmem:[%s3672_s1 + $0x538] sm:$0xff] }
  0x6d   :  { %1412 = vmatpush1.bf16.msra.mxu1 %v1411_v16  ;;  %v178_v16 = vld [vmem:[%s3672_s1 + $0x410] sm:$0xff]  ;;  %v471_v63 = vld [vmem:[%s3672_s1 + $0xd38] sm:$0xff] }
  0x6e   :  { %1668 = vmatpush1.bf16.msra.mxu0 %v1667_v17  ;;  %1414 = vmatprep.subr.bf16.mxu1 %v1413_v18  ;;  %v432_v17 = vld [vmem:[%s3672_s1 + $0xc00] sm:$0xff]  ;;  %v1689_v18 = vpack.c.bf16 %v435_v11, %v433_v10  ;;  %v1435_v25 = vpack.c.bf16 %v178_v16, %v176_v15  ;;  %v450_v11 = vld [vmem:[%s3672_s1 + $0xc90] sm:$0xff]  ;;  %v455_v15 = vld [vmem:[%s3672_s1 + $0xcb8] sm:$0xff]  ;;  %v1451_v16 = vpack.c.bf16 %v194_v8, %v192_v7 }
  0x6f   :  { %1670 = vmatprep.subr.bf16.mxu0 %v1669_v22  ;;  %v437_v22 = vld [vmem:[%s3672_s1 + $0xc28] sm:$0xff]  ;;  %v1691_v27 = vpack.c.bf16 %v434_v19, %v432_v17  ;;  %v1707_v17 = vpack.c.bf16 %v450_v11, %v448_v9  ;;  %v196_v19 = vld [vmem:[%s3672_s1 + $0x4a0] sm:$0xff]  ;;  %v470_v7 = vld [vmem:[%s3672_s1 + $0xd30] sm:$0xff] }
  0x70   :  { %v1693_v32 = vpack.c.bf16 %v439_v23, %v437_v22  ;;  %v454_v23 = vld [vmem:[%s3672_s1 + $0xcb0] sm:$0xff]  ;;  %v217_v8 = vld [vmem:[%s3672_s1 + $0x548] sm:$0xff]  ;;  %v219_v9 = vld [vmem:[%s3672_s1 + $0x558] sm:$0xff] }
  0x71   :  { %1416 = vmatpush1.bf16.msra.mxu1 %v1415_v28  ;;  %v1437_v28 = vpack.c.bf16 %v183_v21, %v181_v20  ;;  %v198_v20 = vld [vmem:[%s3672_s1 + $0x4b0] sm:$0xff]  ;;  %v452_v21 = vld [vmem:[%s3672_s1 + $0xca0] sm:$0xff]  ;;  %v475_v11 = vld [vmem:[%s3672_s1 + $0xd58] sm:$0xff] }
  0x72   :  { %1672 = vmatpush1.bf16.msra.mxu0 %v1671_v29  ;;  %1418 = vmatprep.subr.bf16.mxu1 %v1417_v30  ;;  %v180_v29 = vld [vmem:[%s3672_s1 + $0x420] sm:$0xff]  ;;  %v182_v30 = vld [vmem:[%s3672_s1 + $0x430] sm:$0xff] }
  0x73   :  { %1674 = vmatprep.subr.bf16.mxu0 %v1673_v34  ;;  %v185_v34 = vld [vmem:[%s3672_s1 + $0x448] sm:$0xff]  ;;  %v1439_v39 = vpack.c.bf16 %v182_v30, %v180_v29  ;;  %v1711_v29 = vpack.c.bf16 %v454_v23, %v452_v21  ;;  %v223_v21 = vld [vmem:[%s3672_s1 + $0x578] sm:$0xff] }
  0x74   :  { %v1441_v44 = vpack.c.bf16 %v187_v35, %v185_v34  ;;  %v458_v35 = vld [vmem:[%s3672_s1 + $0xcd0] sm:$0xff]  ;;  %v479_v23 = vld [vmem:[%s3672_s1 + $0xd78] sm:$0xff] }
  0x75   :  { %1420 = vmatpush1.bf16.msra.mxu1 %v1419_v40  ;;  %v184_v40 = vld [vmem:[%s3672_s1 + $0x440] sm:$0xff] }
  0x76   :  { %1676 = vmatpush1.bf16.msra.mxu0 %v1675_v41  ;;  %1422 = vmatprep.subr.bf16.mxu1 %v1421_v42  ;;  %v42_v41 = vld [vmem:[%s3673_s0 + $0xe0] sm:$0xff]  ;;  %v33_v42 = vld [vmem:[%s3673_s0 + $0x98] sm:$0xff]  ;;  %v1443_v55 = vpack.c.bf16 %v186_v45, %v184_v40 }
  0x77   :  { %1678 = vmatprep.subr.bf16.mxu0 %v1677_v46  ;;  %v440_v46 = vld [vmem:[%s3672_s1 + $0xc40] sm:$0xff] }
  0x78   :  { %v1699_v57 = vpack.c.bf16 %v442_v49, %v440_v46  ;;  %v460_v45 = vld [vmem:[%s3672_s1 + $0xce0] sm:$0xff]  ;;  %v211_v49 = vld [vmem:[%s3672_s1 + $0x518] sm:$0xff] }
  0x79   :  { %1424 = vmatpush1.bf16.msra.mxu1 %v1423_v52  ;;  %v445_v52 = vld [vmem:[%s3672_s1 + $0xc68] sm:$0xff] }
  0x7a   :  { %1680 = vmatpush1.bf16.msra.mxu0 %v1679_v53  ;;  %1426 = vmatprep.subr.bf16.mxu1 %v1425_v54  ;;  %v447_v53 = vld [vmem:[%s3672_s1 + $0xc78] sm:$0xff]  ;;  %v19_v54 = vld [vmem:[%s3673_s0 + $0x28] sm:$0xff] }
  0x7b   :  { %1682 = vmatprep.subr.bf16.mxu0 %v1681_v58  ;;  %v1445_v58 = vpack.c.bf16 %v191_v51, %v189_v50  ;;  %v1701_v62 = vpack.c.bf16 %v447_v53, %v445_v52  ;;  %v465_v50 = vld [vmem:[%s3672_s1 + $0xd08] sm:$0xff]  ;;  %v467_v51 = vld [vmem:[%s3672_s1 + $0xd18] sm:$0xff] }
  0x7d   :  { %1428 = vmatpush1.bf16.msra.mxu1 %v1427_v0  ;;  %v193_v0 = vld [vmem:[%s3672_s1 + $0x488] sm:$0xff] }
  0x7e   :  { %1684 = vmatpush1.bf16.msra.mxu0 %v1683_v1  ;;  %1430 = vmatprep.subr.bf16.mxu1 %v1429_v2  ;;  %v195_v1 = vld [vmem:[%s3672_s1 + $0x498] sm:$0xff]  ;;  %v449_v2 = vld [vmem:[%s3672_s1 + $0xc88] sm:$0xff] }
  0x7f   :  { %1686 = vmatprep.subr.bf16.mxu0 %v1685_v6  ;;  %v1449_v6 = vpack.c.bf16 %v195_v1, %v193_v0  ;;  %v1705_v10 = vpack.c.bf16 %v451_v3, %v449_v2  ;;  %v1469_v2 = vpack.c.bf16 %v215_v61, %v213_v60  ;;  %v212_v3 = vld [vmem:[%s3672_s1 + $0x520] sm:$0xff] }
  0x81   :  { %1432 = vmatpush1.bf16.msra.mxu1 %v1431_v12  ;;  %v197_v12 = vld [vmem:[%s3672_s1 + $0x4a8] sm:$0xff] }
  0x82   :  { %1688 = vmatpush1.bf16.msra.mxu0 %v1687_v13  ;;  %1434 = vmatprep.subr.bf16.mxu1 %v1433_v14  ;;  %v199_v13 = vld [vmem:[%s3672_s1 + $0x4b8] sm:$0xff]  ;;  %v453_v14 = vld [vmem:[%s3672_s1 + $0xca8] sm:$0xff] }
  0x83   :  { %1690 = vmatprep.subr.bf16.mxu0 %v1689_v18  ;;  %v1453_v18 = vpack.c.bf16 %v199_v13, %v197_v12  ;;  %v1709_v22 = vpack.c.bf16 %v455_v15, %v453_v14  ;;  %v1473_v14 = vpack.c.bf16 %v219_v9, %v217_v8  ;;  %v216_v15 = vld [vmem:[%s3672_s1 + $0x540] sm:$0xff] }
  0x84   :  { %746 = vmatmul.mubr.f32.vlgmr.msra.gmra.mrb[0].mxu1 %v16_v24  ;;  %v201_v24 = vld [vmem:[%s3672_s1 + $0x4c8] sm:$0xff] }
  0x85   :  { %1436 = vmatpush1.bf16.msra.mxu1 %v1435_v25  ;;  %1054 = vmatmul.mubr.f32.vlgmr.msra.gmra.mrb[0].mxu0 %v24_v26  ;;  %v203_v25 = vld [vmem:[%s3672_s1 + $0x4d8] sm:$0xff]  ;;  %v457_v26 = vld [vmem:[%s3672_s1 + $0xcc8] sm:$0xff] }
  0x86   :  { %1692 = vmatpush1.bf16.msra.mxu0 %v1691_v27  ;;  %1438 = vmatprep.subr.bf16.mxu1 %v1437_v28  ;;  %v459_v27 = vld [vmem:[%s3672_s1 + $0xcd8] sm:$0xff]  ;;  %v1455_v28 = vpack.c.bf16 %v198_v20, %v196_v19  ;;  %v1457_v30 = vpack.c.bf16 %v203_v25, %v201_v24  ;;  %v474_v19 = vld [vmem:[%s3672_s1 + $0xd50] sm:$0xff]  ;;  %v221_v20 = vld [vmem:[%s3672_s1 + $0x568] sm:$0xff] }
  0x87   :  { %1694 = vmatprep.subr.bf16.mxu0 %v1693_v32  ;;  %751 = vmatprep.mubr.f32.mxu1 %v34_v38  ;;  %v202_v32 = vld [vmem:[%s3672_s1 + $0x4d0] sm:$0xff]  ;;  %v1713_v34 = vpack.c.bf16 %v459_v27, %v457_v26  ;;  %v461_v38 = vld [vmem:[%s3672_s1 + $0xce8] sm:$0xff]  ;;  %v1477_v26 = vpack.c.bf16 %v223_v21, %v221_v20  ;;  %v220_v27 = vld [vmem:[%s3672_s1 + $0x560] sm:$0xff] }
  0x88   :  { %1059 = vmatprep.mubr.f32.mxu0 %v42_v41  ;;  %752 = vmatmul.mubr.f32.gmra.mrb[2].mxu1 %v33_v42  ;;  %v1459_v40 = vpack.c.bf16 %v202_v32, %v200_v31  ;;  %v1715_v41 = vpack.c.bf16 %v458_v35, %v456_v33  ;;  %v1461_v42 = vpack.c.bf16 %v207_v37, %v205_v36  ;;  %v478_v31 = vld [vmem:[%s3672_s1 + $0xd70] sm:$0xff]  ;;  %v225_v32 = vld [vmem:[%s3672_s1 + $0x588] sm:$0xff]  ;;  %v227_v33 = vld [vmem:[%s3672_s1 + $0x598] sm:$0xff] }
  0x89   :  { %1440 = vmatpush1.bf16.msra.mxu1 %v1439_v39  ;;  %1060 = vmatmul.mubr.f32.gmra.mrb[2].mxu0 %v41_v47  ;;  %v463_v39 = vld [vmem:[%s3672_s1 + $0xcf8] sm:$0xff]  ;;  %v462_v47 = vld [vmem:[%s3672_s1 + $0xcf0] sm:$0xff] }
  0x8a   :  { %1696 = vmatpush1.bf16.msra.mxu0 %v1695_v43  ;;  %1442 = vmatprep.subr.bf16.mxu1 %v1441_v44  ;;  %v204_v43 = vld [vmem:[%s3672_s1 + $0x4e0] sm:$0xff]  ;;  %v206_v44 = vld [vmem:[%s3672_s1 + $0x4f0] sm:$0xff]  ;;  %v1717_v46 = vpack.c.bf16 %v463_v39, %v461_v38  ;;  %v1719_v53 = vpack.c.bf16 %v462_v47, %v460_v45  ;;  %v483_v35 = vld [vmem:[%s3672_s1 + $0xd98] sm:$0xff]  ;;  %v1481_v38 = vpack.c.bf16 %v227_v33, %v225_v32 }
  0x8b   :  { %1698 = vmatprep.subr.bf16.mxu0 %v1697_v48  ;;  %822 = vmatprep.mubr.f32.mxu1 %v19_v54  ;;  %v209_v48 = vld [vmem:[%s3672_s1 + $0x508] sm:$0xff]  ;;  %v1463_v52 = vpack.c.bf16 %v206_v44, %v204_v43  ;;  %v224_v39 = vld [vmem:[%s3672_s1 + $0x580] sm:$0xff]  ;;  %v482_v43 = vld [vmem:[%s3672_s1 + $0xd90] sm:$0xff] }
  0x8c   :  { %1130 = vmatprep.mubr.f32.mxu0 %v27_v56  ;;  %v1465_v54 = vpack.c.bf16 %v211_v49, %v209_v48  ;;  %v210_v56 = vld [vmem:[%s3672_s1 + $0x510] sm:$0xff]  ;;  %v229_v44 = vld [vmem:[%s3672_s1 + $0x5a8] sm:$0xff]  ;;  %v231_v45 = vld [vmem:[%s3672_s1 + $0x5b8] sm:$0xff] }
  0x8d   :  { %1444 = vmatpush1.bf16.msra.mxu1 %v1443_v55  ;;  %v208_v55 = vld [vmem:[%s3672_s1 + $0x500] sm:$0xff]  ;;  %v487_v47 = vld [vmem:[%s3672_s1 + $0xdb8] sm:$0xff] }
  0x8e   :  { %1700 = vmatpush1.bf16.msra.mxu0 %v1699_v57  ;;  %1446 = vmatprep.subr.bf16.mxu1 %v1445_v58  ;;  %v464_v57 = vld [vmem:[%s3672_s1 + $0xd00] sm:$0xff]  ;;  %v1721_v58 = vpack.c.bf16 %v467_v51, %v465_v50  ;;  %v1467_v0 = vpack.c.bf16 %v210_v56, %v208_v55  ;;  %v1485_v50 = vpack.c.bf16 %v231_v45, %v229_v44  ;;  %v486_v55 = vld [vmem:[%s3672_s1 + $0xdb0] sm:$0xff]  ;;  %v233_v56 = vld [vmem:[%s3672_s1 + $0x5c8] sm:$0xff] }
  0x8f   :  { %1702 = vmatprep.subr.bf16.mxu0 %v1701_v62  ;;  %v469_v62 = vld [vmem:[%s3672_s1 + $0xd28] sm:$0xff]  ;;  %v1723_v1 = vpack.c.bf16 %v466_v59, %v464_v57  ;;  %v228_v51 = vld [vmem:[%s3672_s1 + $0x5a0] sm:$0xff]  ;;  %v235_v57 = vld [vmem:[%s3672_s1 + $0x5d8] sm:$0xff] }
  0x90   :  { %v491_v59 = vld [vmem:[%s3672_s1 + $0xdd8] sm:$0xff]  ;;  %v18_v32 = vld [vmem:[%s3673_s0 + $0x20] sm:$0xff]  ;;  %v505_v44 = vld [vmem:[%s3672_s1 + $0xe48] sm:$0xff] }
  0x91   :  { %1448 = vmatpush1.bf16.msra.mxu1 %v1447_v4  ;;  %v214_v4 = vld [vmem:[%s3672_s1 + $0x530] sm:$0xff]  ;;  %v507_v45 = vld [vmem:[%s3672_s1 + $0xe58] sm:$0xff] }
  0x92   :  { %1704 = vmatpush1.bf16.msra.mxu0 %v1703_v5  ;;  %1450 = vmatprep.subr.bf16.mxu1 %v1449_v6  ;;  %v468_v5 = vld [vmem:[%s3672_s1 + $0xd20] sm:$0xff]  ;;  %v1725_v6 = vpack.c.bf16 %v471_v63, %v469_v62  ;;  %v1471_v12 = vpack.c.bf16 %v214_v4, %v212_v3  ;;  %v1489_v62 = vpack.c.bf16 %v235_v57, %v233_v56  ;;  %v490_v3 = vld [vmem:[%s3672_s1 + $0xdd0] sm:$0xff]  ;;  %v237_v4 = vld [vmem:[%s3672_s1 + $0x5e8] sm:$0xff] }
  0x93   :  { %1706 = vmatprep.subr.bf16.mxu0 %v1705_v10  ;;  %v473_v10 = vld [vmem:[%s3672_s1 + $0xd48] sm:$0xff]  ;;  %v1727_v13 = vpack.c.bf16 %v470_v7, %v468_v5  ;;  %v232_v63 = vld [vmem:[%s3672_s1 + $0x5c0] sm:$0xff]  ;;  %v239_v5 = vld [vmem:[%s3672_s1 + $0x5f8] sm:$0xff]  ;;  %v1761_v56 = vpack.c.bf16 %v507_v45, %v505_v44 }
  0x94   :  { %v495_v7 = vld [vmem:[%s3672_s1 + $0xdf8] sm:$0xff]  ;;  %v506_v57 = vld [vmem:[%s3672_s1 + $0xe50] sm:$0xff]  ;;  %v269_v44 = vld [vmem:[%s3672_s1 + $0x6e8] sm:$0xff] }
  0x95   :  { %1452 = vmatpush1.bf16.msra.mxu1 %v1451_v16  ;;  %v218_v16 = vld [vmem:[%s3672_s1 + $0x550] sm:$0xff]  ;;  %v271_v45 = vld [vmem:[%s3672_s1 + $0x6f8] sm:$0xff] }
  0x96   :  { %1708 = vmatpush1.bf16.msra.mxu0 %v1707_v17  ;;  %1454 = vmatprep.subr.bf16.mxu1 %v1453_v18  ;;  %v472_v17 = vld [vmem:[%s3672_s1 + $0xd40] sm:$0xff]  ;;  %v1729_v18 = vpack.c.bf16 %v475_v11, %v473_v10  ;;  %v1475_v24 = vpack.c.bf16 %v218_v16, %v216_v15  ;;  %v1493_v10 = vpack.c.bf16 %v239_v5, %v237_v4  ;;  %v494_v15 = vld [vmem:[%s3672_s1 + $0xdf0] sm:$0xff]  ;;  %v241_v16 = vld [vmem:[%s3672_s1 + $0x608] sm:$0xff] }
  0x97   :  { %1710 = vmatprep.subr.bf16.mxu0 %v1709_v22  ;;  %v477_v22 = vld [vmem:[%s3672_s1 + $0xd68] sm:$0xff]  ;;  %v1731_v25 = vpack.c.bf16 %v474_v19, %v472_v17  ;;  %v236_v11 = vld [vmem:[%s3672_s1 + $0x5e0] sm:$0xff]  ;;  %v243_v17 = vld [vmem:[%s3672_s1 + $0x618] sm:$0xff] }
  0x98   :  { %v499_v19 = vld [vmem:[%s3672_s1 + $0xe18] sm:$0xff]  ;;  %v254_v4 = vld [vmem:[%s3672_s1 + $0x670] sm:$0xff]  ;;  %v508_v5 = vld [vmem:[%s3672_s1 + $0xe60] sm:$0xff] }
  0x99   :  { %1456 = vmatpush1.bf16.msra.mxu1 %v1455_v28  ;;  %v222_v28 = vld [vmem:[%s3672_s1 + $0x570] sm:$0xff] }
  0x9a   :  { %1712 = vmatpush1.bf16.msra.mxu0 %v1711_v29  ;;  %1458 = vmatprep.subr.bf16.mxu1 %v1457_v30  ;;  %v476_v29 = vld [vmem:[%s3672_s1 + $0xd60] sm:$0xff]  ;;  %v1733_v30 = vpack.c.bf16 %v479_v23, %v477_v22  ;;  %v1479_v36 = vpack.c.bf16 %v222_v28, %v220_v27  ;;  %v1497_v22 = vpack.c.bf16 %v243_v17, %v241_v16  ;;  %v498_v27 = vld [vmem:[%s3672_s1 + $0xe10] sm:$0xff]  ;;  %v245_v28 = vld [vmem:[%s3672_s1 + $0x628] sm:$0xff] }
  0x9b   :  { %1714 = vmatprep.subr.bf16.mxu0 %v1713_v34  ;;  %v481_v34 = vld [vmem:[%s3672_s1 + $0xd88] sm:$0xff]  ;;  %v1735_v37 = vpack.c.bf16 %v478_v31, %v476_v29  ;;  %v240_v23 = vld [vmem:[%s3672_s1 + $0x600] sm:$0xff]  ;;  %v247_v29 = vld [vmem:[%s3672_s1 + $0x638] sm:$0xff] }
  0x9c   :  { %v503_v31 = vld [vmem:[%s3672_s1 + $0xe38] sm:$0xff]  ;;  %v258_v16 = vld [vmem:[%s3672_s1 + $0x690] sm:$0xff]  ;;  %v512_v17 = vld [vmem:[%s3672_s1 + $0xe80] sm:$0xff] }
  0x9d   :  { %1460 = vmatpush1.bf16.msra.mxu1 %v1459_v40  ;;  %v226_v40 = vld [vmem:[%s3672_s1 + $0x590] sm:$0xff] }
  0x9e   :  { %1716 = vmatpush1.bf16.msra.mxu0 %v1715_v41  ;;  %1462 = vmatprep.subr.bf16.mxu1 %v1461_v42  ;;  %v480_v41 = vld [vmem:[%s3672_s1 + $0xd80] sm:$0xff]  ;;  %v1737_v42 = vpack.c.bf16 %v483_v35, %v481_v34  ;;  %v1483_v48 = vpack.c.bf16 %v226_v40, %v224_v39 }
  0x9f   :  { %1718 = vmatprep.subr.bf16.mxu0 %v1717_v46  ;;  %v485_v46 = vld [vmem:[%s3672_s1 + $0xda8] sm:$0xff]  ;;  %v1739_v49 = vpack.c.bf16 %v482_v43, %v480_v41  ;;  %v26_v34 = vld [vmem:[%s3673_s0 + $0x60] sm:$0xff]  ;;  %v502_v41 = vld [vmem:[%s3672_s1 + $0xe30] sm:$0xff] }
  0xa0   :  { %v500_v39 = vld [vmem:[%s3672_s1 + $0xe20] sm:$0xff]  ;;  %v251_v43 = vld [vmem:[%s3672_s1 + $0x658] sm:$0xff] }
  0xa1   :  { %1464 = vmatpush1.bf16.msra.mxu1 %v1463_v52  ;;  %v230_v52 = vld [vmem:[%s3672_s1 + $0x5b0] sm:$0xff] }
  0xa2   :  { %1720 = vmatpush1.bf16.msra.mxu0 %v1719_v53  ;;  %1466 = vmatprep.subr.bf16.mxu1 %v1465_v54  ;;  %v484_v53 = vld [vmem:[%s3672_s1 + $0xda0] sm:$0xff]  ;;  %v1741_v54 = vpack.c.bf16 %v487_v47, %v485_v46  ;;  %v1487_v60 = vpack.c.bf16 %v230_v52, %v228_v51  ;;  %v36_v46 = vld [vmem:[%s3673_s0 + $0xb0] sm:$0xff]  ;;  %v1759_v51 = vpack.c.bf16 %v502_v41, %v500_v39 }
  0xa3   :  { %1722 = vmatprep.subr.bf16.mxu0 %v1721_v58  ;;  %v489_v58 = vld [vmem:[%s3672_s1 + $0xdc8] sm:$0xff]  ;;  %v1743_v61 = vpack.c.bf16 %v486_v55, %v484_v53  ;;  %v250_v53 = vld [vmem:[%s3672_s1 + $0x650] sm:$0xff]  ;;  %v264_v39 = vld [vmem:[%s3672_s1 + $0x6c0] sm:$0xff] }
  0xa4   :  { %v43_v55 = vld [vmem:[%s3673_s0 + $0xe8] sm:$0xff]  ;;  %v520_v41 = vld [vmem:[%s3672_s1 + $0xec0] sm:$0xff] }
  0xa5   :  { %1468 = vmatpush1.bf16.msra.mxu1 %v1467_v0  ;;  %v234_v0 = vld [vmem:[%s3672_s1 + $0x5d0] sm:$0xff] }
  0xa6   :  { %1724 = vmatpush1.bf16.msra.mxu0 %v1723_v1  ;;  %1470 = vmatprep.subr.bf16.mxu1 %v1469_v2  ;;  %v488_v1 = vld [vmem:[%s3672_s1 + $0xdc0] sm:$0xff]  ;;  %v1745_v2 = vpack.c.bf16 %v491_v59, %v489_v58  ;;  %v1491_v8 = vpack.c.bf16 %v234_v0, %v232_v63  ;;  %v253_v58 = vld [vmem:[%s3672_s1 + $0x668] sm:$0xff]  ;;  %v255_v59 = vld [vmem:[%s3672_s1 + $0x678] sm:$0xff] }
  0xa7   :  { %1726 = vmatprep.subr.bf16.mxu0 %v1725_v6  ;;  %v493_v6 = vld [vmem:[%s3672_s1 + $0xde8] sm:$0xff]  ;;  %v1747_v9 = vpack.c.bf16 %v490_v3, %v488_v1  ;;  %v29_v0 = vld [vmem:[%s3673_s0 + $0x78] sm:$0xff]  ;;  %v252_v3 = vld [vmem:[%s3672_s1 + $0x660] sm:$0xff] }
  0xa9   :  { %1472 = vmatpush1.bf16.msra.mxu1 %v1471_v12  ;;  %v238_v12 = vld [vmem:[%s3672_s1 + $0x5f0] sm:$0xff] }
  0xaa   :  { %1728 = vmatpush1.bf16.msra.mxu0 %v1727_v13  ;;  %1474 = vmatprep.subr.bf16.mxu1 %v1473_v14  ;;  %v492_v13 = vld [vmem:[%s3672_s1 + $0xde0] sm:$0xff]  ;;  %v1749_v14 = vpack.c.bf16 %v495_v7, %v493_v6  ;;  %v1495_v20 = vpack.c.bf16 %v238_v12, %v236_v11  ;;  %v510_v7 = vld [vmem:[%s3672_s1 + $0xe70] sm:$0xff]  ;;  %v515_v11 = vld [vmem:[%s3672_s1 + $0xe98] sm:$0xff]  ;;  %v1511_v12 = vpack.c.bf16 %v254_v4, %v252_v3 }
  0xab   :  { %1730 = vmatprep.subr.bf16.mxu0 %v1729_v18  ;;  %v497_v18 = vld [vmem:[%s3672_s1 + $0xe08] sm:$0xff]  ;;  %v1751_v21 = vpack.c.bf16 %v494_v15, %v492_v13  ;;  %v1767_v13 = vpack.c.bf16 %v510_v7, %v508_v5  ;;  %v256_v15 = vld [vmem:[%s3672_s1 + $0x680] sm:$0xff]  ;;  %v530_v3 = vld [vmem:[%s3672_s1 + $0xf10] sm:$0xff] }
  0xac   :  { %v277_v4 = vld [vmem:[%s3672_s1 + $0x728] sm:$0xff]  ;;  %v279_v5 = vld [vmem:[%s3672_s1 + $0x738] sm:$0xff] }
  0xad   :  { %1476 = vmatpush1.bf16.msra.mxu1 %v1475_v24  ;;  %v242_v24 = vld [vmem:[%s3672_s1 + $0x610] sm:$0xff]  ;;  %v535_v7 = vld [vmem:[%s3672_s1 + $0xf38] sm:$0xff] }
  0xae   :  { %1732 = vmatpush1.bf16.msra.mxu0 %v1731_v25  ;;  %1478 = vmatprep.subr.bf16.mxu1 %v1477_v26  ;;  %v496_v25 = vld [vmem:[%s3672_s1 + $0xe00] sm:$0xff]  ;;  %v1753_v26 = vpack.c.bf16 %v499_v19, %v497_v18  ;;  %v1499_v33 = vpack.c.bf16 %v242_v24, %v240_v23  ;;  %v514_v19 = vld [vmem:[%s3672_s1 + $0xe90] sm:$0xff]  ;;  %v519_v23 = vld [vmem:[%s3672_s1 + $0xeb8] sm:$0xff]  ;;  %v1515_v24 = vpack.c.bf16 %v258_v16, %v256_v15 }
  0xaf   :  { %1734 = vmatprep.subr.bf16.mxu0 %v1733_v30  ;;  %v501_v30 = vld [vmem:[%s3672_s1 + $0xe28] sm:$0xff]  ;;  %v1755_v35 = vpack.c.bf16 %v498_v27, %v496_v25  ;;  %v1771_v25 = vpack.c.bf16 %v514_v19, %v512_v17  ;;  %v260_v27 = vld [vmem:[%s3672_s1 + $0x6a0] sm:$0xff]  ;;  %v534_v15 = vld [vmem:[%s3672_s1 + $0xf30] sm:$0xff] }
  0xb0   :  { %v1757_v40 = vpack.c.bf16 %v503_v31, %v501_v30  ;;  %v518_v31 = vld [vmem:[%s3672_s1 + $0xeb0] sm:$0xff]  ;;  %v281_v16 = vld [vmem:[%s3672_s1 + $0x748] sm:$0xff]  ;;  %v283_v17 = vld [vmem:[%s3672_s1 + $0x758] sm:$0xff] }
  0xb1   :  { %1480 = vmatpush1.bf16.msra.mxu1 %v1479_v36  ;;  %v1501_v36 = vpack.c.bf16 %v247_v29, %v245_v28  ;;  %v262_v28 = vld [vmem:[%s3672_s1 + $0x6b0] sm:$0xff]  ;;  %v516_v29 = vld [vmem:[%s3672_s1 + $0xea0] sm:$0xff]  ;;  %v539_v19 = vld [vmem:[%s3672_s1 + $0xf58] sm:$0xff] }
  0xb2   :  { %1736 = vmatpush1.bf16.msra.mxu0 %v1735_v37  ;;  %1482 = vmatprep.subr.bf16.mxu1 %v1481_v38  ;;  %v244_v37 = vld [vmem:[%s3672_s1 + $0x620] sm:$0xff]  ;;  %v246_v38 = vld [vmem:[%s3672_s1 + $0x630] sm:$0xff] }
  0xb3   :  { %1738 = vmatprep.subr.bf16.mxu0 %v1737_v42  ;;  %v249_v42 = vld [vmem:[%s3672_s1 + $0x648] sm:$0xff]  ;;  %v1503_v47 = vpack.c.bf16 %v246_v38, %v244_v37  ;;  %v1775_v37 = vpack.c.bf16 %v518_v31, %v516_v29  ;;  %v287_v29 = vld [vmem:[%s3672_s1 + $0x778] sm:$0xff] }
  0xb4   :  { %v1505_v52 = vpack.c.bf16 %v251_v43, %v249_v42  ;;  %v522_v43 = vld [vmem:[%s3672_s1 + $0xed0] sm:$0xff]  ;;  %v543_v31 = vld [vmem:[%s3672_s1 + $0xf78] sm:$0xff] }
  0xb5   :  { %1484 = vmatpush1.bf16.msra.mxu1 %v1483_v48  ;;  %v248_v48 = vld [vmem:[%s3672_s1 + $0x640] sm:$0xff] }
  0xb6   :  { %1740 = vmatpush1.bf16.msra.mxu0 %v1739_v49  ;;  %1486 = vmatprep.subr.bf16.mxu1 %v1485_v50  ;;  %v44_v49 = vld [vmem:[%s3673_s0 + $0xf0] sm:$0xff]  ;;  %v35_v50 = vld [vmem:[%s3673_s0 + $0xa8] sm:$0xff]  ;;  %v1507_v63 = vpack.c.bf16 %v250_v53, %v248_v48  ;;  %v524_v53 = vld [vmem:[%s3672_s1 + $0xee0] sm:$0xff] }
  0xb7   :  { %1742 = vmatprep.subr.bf16.mxu0 %v1741_v54  ;;  %v504_v54 = vld [vmem:[%s3672_s1 + $0xe40] sm:$0xff] }
  0xb8   :  { %v1763_v1 = vpack.c.bf16 %v506_v57, %v504_v54  ;;  %v275_v57 = vld [vmem:[%s3672_s1 + $0x718] sm:$0xff] }
  0xb9   :  { %1488 = vmatpush1.bf16.msra.mxu1 %v1487_v60  ;;  %v509_v60 = vld [vmem:[%s3672_s1 + $0xe68] sm:$0xff] }
  0xba   :  { %1744 = vmatpush1.bf16.msra.mxu0 %v1743_v61  ;;  %1490 = vmatprep.subr.bf16.mxu1 %v1489_v62  ;;  %v511_v61 = vld [vmem:[%s3672_s1 + $0xe78] sm:$0xff] }
  0xbb   :  { %1746 = vmatprep.subr.bf16.mxu0 %v1745_v2  ;;  %v21_v62 = vld [vmem:[%s3673_s0 + $0x38] sm:$0xff]  ;;  %v1509_v2 = vpack.c.bf16 %v255_v59, %v253_v58  ;;  %v1765_v6 = vpack.c.bf16 %v511_v61, %v509_v60  ;;  %v529_v58 = vld [vmem:[%s3672_s1 + $0xf08] sm:$0xff] }
  0xbc   :  { %v531_v59 = vld [vmem:[%s3672_s1 + $0xf18] sm:$0xff] }
  0xbd   :  { %1492 = vmatpush1.bf16.msra.mxu1 %v1491_v8  ;;  %v257_v8 = vld [vmem:[%s3672_s1 + $0x688] sm:$0xff] }
  0xbe   :  { %1748 = vmatpush1.bf16.msra.mxu0 %v1747_v9  ;;  %1494 = vmatprep.subr.bf16.mxu1 %v1493_v10  ;;  %v259_v9 = vld [vmem:[%s3672_s1 + $0x698] sm:$0xff]  ;;  %v513_v10 = vld [vmem:[%s3672_s1 + $0xe88] sm:$0xff] }
  0xbf   :  { %1750 = vmatprep.subr.bf16.mxu0 %v1749_v14  ;;  %v1513_v14 = vpack.c.bf16 %v259_v9, %v257_v8  ;;  %v1769_v18 = vpack.c.bf16 %v515_v11, %v513_v10  ;;  %v1533_v10 = vpack.c.bf16 %v279_v5, %v277_v4  ;;  %v276_v11 = vld [vmem:[%s3672_s1 + $0x720] sm:$0xff] }
  0xc1   :  { %1496 = vmatpush1.bf16.msra.mxu1 %v1495_v20  ;;  %v261_v20 = vld [vmem:[%s3672_s1 + $0x6a8] sm:$0xff] }
  0xc2   :  { %1752 = vmatpush1.bf16.msra.mxu0 %v1751_v21  ;;  %1498 = vmatprep.subr.bf16.mxu1 %v1497_v22  ;;  %v263_v21 = vld [vmem:[%s3672_s1 + $0x6b8] sm:$0xff]  ;;  %v517_v22 = vld [vmem:[%s3672_s1 + $0xea8] sm:$0xff] }
  0xc3   :  { %1754 = vmatprep.subr.bf16.mxu0 %v1753_v26  ;;  %v1517_v26 = vpack.c.bf16 %v263_v21, %v261_v20  ;;  %v1773_v30 = vpack.c.bf16 %v519_v23, %v517_v22  ;;  %v1537_v22 = vpack.c.bf16 %v283_v17, %v281_v16  ;;  %v280_v23 = vld [vmem:[%s3672_s1 + $0x740] sm:$0xff] }
  0xc4   :  { %823 = vmatmul.mubr.f32.vlgmr.msra.gmra.mrb[0].mxu1 %v18_v32  ;;  %v265_v32 = vld [vmem:[%s3672_s1 + $0x6c8] sm:$0xff] }
  0xc5   :  { %1500 = vmatpush1.bf16.msra.mxu1 %v1499_v33  ;;  %1131 = vmatmul.mubr.f32.vlgmr.msra.gmra.mrb[0].mxu0 %v26_v34  ;;  %v267_v33 = vld [vmem:[%s3672_s1 + $0x6d8] sm:$0xff]  ;;  %v521_v34 = vld [vmem:[%s3672_s1 + $0xec8] sm:$0xff] }
  0xc6   :  { %1756 = vmatpush1.bf16.msra.mxu0 %v1755_v35  ;;  %1502 = vmatprep.subr.bf16.mxu1 %v1501_v36  ;;  %v523_v35 = vld [vmem:[%s3672_s1 + $0xed8] sm:$0xff]  ;;  %v1519_v36 = vpack.c.bf16 %v262_v28, %v260_v27  ;;  %v1521_v38 = vpack.c.bf16 %v267_v33, %v265_v32  ;;  %v538_v27 = vld [vmem:[%s3672_s1 + $0xf50] sm:$0xff]  ;;  %v285_v28 = vld [vmem:[%s3672_s1 + $0x768] sm:$0xff] }
  0xc7   :  { %1758 = vmatprep.subr.bf16.mxu0 %v1757_v40  ;;  %828 = vmatprep.mubr.f32.mxu1 %v36_v46  ;;  %v266_v40 = vld [vmem:[%s3672_s1 + $0x6d0] sm:$0xff]  ;;  %v1777_v42 = vpack.c.bf16 %v523_v35, %v521_v34  ;;  %v525_v46 = vld [vmem:[%s3672_s1 + $0xee8] sm:$0xff]  ;;  %v1541_v34 = vpack.c.bf16 %v287_v29, %v285_v28  ;;  %v284_v35 = vld [vmem:[%s3672_s1 + $0x760] sm:$0xff] }
  0xc8   :  { %1136 = vmatprep.mubr.f32.mxu0 %v44_v49  ;;  %829 = vmatmul.mubr.f32.gmra.mrb[2].mxu1 %v35_v50  ;;  %v1523_v48 = vpack.c.bf16 %v266_v40, %v264_v39  ;;  %v1779_v49 = vpack.c.bf16 %v522_v43, %v520_v41  ;;  %v1525_v50 = vpack.c.bf16 %v271_v45, %v269_v44  ;;  %v542_v39 = vld [vmem:[%s3672_s1 + $0xf70] sm:$0xff]  ;;  %v289_v40 = vld [vmem:[%s3672_s1 + $0x788] sm:$0xff]  ;;  %v291_v41 = vld [vmem:[%s3672_s1 + $0x798] sm:$0xff] }
  0xc9   :  { %1504 = vmatpush1.bf16.msra.mxu1 %v1503_v47  ;;  %1137 = vmatmul.mubr.f32.gmra.mrb[2].mxu0 %v43_v55  ;;  %v527_v47 = vld [vmem:[%s3672_s1 + $0xef8] sm:$0xff]  ;;  %v526_v55 = vld [vmem:[%s3672_s1 + $0xef0] sm:$0xff]  ;;  %v560_v29 = vld [vmem:[%s3672_s1 + $0x1000] sm:$0xff] }
  0xca   :  { %1760 = vmatpush1.bf16.msra.mxu0 %v1759_v51  ;;  %1506 = vmatprep.subr.bf16.mxu1 %v1505_v52  ;;  %v268_v51 = vld [vmem:[%s3672_s1 + $0x6e0] sm:$0xff]  ;;  %v270_v52 = vld [vmem:[%s3672_s1 + $0x6f0] sm:$0xff]  ;;  %v1781_v54 = vpack.c.bf16 %v527_v47, %v525_v46  ;;  %v1783_v61 = vpack.c.bf16 %v526_v55, %v524_v53  ;;  %v547_v43 = vld [vmem:[%s3672_s1 + $0xf98] sm:$0xff]  ;;  %v1545_v46 = vpack.c.bf16 %v291_v41, %v289_v40 }
  0xcb   :  { %1762 = vmatprep.subr.bf16.mxu0 %v1761_v56  ;;  %899 = vmatprep.mubr.f32.mxu1 %v21_v62  ;;  %v273_v56 = vld [vmem:[%s3672_s1 + $0x708] sm:$0xff]  ;;  %v1527_v60 = vpack.c.bf16 %v270_v52, %v268_v51  ;;  %v288_v47 = vld [vmem:[%s3672_s1 + $0x780] sm:$0xff]  ;;  %v546_v51 = vld [vmem:[%s3672_s1 + $0xf90] sm:$0xff] }
  0xcc   :  { %1207 = vmatprep.mubr.f32.mxu0 %v29_v0  ;;  %v1529_v62 = vpack.c.bf16 %v275_v57, %v273_v56  ;;  %v274_v0 = vld [vmem:[%s3672_s1 + $0x710] sm:$0xff]  ;;  %v293_v52 = vld [vmem:[%s3672_s1 + $0x7a8] sm:$0xff]  ;;  %v295_v53 = vld [vmem:[%s3672_s1 + $0x7b8] sm:$0xff] }
  0xcd   :  { %1508 = vmatpush1.bf16.msra.mxu1 %v1507_v63  ;;  %v272_v63 = vld [vmem:[%s3672_s1 + $0x700] sm:$0xff]  ;;  %v551_v55 = vld [vmem:[%s3672_s1 + $0xfb8] sm:$0xff]  ;;  %v569_v40 = vld [vmem:[%s3672_s1 + $0x1048] sm:$0xff] }
  0xce   :  { %1764 = vmatpush1.bf16.msra.mxu0 %v1763_v1  ;;  %1510 = vmatprep.subr.bf16.mxu1 %v1509_v2  ;;  %v528_v1 = vld [vmem:[%s3672_s1 + $0xf00] sm:$0xff]  ;;  %v1785_v2 = vpack.c.bf16 %v531_v59, %v529_v58  ;;  %v1531_v8 = vpack.c.bf16 %v274_v0, %v272_v63  ;;  %v1549_v58 = vpack.c.bf16 %v295_v53, %v293_v52  ;;  %v550_v63 = vld [vmem:[%s3672_s1 + $0xfb0] sm:$0xff]  ;;  %v297_v0 = vld [vmem:[%s3672_s1 + $0x7c8] sm:$0xff] }
  0xcf   :  { %1766 = vmatprep.subr.bf16.mxu0 %v1765_v6  ;;  %v533_v6 = vld [vmem:[%s3672_s1 + $0xf28] sm:$0xff]  ;;  %v1787_v9 = vpack.c.bf16 %v530_v3, %v528_v1  ;;  %v292_v59 = vld [vmem:[%s3672_s1 + $0x7a0] sm:$0xff]  ;;  %v299_v1 = vld [vmem:[%s3672_s1 + $0x7d8] sm:$0xff] }
  0xd0   :  { %v555_v3 = vld [vmem:[%s3672_s1 + $0xfd8] sm:$0xff]  ;;  %v572_v53 = vld [vmem:[%s3672_s1 + $0x1060] sm:$0xff] }
  0xd1   :  { %1512 = vmatpush1.bf16.msra.mxu1 %v1511_v12  ;;  %v278_v12 = vld [vmem:[%s3672_s1 + $0x730] sm:$0xff]  ;;  %v571_v41 = vld [vmem:[%s3672_s1 + $0x1058] sm:$0xff] }
  0xd2   :  { %1768 = vmatpush1.bf16.msra.mxu0 %v1767_v13  ;;  %1514 = vmatprep.subr.bf16.mxu1 %v1513_v14  ;;  %v532_v13 = vld [vmem:[%s3672_s1 + $0xf20] sm:$0xff]  ;;  %v1789_v14 = vpack.c.bf16 %v535_v7, %v533_v6  ;;  %v1535_v20 = vpack.c.bf16 %v278_v12, %v276_v11  ;;  %v1553_v6 = vpack.c.bf16 %v299_v1, %v297_v0  ;;  %v554_v11 = vld [vmem:[%s3672_s1 + $0xfd0] sm:$0xff]  ;;  %v301_v12 = vld [vmem:[%s3672_s1 + $0x7e8] sm:$0xff] }
  0xd3   :  { %1770 = vmatprep.subr.bf16.mxu0 %v1769_v18  ;;  %v537_v18 = vld [vmem:[%s3672_s1 + $0xf48] sm:$0xff]  ;;  %v1791_v21 = vpack.c.bf16 %v534_v15, %v532_v13  ;;  %v296_v7 = vld [vmem:[%s3672_s1 + $0x7c0] sm:$0xff]  ;;  %v303_v13 = vld [vmem:[%s3672_s1 + $0x7f8] sm:$0xff] }
  0xd4   :  { %v559_v15 = vld [vmem:[%s3672_s1 + $0xff8] sm:$0xff] }
  0xd5   :  { %1516 = vmatpush1.bf16.msra.mxu1 %v1515_v24  ;;  %v282_v24 = vld [vmem:[%s3672_s1 + $0x750] sm:$0xff] }
  0xd6   :  { %1772 = vmatpush1.bf16.msra.mxu0 %v1771_v25  ;;  %1518 = vmatprep.subr.bf16.mxu1 %v1517_v26  ;;  %v536_v25 = vld [vmem:[%s3672_s1 + $0xf40] sm:$0xff]  ;;  %v1793_v26 = vpack.c.bf16 %v539_v19, %v537_v18  ;;  %v1539_v32 = vpack.c.bf16 %v282_v24, %v280_v23  ;;  %v1557_v18 = vpack.c.bf16 %v303_v13, %v301_v12  ;;  %v558_v23 = vld [vmem:[%s3672_s1 + $0xff0] sm:$0xff]  ;;  %v561_v24 = vld [vmem:[%s3672_s1 + $0x1008] sm:$0xff] }
  0xd7   :  { %1774 = vmatprep.subr.bf16.mxu0 %v1773_v30  ;;  %v541_v30 = vld [vmem:[%s3672_s1 + $0xf68] sm:$0xff]  ;;  %v1795_v33 = vpack.c.bf16 %v538_v27, %v536_v25  ;;  %v300_v19 = vld [vmem:[%s3672_s1 + $0x7e0] sm:$0xff]  ;;  %v563_v25 = vld [vmem:[%s3672_s1 + $0x1018] sm:$0xff] }
  0xd8   :  { %v1817_v28 = vpack.c.bf16 %v563_v25, %v561_v24 }
  0xd9   :  { %1520 = vmatpush1.bf16.msra.mxu1 %v1519_v36  ;;  %v286_v36 = vld [vmem:[%s3672_s1 + $0x770] sm:$0xff] }
  0xda   :  { %1776 = vmatpush1.bf16.msra.mxu0 %v1775_v37  ;;  %1522 = vmatprep.subr.bf16.mxu1 %v1521_v38  ;;  %v540_v37 = vld [vmem:[%s3672_s1 + $0xf60] sm:$0xff]  ;;  %v1797_v38 = vpack.c.bf16 %v543_v31, %v541_v30  ;;  %v1543_v44 = vpack.c.bf16 %v286_v36, %v284_v35  ;;  %v562_v30 = vld [vmem:[%s3672_s1 + $0x1010] sm:$0xff]  ;;  %v565_v31 = vld [vmem:[%s3672_s1 + $0x1028] sm:$0xff] }
  0xdb   :  { %1778 = vmatprep.subr.bf16.mxu0 %v1777_v42  ;;  %v545_v42 = vld [vmem:[%s3672_s1 + $0xf88] sm:$0xff]  ;;  %v1799_v45 = vpack.c.bf16 %v542_v39, %v540_v37  ;;  %v28_v35 = vld [vmem:[%s3673_s0 + $0x70] sm:$0xff]  ;;  %v564_v36 = vld [vmem:[%s3672_s1 + $0x1020] sm:$0xff] }
  0xdc   :  { %v566_v37 = vld [vmem:[%s3672_s1 + $0x1030] sm:$0xff] }
  0xdd   :  { %1524 = vmatpush1.bf16.msra.mxu1 %v1523_v48  ;;  %v290_v48 = vld [vmem:[%s3672_s1 + $0x790] sm:$0xff] }
  0xde   :  { %1780 = vmatpush1.bf16.msra.mxu0 %v1779_v49  ;;  %1526 = vmatprep.subr.bf16.mxu1 %v1525_v50  ;;  %v544_v49 = vld [vmem:[%s3672_s1 + $0xf80] sm:$0xff]  ;;  %v1801_v50 = vpack.c.bf16 %v547_v43, %v545_v42  ;;  %v1547_v56 = vpack.c.bf16 %v290_v48, %v288_v47  ;;  %v37_v43 = vld [vmem:[%s3673_s0 + $0xb8] sm:$0xff]  ;;  %v570_v48 = vld [vmem:[%s3672_s1 + $0x1050] sm:$0xff] }
  0xdf   :  { %1782 = vmatprep.subr.bf16.mxu0 %v1781_v54  ;;  %v549_v54 = vld [vmem:[%s3672_s1 + $0xfa8] sm:$0xff]  ;;  %v1803_v57 = vpack.c.bf16 %v546_v51, %v544_v49  ;;  %v46_v42 = vld [vmem:[%s3673_s0 + $0x100] sm:$0xff] }
  0xe0   :  { %v568_v47 = vld [vmem:[%s3672_s1 + $0x1040] sm:$0xff]  ;;  %v573_v49 = vld [vmem:[%s3672_s1 + $0x1068] sm:$0xff] }
  0xe1   :  { %1528 = vmatpush1.bf16.msra.mxu1 %v1527_v60  ;;  %v294_v60 = vld [vmem:[%s3672_s1 + $0x7b0] sm:$0xff]  ;;  %v1827_v51 = vpack.c.bf16 %v570_v48, %v568_v47 }
  0xe2   :  { %1784 = vmatpush1.bf16.msra.mxu0 %v1783_v61  ;;  %1530 = vmatprep.subr.bf16.mxu1 %v1529_v62  ;;  %v548_v61 = vld [vmem:[%s3672_s1 + $0xfa0] sm:$0xff]  ;;  %v1805_v62 = vpack.c.bf16 %v551_v55, %v549_v54  ;;  %v1551_v4 = vpack.c.bf16 %v294_v60, %v292_v59  ;;  %v574_v54 = vld [vmem:[%s3672_s1 + $0x1070] sm:$0xff]  ;;  %v577_v55 = vld [vmem:[%s3672_s1 + $0x1088] sm:$0xff] }
  0xe3   :  { %1786 = vmatprep.subr.bf16.mxu0 %v1785_v2  ;;  %v553_v2 = vld [vmem:[%s3672_s1 + $0xfc8] sm:$0xff]  ;;  %v1807_v5 = vpack.c.bf16 %v550_v63, %v548_v61  ;;  %v576_v60 = vld [vmem:[%s3672_s1 + $0x1080] sm:$0xff]  ;;  %v578_v61 = vld [vmem:[%s3672_s1 + $0x1090] sm:$0xff] }
  0xe4   :  { %v583_v63 = vld [vmem:[%s3672_s1 + $0x10b8] sm:$0xff]  ;;  %v1835_v0 = vpack.c.bf16 %v578_v61, %v576_v60 }
  0xe5   :  { %1532 = vmatpush1.bf16.msra.mxu1 %v1531_v8  ;;  %v298_v8 = vld [vmem:[%s3672_s1 + $0x7d0] sm:$0xff] }
  0xe6   :  { %1788 = vmatpush1.bf16.msra.mxu0 %v1787_v9  ;;  %1534 = vmatprep.subr.bf16.mxu1 %v1533_v10  ;;  %v552_v9 = vld [vmem:[%s3672_s1 + $0xfc0] sm:$0xff]  ;;  %v1809_v10 = vpack.c.bf16 %v555_v3, %v553_v2  ;;  %v1555_v16 = vpack.c.bf16 %v298_v8, %v296_v7  ;;  %v582_v3 = vld [vmem:[%s3672_s1 + $0x10b0] sm:$0xff] }
  0xe7   :  { %1790 = vmatprep.subr.bf16.mxu0 %v1789_v14  ;;  %v557_v14 = vld [vmem:[%s3672_s1 + $0xfe8] sm:$0xff]  ;;  %v1811_v17 = vpack.c.bf16 %v554_v11, %v552_v9  ;;  %v580_v2 = vld [vmem:[%s3672_s1 + $0x10a0] sm:$0xff]  ;;  %v586_v9 = vld [vmem:[%s3672_s1 + $0x10d0] sm:$0xff] }
  0xe8   :  { %v584_v8 = vld [vmem:[%s3672_s1 + $0x10c0] sm:$0xff]  ;;  %v591_v11 = vld [vmem:[%s3672_s1 + $0x10f8] sm:$0xff] }
  0xe9   :  { %1536 = vmatpush1.bf16.msra.mxu1 %v1535_v20  ;;  %v302_v20 = vld [vmem:[%s3672_s1 + $0x7f0] sm:$0xff]  ;;  %v1843_v12 = vpack.c.bf16 %v586_v9, %v584_v8 }
  0xea   :  { %1792 = vmatpush1.bf16.msra.mxu0 %v1791_v21  ;;  %1538 = vmatprep.subr.bf16.mxu1 %v1537_v22  ;;  %v556_v21 = vld [vmem:[%s3672_s1 + $0xfe0] sm:$0xff]  ;;  %v1813_v22 = vpack.c.bf16 %v559_v15, %v557_v14  ;;  %v590_v15 = vld [vmem:[%s3672_s1 + $0x10f0] sm:$0xff] }
  0xeb   :  { %1794 = vmatprep.subr.bf16.mxu0 %v1793_v26  ;;  %v1559_v26 = vpack.c.bf16 %v302_v20, %v300_v19  ;;  %v1815_v27 = vpack.c.bf16 %v558_v23, %v556_v21  ;;  %v588_v14 = vld [vmem:[%s3672_s1 + $0x10e0] sm:$0xff]  ;;  %v594_v19 = vlaneseq }
  0xed   :  { %1540 = vmatpush1.bf16.msra.mxu1 %v1539_v32  ;;  %v567_v32 = vld [vmem:[%s3672_s1 + $0x1038] sm:$0xff]  ;;  %v595_v20 = vshrl.u32 %v594_v19, 7 }
  0xee   :  { %1796 = vmatpush1.bf16.msra.mxu0 %v1795_v33  ;;  %1542 = vmatprep.subr.bf16.mxu1 %v1541_v34  ;;  %v20_v33 = vld [vmem:[%s3673_s0 + $0x30] sm:$0xff]  ;;  %v1819_v34 = vpack.c.bf16 %v562_v30, %v560_v29  ;;  %v1821_v39 = vpack.c.bf16 %v567_v32, %v565_v31 }
  0xef   :  { %1798 = vmatprep.subr.bf16.mxu0 %v1797_v38  ;;  %v38_v38 = vld [vmem:[%s3673_s0 + $0xc0] sm:$0xff]  ;;  %v596_v21 = vsub.s32 0, %v595_v20  ;;  %v600_v24 = vsub.s32 1, %v595_v20 }
  0xf1   :  { %1544 = vmatpush1.bf16.msra.mxu1 %v1543_v44  ;;  %v1823_v44 = vpack.c.bf16 %v566_v37, %v564_v36 }
  0xf2   :  { %1800 = vmatpush1.bf16.msra.mxu0 %v1799_v45  ;;  %1546 = vmatprep.subr.bf16.mxu1 %v1545_v46  ;;  %v45_v45 = vld [vmem:[%s3673_s0 + $0xf8] sm:$0xff]  ;;  %v1825_v46 = vpack.c.bf16 %v571_v41, %v569_v40 }
  0xf3   :  { %1802 = vmatprep.subr.bf16.mxu0 %v1801_v50  ;;  %v575_v50 = vld [vmem:[%s3672_s1 + $0x1078] sm:$0xff] }
  0xf4   :  { %v1829_v52 = vpack.c.bf16 %v575_v50, %v573_v49 }
  0xf5   :  { %1548 = vmatpush1.bf16.msra.mxu1 %v1547_v56  ;;  %v579_v56 = vld [vmem:[%s3672_s1 + $0x1098] sm:$0xff] }
  0xf6   :  { %1804 = vmatpush1.bf16.msra.mxu0 %v1803_v57  ;;  %1550 = vmatprep.subr.bf16.mxu1 %v1549_v58  ;;  %v1902_v57 = vmov 0.0   ;;  %v1831_v58 = vpack.c.bf16 %v574_v54, %v572_v53  ;;  %v1833_v59 = vpack.c.bf16 %v579_v56, %v577_v55 }
  0xf7   :  { %1806 = vmatprep.subr.bf16.mxu0 %v1805_v62  ;;  %v581_v62 = vld [vmem:[%s3672_s1 + $0x10a8] sm:$0xff] }
  0xf8   :  { %v1837_v1 = vpack.c.bf16 %v583_v63, %v581_v62 }
  0xf9   :  { %1552 = vmatpush1.bf16.msra.mxu1 %v1551_v4  ;;  %v585_v4 = vld [vmem:[%s3672_s1 + $0x10c8] sm:$0xff] }
  0xfa   :  { %1808 = vmatpush1.bf16.msra.mxu0 %v1807_v5  ;;  %1554 = vmatprep.subr.bf16.mxu1 %v1553_v6  ;;  %v587_v5 = vld [vmem:[%s3672_s1 + $0x10d8] sm:$0xff]  ;;  %v1839_v6 = vpack.c.bf16 %v582_v3, %v580_v2 }
  0xfb   :  { %1810 = vmatprep.subr.bf16.mxu0 %v1809_v10  ;;  %v1841_v7 = vpack.c.bf16 %v587_v5, %v585_v4  ;;  %v589_v10 = vld [vmem:[%s3672_s1 + $0x10e8] sm:$0xff] }
  0xfc   :  { %v1845_v13 = vpack.c.bf16 %v591_v11, %v589_v10 }
  0xfd   :  { %1556 = vmatpush1.bf16.msra.mxu1 %v1555_v16  ;;  %v1847_v16 = vpack.c.bf16 %v590_v15, %v588_v14 }
  0xfe   :  { %1812 = vmatpush1.bf16.msra.mxu0 %v1811_v17  ;;  %1558 = vmatprep.subr.bf16.mxu1 %v1557_v18  ;;  %v47_v17 = vld [vmem:[%s3673_s0 + $0x108] sm:$0xff]  ;;  %v30_v18 = vld [vmem:[%s3673_s0 + $0x80] sm:$0xff] }
  0xff   :  { %1814 = vmatprep.subr.bf16.mxu0 %v1813_v22  ;;  %v592_v22 = vld [vmem:[%s3674_s2] sm:$0x3] }
 0x101   :  { %1560 = vmatpush1.bf16.msra.mxu1 %v1559_v26  ;;  %v597_v26 = vrot.slane %v592_v22, %v596_v21 }
 0x102   :  { %1816 = vmatpush1.bf16.msra.mxu0 %v1815_v27  ;;  %1849 = vmatprep.subr.bf16.mxu1 %v1817_v28  ;;  %v601_v27 = vrot.slane %v592_v22, %v600_v24 }
 0x103   :  { %1818 = vmatprep.subr.bf16.mxu0 %v1817_v28 }
 0x104   :  { %900 = vmatmul.mubr.f32.vlgmr.msra.gmra.mrb[0].mxu1 %v20_v33 }
 0x105   :  { %1208 = vmatmul.mubr.f32.vlgmr.msra.gmra.mrb[0].mxu0 %v28_v35  ;;  %1857 = vmatpush1.bf16.msra.mxu1 %v1819_v34 }
 0x106   :  { %1820 = vmatpush1.bf16.msra.mxu0 %v1819_v34  ;;  %905 = vmatprep.mubr.f32.mxu1 %v38_v38 }
 0x107   :  { %1213 = vmatprep.mubr.f32.mxu0 %v46_v42  ;;  %1822 = vmatprep.subr.bf16.mxu0 %v1821_v39 }
 0x108   :  { %906 = vmatmul.mubr.f32.gmra.mrb[2].mxu1 %v37_v43  ;;  %1850 = vmatprep.subr.bf16.mxu1 %v1821_v39 }
 0x109   :  { %1214 = vmatmul.mubr.f32.gmra.mrb[2].mxu0 %v45_v45  ;;  %1858 = vmatpush1.bf16.msra.mxu1 %v1823_v44 }
 0x10a   :  { %1824 = vmatpush1.bf16.msra.mxu0 %v1823_v44  ;;  %1851 = vmatprep.subr.bf16.mxu1 %v1825_v46 }
 0x10b   :  { %1826 = vmatprep.subr.bf16.mxu0 %v1825_v46  ;;  %1284 = vmatprep.mubr.f32.mxu0 %v1902_v57 }
 0x10c   :  { %1290 = vmatprep.mubr.f32.mxu1 %v1902_v57 }
 0x10d   :  { %1859 = vmatpush1.bf16.msra.mxu1 %v1827_v51 }
 0x10e   :  { %1828 = vmatpush1.bf16.msra.mxu0 %v1827_v51  ;;  %1852 = vmatprep.subr.bf16.mxu1 %v1829_v52 }
 0x10f   :  { %1830 = vmatprep.subr.bf16.mxu0 %v1829_v52 }
 0x111   :  { %1860 = vmatpush1.bf16.msra.mxu1 %v1831_v58 }
 0x112   :  { %1832 = vmatpush1.bf16.msra.mxu0 %v1831_v58  ;;  %1853 = vmatprep.subr.bf16.mxu1 %v1833_v59 }
 0x113   :  { %1834 = vmatprep.subr.bf16.mxu0 %v1833_v59 }
 0x115   :  { %1861 = vmatpush1.bf16.msra.mxu1 %v1835_v0 }
 0x116   :  { %1836 = vmatpush1.bf16.msra.mxu0 %v1835_v0  ;;  %1854 = vmatprep.subr.bf16.mxu1 %v1837_v1 }
 0x117   :  { %1838 = vmatprep.subr.bf16.mxu0 %v1837_v1 }
 0x119   :  { %1862 = vmatpush1.bf16.msra.mxu1 %v1839_v6 }
 0x11a   :  { %1840 = vmatpush1.bf16.msra.mxu0 %v1839_v6  ;;  %1855 = vmatprep.subr.bf16.mxu1 %v1841_v7 }
 0x11b   :  { %1842 = vmatprep.subr.bf16.mxu0 %v1841_v7 }
 0x11d   :  { %1863 = vmatpush1.bf16.msra.mxu1 %v1843_v12 }
 0x11e   :  { %1844 = vmatpush1.bf16.msra.mxu0 %v1843_v12  ;;  %1856 = vmatprep.subr.bf16.mxu1 %v1845_v13 }
 0x11f   :  { %1846 = vmatprep.subr.bf16.mxu0 %v1845_v13 }
 0x121   :  { %1864 = vmatpush1.bf16.msra.mxu1 %v1847_v16 }
 0x122   :  { %1848 = vmatpush1.bf16.msra.mxu0 %v1847_v16 }
 0x124   :  { %1291 = vmatmul.mubr.f32.vlgmr.msra.gmra.mrb[4].mxu1 %v47_v17 }
 0x125   :  { %1285 = vmatmul.mubr.f32.vlgmr.msra.gmra.mrb[0].mxu0 %v30_v18 }
 0x1d7   :  { %v901_v23 = vpop.f32.mrb[0].mxu1 }
 0x1d8   :  { %v903_v25 = vpop.f32.mrb[1].mxu1  ;;  %v1865_v36 = vadd.f32 %v901_v23, %v597_v26 }
 0x1d9   :  { %v1867_v38 = vadd.f32 %v903_v25, %v601_v27 }
 0x1db   :  { %v907_v28 = vpop.f32.mrb[2].mxu1 }
 0x1dc   :  { %v1869_v29 = vadd.f32 %v907_v28, %v597_v26  ;;  %v1215_v30 = vpop.f32.mrb[2].mxu0  ;;  %v909_v31 = vpop.f32.mrb[3].mxu1 }
 0x1dd   :  { %v1872_v32 = vadd.f32 %v909_v31, %v601_v27  ;;  %v1217_v33 = vpop.f32.mrb[3].mxu0 }
 0x1de   :  { %v1870_v34 = vadd.f32 %v1869_v29, %v1215_v30 }
 0x1df   :  { %v1873_v35 = vadd.f32 %v1872_v32, %v1217_v33 }
 0x1f7   :  { %v1292_v37 = vpop.f32.mrb[4].mxu1 }
 0x1f8   :  { %v1286_v39 = vpop.f32.mrb[0].mxu0  ;;  %v1871_v40 = vadd.f32 %v1870_v34, %v1292_v37  ;;  %v1294_v41 = vpop.f32.mrb[5].mxu1 }
 0x1f9   :  { %v1866_v42 = vadd.f32 %v1865_v36, %v1286_v39  ;;  %v1288_v43 = vpop.f32.mrb[1].mxu0  ;;  %v1874_v44 = vadd.f32 %v1873_v35, %v1294_v41 }
 0x1fa   :  { %1299 = vst [vmem:[%s3675_s3 + $0x10] sm:$0xff] %v1871_v40  ;;  %v1868_v45 = vadd.f32 %v1867_v38, %v1288_v43 }
 0x1fb   :  { %1297 = vst [vmem:[%s3675_s3] sm:$0xff] %v1866_v42  ;;  %1300 = vst [vmem:[%s3675_s3 + $0x18] sm:$0xff] %v1874_v44 }
 0x1fc   :  { %1298 = vst [vmem:[%s3675_s3 + $0x8] sm:$0xff] %v1868_v45 }

// kernel: smpl_regressor_forward.12
= control target key start
LH: loop header
LB: loop body
LE: loop exit
PB: predicated region body
PF: predicated region fallthrough
CT: control target
= control target key end

     0   :  { %v538_v14 = vmov 1966171168   ;;  %v248_v16 = vlaneseq  ;;  %s686_s0 = inlined_call_operand.vmem [shape: f32[3,384], index: 0, kind: input, shape index: {}]   ;;  %s687_s1 = inlined_call_operand.vmem [shape: f32[3,384], index: 1, kind: input, shape index: {}]   ;;  %s688_s2 = inlined_call_operand.vmem [shape: f32[9,384], index: 2, kind: output, shape index: {}]  }
   0x1   :  { %v11_v0 = vld [vmem:[%s686_s0] sm:$0x77]  ;;  %v12_v1 = vld [vmem:[%s686_s0 + $0x8] sm:$0x7]  ;;  %v246_v15 = vunpack.c.l.s4 %v538_v14 }
   0x2   :  { %v15_v2 = vmul.f32 %v11_v0, %v11_v0  ;;  %v16_v3 = vmul.f32 %v12_v1, %v12_v1  ;;  %v249_v18 = vshrl.u32 %v248_v16, 7  ;;  %v13_v28 = vld [vmem:[%s687_s1] sm:$0x77]  ;;  %v14_v32 = vld [vmem:[%s687_s1 + $0x8] sm:$0x7]  ;;  %vm584_vm0 = vcmp.lt.s32.totalorder %v248_v16, 384 }
   0x3   :  { %v247_v17 = vunpack.c.0.s8 %v246_v15 }
   0x4   :  { %v495_v4 = vrot.slane %v15_v2, 9  ;;  %v496_v5 = vrot.slane %v16_v3, 9  ;;  %v497_v6 = vrot.slane %v15_v2, 10  ;;  %v498_v7 = vrot.slane %v16_v3, 10 }
   0x5   :  { %v562_v24 = vsub.s32 %v247_v17, %v249_v18 }
   0x6   :  { %v25_v8 = vadd.f32 %v495_v4, %v15_v2  ;;  %v26_v9 = vadd.f32 %v496_v5, %v16_v3 }
   0x8   :  { %v33_v10 = vadd.f32 %v497_v6, %v25_v8  ;;  %v34_v11 = vadd.f32 %v498_v7, %v26_v9 }
   0xa   :  { %v35_v12 = vmax.f32 %v33_v10, 1e-24  ;;  %v36_v13 = vmax.f32 %v34_v11, 1e-24 }
   0xc   :  { %530 = vrsqrt.f32 %v35_v12 }
   0xd   :  { %532 = vrsqrt.f32 %v36_v13 }
  0x16   :  { %v531_v19 = vpop.eup %530 }
  0x17   :  { %v533_v20 = vpop.eup %532  ;;  %v560_v21 = vmul.f32 %v531_v19, %v11_v0  ;;  %v43_v22 = vrot.slane %v531_v19, 7  ;;  %v49_v23 = vrot.slane %v531_v19, 6 }
  0x18   :  { %v564_v25 = vmul.f32 %v533_v20, %v12_v1  ;;  %v44_v26 = vrot.slane %v533_v20, 7  ;;  %v50_v27 = vrot.slane %v533_v20, 6 }
  0x19   :  { %v569_v29 = vmul.f32 %v43_v22, %v11_v0  ;;  %v571_v30 = vmul.f32 %v49_v23, %v11_v0  ;;  %v251_v31 = vrot.slane %v560_v21, %v562_v24  ;;  %v55_v37 = vmul.f32 %v560_v21, %v13_v28 }
  0x1a   :  { %v578_v33 = vmul.f32 %v44_v26, %v12_v1  ;;  %v580_v34 = vmul.f32 %v50_v27, %v12_v1  ;;  %v258_v35 = vrot.slane %v564_v25, %v562_v24  ;;  %v56_v41 = vmul.f32 %v564_v25, %v14_v32 }
  0x1b   :  { %v57_v38 = vmul.f32 %v569_v29, %v13_v28  ;;  %v69_v39 = vmul.f32 %v571_v30, %v13_v28  ;;  %v503_v46 = vrot.slane %v569_v29, 9  ;;  %v334_v47 = vrot.slane %v569_v29, %v562_v24 }
  0x1c   :  { %v259_v40 = vcombine.low %v251_v31, %v258_v35  ;;  %v58_v42 = vmul.f32 %v578_v33, %v14_v32  ;;  %v70_v43 = vmul.f32 %v580_v34, %v14_v32  ;;  %v341_v51 = vrot.slane %v578_v33, %v562_v24 }
  0x1d   :  { %v499_v44 = vrot.slane %v57_v38, 9  ;;  %v501_v45 = vrot.slane %v69_v39, 10  ;;  %v505_v53 = vrot.slane %v571_v30, 10  ;;  %v415_v54 = vrot.slane %v571_v30, %v562_v24 }
  0x1e   :  { %v266_v48 = vrot.slane %v259_v40, %v562_v24  ;;  %v500_v49 = vrot.slane %v58_v42, 9  ;;  %v502_v50 = vrot.slane %v70_v43, 10  ;;  %v422_v55 = vrot.slane %v580_v34, %v562_v24 }
  0x1f   :  { %v67_v52 = vadd.f32 %v499_v44, %v55_v37  ;;  %v504_v57 = vrot.slane %v578_v33, 9  ;;  %v506_v58 = vrot.slane %v580_v34, 10  ;;  %v342_v59 = vcombine.high %v334_v47, %v341_v51 }
  0x20   :  { %272 = vst.msk [vmem:[%s688_s2] ss:$8 sm:$0x7] %vm584_vm0, %v266_v48  ;;  %v68_v56 = vadd.f32 %v500_v49, %v56_v41  ;;  %v423_v61 = vcombine.low %v415_v54, %v422_v55 }
  0x21   :  { %v79_v60 = vadd.f32 %v501_v45, %v67_v52  ;;  %v349_v63 = vrot.slane %v342_v59, %v562_v24 }
  0x22   :  { %v80_v62 = vadd.f32 %v502_v50, %v68_v56  ;;  %v430_v3 = vrot.slane %v423_v61, %v562_v24 }
  0x23   :  { %v81_v0 = vmul.f32 %v79_v60, %v560_v21  ;;  %v93_v1 = vmul.f32 %v503_v46, %v79_v60  ;;  %v111_v2 = vmul.f32 %v505_v53, %v79_v60  ;;  %523 = vst.msk [vmem:[%s688_s2 + $0x3] ss:$8 sm:$0x7] %vm584_vm0, %v349_v63 }
  0x24   :  { %v82_v4 = vmul.f32 %v80_v62, %v564_v25  ;;  %v94_v5 = vmul.f32 %v504_v57, %v80_v62  ;;  %v112_v6 = vmul.f32 %v506_v58, %v80_v62  ;;  %v431_v10 = vcombine.high %v430_v3, %v430_v3 }
  0x25   :  { %v83_v7 = vsub.f32 %v13_v28, %v81_v0  ;;  %v97_v8 = vrot.slane %v93_v1, 7  ;;  %v115_v9 = vrot.slane %v111_v2, 6 }
  0x26   :  { %v84_v11 = vsub.f32 %v14_v32, %v82_v4  ;;  %v98_v12 = vrot.slane %v94_v5, 7  ;;  %v116_v13 = vrot.slane %v112_v6, 6  ;;  %526 = vst.msk [vmem:[%s688_s2 + $0x6] ss:$8 sm:$0x7] %vm584_vm0, %v431_v10 }
  0x27   :  { %v101_v14 = vsub.f32 %v13_v28, %v97_v8  ;;  %v119_v15 = vsub.f32 %v13_v28, %v115_v9  ;;  %v121_v18 = vmul.f32 %v83_v7, %v83_v7 }
  0x28   :  { %v102_v16 = vsub.f32 %v14_v32, %v98_v12  ;;  %v120_v17 = vsub.f32 %v14_v32, %v116_v13  ;;  %v122_v22 = vmul.f32 %v84_v11, %v84_v11 }
  0x29   :  { %v123_v19 = vmul.f32 %v101_v14, %v101_v14  ;;  %v135_v20 = vmul.f32 %v119_v15, %v119_v15 }
  0x2a   :  { %v124_v23 = vmul.f32 %v102_v16, %v102_v16  ;;  %v136_v26 = vmul.f32 %v120_v17, %v120_v17 }
  0x2b   :  { %v507_v27 = vrot.slane %v123_v19, 9  ;;  %v509_v31 = vrot.slane %v135_v20, 10 }
  0x2c   :  { %v508_v35 = vrot.slane %v124_v23, 9  ;;  %v510_v37 = vrot.slane %v136_v26, 10 }
  0x2d   :  { %v133_v38 = vadd.f32 %v507_v27, %v121_v18 }
  0x2e   :  { %v134_v28 = vadd.f32 %v508_v35, %v122_v22 }
  0x2f   :  { %v145_v39 = vadd.f32 %v509_v31, %v133_v38 }
  0x30   :  { %v146_v40 = vadd.f32 %v510_v37, %v134_v28 }
  0x31   :  { %v147_v41 = vmax.f32 %v145_v39, 1e-24 }
  0x32   :  { %v148_v42 = vmax.f32 %v146_v40, 1e-24 }
  0x33   :  { %534 = vrsqrt.f32 %v147_v41 }
  0x34   :  { %536 = vrsqrt.f32 %v148_v42 }
  0x3d   :  { %v535_v43 = vpop.eup %534 }
  0x3e   :  { %v537_v32 = vpop.eup %536  ;;  %v151_v44 = vmul.f32 %v535_v43, %v83_v7  ;;  %v155_v45 = vrot.slane %v535_v43, 7  ;;  %v161_v46 = vrot.slane %v535_v43, 6 }
  0x3f   :  { %v152_v47 = vmul.f32 %v537_v32, %v84_v11  ;;  %v156_v48 = vrot.slane %v537_v32, 7  ;;  %v162_v49 = vrot.slane %v537_v32, 6 }
  0x40   :  { %v280_v50 = vrot.slane %v151_v44, %v562_v24  ;;  %v159_v51 = vmul.f32 %v155_v45, %v101_v14  ;;  %v165_v52 = vmul.f32 %v161_v46, %v119_v15  ;;  %v197_v53 = vrot.slane %v151_v44, 6 }
  0x41   :  { %v287_v54 = vrot.slane %v152_v47, %v562_v24  ;;  %v160_v55 = vmul.f32 %v156_v48, %v102_v16  ;;  %v166_v56 = vmul.f32 %v162_v49, %v120_v17  ;;  %v198_v57 = vrot.slane %v152_v47, 6 }
  0x42   :  { %v511_v58 = vrot.slane %v165_v52, 9  ;;  %v179_v59 = vrot.slane %v159_v51, 7  ;;  %v360_v60 = vrot.slane %v159_v51, %v562_v24  ;;  %v201_v61 = vmul.f32 %v197_v53, %v571_v30 }
  0x43   :  { %v288_v62 = vcombine.low %v280_v50, %v287_v54  ;;  %v512_v63 = vrot.slane %v166_v56, 9  ;;  %v180_v0 = vrot.slane %v160_v55, 7  ;;  %v367_v1 = vrot.slane %v160_v55, %v562_v24 }
  0x44   :  { %v175_v2 = vmul.f32 %v511_v58, %v569_v29  ;;  %v183_v3 = vmul.f32 %v179_v59, %v571_v30  ;;  %v202_v4 = vmul.f32 %v198_v57, %v580_v34  ;;  %v515_v5 = vrot.slane %v165_v52, 10 }
  0x45   :  { %v295_v6 = vrot.slane %v288_v62, %v562_v24  ;;  %v176_v7 = vmul.f32 %v512_v63, %v578_v33  ;;  %v184_v8 = vmul.f32 %v180_v0, %v580_v34  ;;  %v368_v9 = vcombine.high %v360_v60, %v367_v1 }
  0x46   :  { %v513_v10 = vrot.slane %v183_v3, 9  ;;  %v516_v11 = vrot.slane %v166_v56, 10  ;;  %v209_v12 = vmul.f32 %v515_v5, %v560_v21  ;;  %v442_v13 = vrot.slane %v165_v52, %v562_v24 }
  0x47   :  { %521 = vst.msk [vmem:[%s688_s2 + $0x1] ss:$8 sm:$0x7] %vm584_vm0, %v295_v6  ;;  %v514_v30 = vrot.slane %v184_v8, 9  ;;  %v375_v14 = vrot.slane %v368_v9, %v562_v24  ;;  %v449_v15 = vrot.slane %v166_v56, %v562_v24  ;;  %v517_v16 = vrot.slane %v159_v51, 9 }
  0x48   :  { %v193_v34 = vsub.f32 %v175_v2, %v513_v10  ;;  %v210_v17 = vmul.f32 %v516_v11, %v564_v25  ;;  %v213_v18 = vrot.slane %v209_v12, 6  ;;  %v518_v19 = vrot.slane %v160_v55, 9 }
  0x49   :  { %v194_v20 = vsub.f32 %v176_v7, %v514_v30  ;;  %524 = vst.msk [vmem:[%s688_s2 + $0x4] ss:$8 sm:$0x7] %vm584_vm0, %v375_v14  ;;  %v450_v22 = vcombine.low %v442_v13, %v449_v15  ;;  %v227_v23 = vrot.slane %v151_v44, 7  ;;  %v225_v35 = vmul.f32 %v517_v16, %v560_v21 }
  0x4a   :  { %v308_v26 = vrot.slane %v193_v34, %v562_v24  ;;  %v214_v27 = vrot.slane %v210_v17, 6  ;;  %v217_v31 = vsub.f32 %v201_v61, %v213_v18  ;;  %v228_v28 = vrot.slane %v152_v47, 7 }
  0x4b   :  { %v315_v37 = vrot.slane %v194_v20, %v562_v24  ;;  %v457_v38 = vrot.slane %v450_v22, %v562_v24  ;;  %v231_v39 = vmul.f32 %v227_v23, %v569_v29  ;;  %v226_v42 = vmul.f32 %v518_v19, %v564_v25 }
  0x4c   :  { %v218_v40 = vsub.f32 %v202_v4, %v214_v27  ;;  %v388_v41 = vrot.slane %v217_v31, %v562_v24  ;;  %v232_v44 = vmul.f32 %v228_v28, %v578_v33 }
  0x4d   :  { %v316_v43 = vcombine.high %v308_v26, %v315_v37  ;;  %v458_v32 = vcombine.high %v457_v38, %v457_v38  ;;  %v519_v45 = vrot.slane %v231_v39, 9 }
  0x4e   :  { %v395_v46 = vrot.slane %v218_v40, %v562_v24  ;;  %v520_v29 = vrot.slane %v232_v44, 9 }
  0x4f   :  { %v323_v21 = vrot.slane %v316_v43, %v562_v24  ;;  %527 = vst.msk [vmem:[%s688_s2 + $0x7] ss:$8 sm:$0x7] %vm584_vm0, %v458_v32  ;;  %v241_v47 = vsub.f32 %v225_v35, %v519_v45 }
  0x50   :  { %v396_v48 = vcombine.low %v388_v41, %v395_v46  ;;  %v242_v25 = vsub.f32 %v226_v42, %v520_v29 }
  0x51   :  { %522 = vst.msk [vmem:[%s688_s2 + $0x2] ss:$8 sm:$0x7] %vm584_vm0, %v323_v21  ;;  %v471_v33 = vrot.slane %v241_v47, %v562_v24 }
  0x52   :  { %v403_v49 = vrot.slane %v396_v48, %v562_v24  ;;  %v478_v50 = vrot.slane %v242_v25, %v562_v24 }
  0x54   :  { %v404_v51 = vcombine.high %v403_v49, %v403_v49  ;;  %v479_v52 = vcombine.low %v471_v33, %v478_v50 }
  0x56   :  { %525 = vst.msk [vmem:[%s688_s2 + $0x5] ss:$8 sm:$0x7] %vm584_vm0, %v404_v51  ;;  %v486_v53 = vrot.slane %v479_v52, %v562_v24 }
  0x58   :  { %528 = vst.msk [vmem:[%s688_s2 + $0x18] ss:$8 sm:$0x7] %vm584_vm0, %v486_v53 }

// kernel: smpl_regressor_forward.15
= control target key start
LH: loop header
LB: loop body
LE: loop exit
PB: predicated region body
PF: predicated region fallthrough
CT: control target
= control target key end

     0   :  { %s1091_s0 = inlined_call_operand.vmem [shape: f32[48,640], index: 0, kind: input, shape index: {}]   ;;  %s1092_s1 = inlined_call_operand.vmem [shape: f32[640,128], index: 1, kind: input, shape index: {}]   ;;  %s1093_s2 = inlined_call_operand.hbm [shape: f32[48,128], index: 2, kind: output, shape index: {}]  }
   0x1   :  { %v58_v0 = vld [vmem:[%s1092_s1 + $0x80] sm:$0xff]  ;;  %v59_v1 = vld [vmem:[%s1092_s1 + $0x88] sm:$0xff]  ;;  %v60_v11 = vld [vmem:[%s1092_s1 + $0x90] sm:$0xff] }
   0x2   :  { %v90_v2 = vld [vmem:[%s1092_s1 + $0x180] sm:$0xff]  ;;  %v592_v3 = vpack.c.bf16 %v59_v1, %v58_v0  ;;  %v91_v4 = vld [vmem:[%s1092_s1 + $0x188] sm:$0xff]  ;;  %v61_v13 = vld [vmem:[%s1092_s1 + $0x98] sm:$0xff] }
   0x3   :  { %v42_v5 = vld [vmem:[%s1092_s1] sm:$0xff]  ;;  %v43_v6 = vld [vmem:[%s1092_s1 + $0x8] sm:$0xff]  ;;  %v624_v7 = vpack.c.bf16 %v91_v4, %v90_v2  ;;  %v92_v14 = vld [vmem:[%s1092_s1 + $0x190] sm:$0xff]  ;;  %v596_v16 = vpack.c.bf16 %v61_v13, %v60_v11 }
   0x4   :  { %v594_v8 = vpack.c.bf16 %v43_v6, %v42_v5  ;;  %v74_v9 = vld [vmem:[%s1092_s1 + $0x100] sm:$0xff]  ;;  %v75_v10 = vld [vmem:[%s1092_s1 + $0x108] sm:$0xff]  ;;  %593 = vmatprep.subr.bf16.mxu0 %v592_v3  ;;  %v93_v15 = vld [vmem:[%s1092_s1 + $0x198] sm:$0xff] }
   0x5   :  { %v626_v12 = vpack.c.bf16 %v75_v10, %v74_v9  ;;  %625 = vmatprep.subr.bf16.mxu1 %v624_v7  ;;  %v628_v17 = vpack.c.bf16 %v93_v15, %v92_v14  ;;  %v44_v18 = vld [vmem:[%s1092_s1 + $0x10] sm:$0xff]  ;;  %v45_v19 = vld [vmem:[%s1092_s1 + $0x18] sm:$0xff]  ;;  %v62_v23 = vld [vmem:[%s1092_s1 + $0xa0] sm:$0xff] }
   0x6   :  { %595 = vmatpush3.bf16.msra.mxu0 %v594_v8  ;;  %v76_v20 = vld [vmem:[%s1092_s1 + $0x110] sm:$0xff]  ;;  %v598_v21 = vpack.c.bf16 %v45_v19, %v44_v18  ;;  %v77_v22 = vld [vmem:[%s1092_s1 + $0x118] sm:$0xff]  ;;  %v63_v24 = vld [vmem:[%s1092_s1 + $0xa8] sm:$0xff] }
   0x7   :  { %627 = vmatpush3.bf16.msra.mxu1 %v626_v12  ;;  %597 = vmatprep.subr.bf16.mxu0 %v596_v16  ;;  %v630_v25 = vpack.c.bf16 %v77_v22, %v76_v20  ;;  %v600_v26 = vpack.c.bf16 %v63_v24, %v62_v23  ;;  %v94_v27 = vld [vmem:[%s1092_s1 + $0x1a0] sm:$0xff]  ;;  %v95_v28 = vld [vmem:[%s1092_s1 + $0x1a8] sm:$0xff]  ;;  %v64_v35 = vld [vmem:[%s1092_s1 + $0xb0] sm:$0xff] }
   0x8   :  { %629 = vmatprep.subr.bf16.mxu1 %v628_v17  ;;  %v46_v29 = vld [vmem:[%s1092_s1 + $0x20] sm:$0xff]  ;;  %v632_v30 = vpack.c.bf16 %v95_v28, %v94_v27  ;;  %v47_v31 = vld [vmem:[%s1092_s1 + $0x28] sm:$0xff]  ;;  %v65_v36 = vld [vmem:[%s1092_s1 + $0xb8] sm:$0xff] }
   0x9   :  { %v78_v32 = vld [vmem:[%s1092_s1 + $0x120] sm:$0xff]  ;;  %v79_v33 = vld [vmem:[%s1092_s1 + $0x128] sm:$0xff]  ;;  %v602_v34 = vpack.c.bf16 %v47_v31, %v46_v29  ;;  %v96_v37 = vld [vmem:[%s1092_s1 + $0x1b0] sm:$0xff]  ;;  %v604_v39 = vpack.c.bf16 %v65_v36, %v64_v35 }
   0xa   :  { %599 = vmatpush3.bf16.msra.mxu0 %v598_v21  ;;  %v634_v38 = vpack.c.bf16 %v79_v33, %v78_v32  ;;  %v97_v40 = vld [vmem:[%s1092_s1 + $0x1b8] sm:$0xff]  ;;  %v48_v41 = vld [vmem:[%s1092_s1 + $0x30] sm:$0xff]  ;;  %v66_v46 = vld [vmem:[%s1092_s1 + $0xc0] sm:$0xff] }
   0xb   :  { %631 = vmatpush3.bf16.msra.mxu1 %v630_v25  ;;  %601 = vmatprep.subr.bf16.mxu0 %v600_v26  ;;  %v49_v42 = vld [vmem:[%s1092_s1 + $0x38] sm:$0xff]  ;;  %v636_v43 = vpack.c.bf16 %v97_v40, %v96_v37  ;;  %v80_v44 = vld [vmem:[%s1092_s1 + $0x130] sm:$0xff]  ;;  %v67_v47 = vld [vmem:[%s1092_s1 + $0xc8] sm:$0xff] }
   0xc   :  { %633 = vmatprep.subr.bf16.mxu1 %v632_v30  ;;  %v81_v45 = vld [vmem:[%s1092_s1 + $0x138] sm:$0xff]  ;;  %v98_v48 = vld [vmem:[%s1092_s1 + $0x1c0] sm:$0xff]  ;;  %v99_v49 = vld [vmem:[%s1092_s1 + $0x1c8] sm:$0xff]  ;;  %v606_v50 = vpack.c.bf16 %v49_v42, %v48_v41  ;;  %v608_v52 = vpack.c.bf16 %v67_v47, %v66_v46 }
   0xd   :  { %v638_v51 = vpack.c.bf16 %v81_v45, %v80_v44  ;;  %v50_v53 = vld [vmem:[%s1092_s1 + $0x40] sm:$0xff]  ;;  %v51_v54 = vld [vmem:[%s1092_s1 + $0x48] sm:$0xff]  ;;  %v640_v56 = vpack.c.bf16 %v99_v49, %v98_v48  ;;  %v68_v58 = vld [vmem:[%s1092_s1 + $0xd0] sm:$0xff] }
   0xe   :  { %603 = vmatpush3.bf16.msra.mxu0 %v602_v34  ;;  %v82_v55 = vld [vmem:[%s1092_s1 + $0x140] sm:$0xff]  ;;  %v83_v57 = vld [vmem:[%s1092_s1 + $0x148] sm:$0xff]  ;;  %v69_v59 = vld [vmem:[%s1092_s1 + $0xd8] sm:$0xff]  ;;  %v610_v62 = vpack.c.bf16 %v51_v54, %v50_v53 }
   0xf   :  { %635 = vmatpush3.bf16.msra.mxu1 %v634_v38  ;;  %605 = vmatprep.subr.bf16.mxu0 %v604_v39  ;;  %v100_v60 = vld [vmem:[%s1092_s1 + $0x1d0] sm:$0xff]  ;;  %v101_v61 = vld [vmem:[%s1092_s1 + $0x1d8] sm:$0xff]  ;;  %v642_v63 = vpack.c.bf16 %v83_v57, %v82_v55  ;;  %v612_v0 = vpack.c.bf16 %v69_v59, %v68_v58  ;;  %v70_v6 = vld [vmem:[%s1092_s1 + $0xe0] sm:$0xff] }
  0x10   :  { %637 = vmatprep.subr.bf16.mxu1 %v636_v43  ;;  %v52_v1 = vld [vmem:[%s1092_s1 + $0x50] sm:$0xff]  ;;  %v53_v2 = vld [vmem:[%s1092_s1 + $0x58] sm:$0xff]  ;;  %v644_v4 = vpack.c.bf16 %v101_v61, %v100_v60  ;;  %v71_v7 = vld [vmem:[%s1092_s1 + $0xe8] sm:$0xff] }
  0x11   :  { %v84_v3 = vld [vmem:[%s1092_s1 + $0x150] sm:$0xff]  ;;  %v85_v5 = vld [vmem:[%s1092_s1 + $0x158] sm:$0xff]  ;;  %v102_v8 = vld [vmem:[%s1092_s1 + $0x1e0] sm:$0xff]  ;;  %v614_v10 = vpack.c.bf16 %v53_v2, %v52_v1  ;;  %v616_v14 = vpack.c.bf16 %v71_v7, %v70_v6 }
  0x12   :  { %607 = vmatpush3.bf16.msra.mxu0 %v606_v50  ;;  %v103_v9 = vld [vmem:[%s1092_s1 + $0x1e8] sm:$0xff]  ;;  %v54_v11 = vld [vmem:[%s1092_s1 + $0x60] sm:$0xff]  ;;  %v646_v13 = vpack.c.bf16 %v85_v5, %v84_v3  ;;  %v15_v17 = vld [vmem:[%s1091_s0 + $0x18] sm:$0xff] }
  0x13   :  { %639 = vmatpush3.bf16.msra.mxu1 %v638_v51  ;;  %609 = vmatprep.subr.bf16.mxu0 %v608_v52  ;;  %v55_v12 = vld [vmem:[%s1092_s1 + $0x68] sm:$0xff]  ;;  %v86_v15 = vld [vmem:[%s1092_s1 + $0x160] sm:$0xff]  ;;  %v648_v18 = vpack.c.bf16 %v103_v9, %v102_v8  ;;  %v72_v20 = vld [vmem:[%s1092_s1 + $0xf0] sm:$0xff] }
  0x14   :  { %641 = vmatprep.subr.bf16.mxu1 %v640_v56  ;;  %v13_v16 = vld [vmem:[%s1091_s0 + $0x8] sm:$0xff]  ;;  %v73_v21 = vld [vmem:[%s1092_s1 + $0xf8] sm:$0xff]  ;;  %v104_v22 = vld [vmem:[%s1092_s1 + $0x1f0] sm:$0xff]  ;;  %281 = vmatprep.mubr.f32.mxu1 %v15_v17  ;;  %v618_v24 = vpack.c.bf16 %v55_v12, %v54_v11 }
  0x15   :  { %v87_v19 = vld [vmem:[%s1092_s1 + $0x168] sm:$0xff]  ;;  %186 = vmatprep.mubr.f32.mxu0 %v13_v16  ;;  %v105_v23 = vld [vmem:[%s1092_s1 + $0x1f8] sm:$0xff]  ;;  %v620_v26 = vpack.c.bf16 %v73_v21, %v72_v20  ;;  %v56_v27 = vld [vmem:[%s1092_s1 + $0x70] sm:$0xff] }
  0x16   :  { %611 = vmatpush3.bf16.msra.mxu0 %v610_v62  ;;  %v650_v25 = vpack.c.bf16 %v87_v19, %v86_v15  ;;  %v57_v28 = vld [vmem:[%s1092_s1 + $0x78] sm:$0xff]  ;;  %v88_v29 = vld [vmem:[%s1092_s1 + $0x170] sm:$0xff]  ;;  %v652_v30 = vpack.c.bf16 %v105_v23, %v104_v22  ;;  %v106_v32 = vld [vmem:[%s1092_s1 + $0x200] sm:$0xff] }
  0x17   :  { %643 = vmatpush3.bf16.msra.mxu1 %v642_v63  ;;  %613 = vmatprep.subr.bf16.mxu0 %v612_v0  ;;  %v89_v31 = vld [vmem:[%s1092_s1 + $0x178] sm:$0xff]  ;;  %v107_v33 = vld [vmem:[%s1092_s1 + $0x208] sm:$0xff]  ;;  %v622_v34 = vpack.c.bf16 %v57_v28, %v56_v27  ;;  %v108_v37 = vld [vmem:[%s1092_s1 + $0x210] sm:$0xff] }
  0x18   :  { %645 = vmatprep.subr.bf16.mxu1 %v644_v4  ;;  %v654_v35 = vpack.c.bf16 %v89_v31, %v88_v29  ;;  %v656_v36 = vpack.c.bf16 %v107_v33, %v106_v32  ;;  %v109_v38 = vld [vmem:[%s1092_s1 + $0x218] sm:$0xff]  ;;  %v12_v39 = vld [vmem:[%s1091_s0] sm:$0xff]  ;;  %v14_v40 = vld [vmem:[%s1091_s0 + $0x10] sm:$0xff] }
  0x19   :  { %v660_v41 = vpack.c.bf16 %v109_v38, %v108_v37  ;;  %v110_v42 = vld [vmem:[%s1092_s1 + $0x220] sm:$0xff]  ;;  %v111_v43 = vld [vmem:[%s1092_s1 + $0x228] sm:$0xff]  ;;  %v18_v44 = vld [vmem:[%s1091_s0 + $0x30] sm:$0xff] }
  0x1a   :  { %615 = vmatpush3.bf16.msra.mxu0 %v614_v10  ;;  %v20_v45 = vld [vmem:[%s1091_s0 + $0x40] sm:$0xff]  ;;  %v17_v46 = vld [vmem:[%s1091_s0 + $0x28] sm:$0xff] }
  0x1b   :  { %647 = vmatpush3.bf16.msra.mxu1 %v646_v13  ;;  %617 = vmatprep.subr.bf16.mxu0 %v616_v14 }
  0x1c   :  { %649 = vmatprep.subr.bf16.mxu1 %v648_v18 }
  0x1e   :  { %619 = vmatpush3.bf16.msra.mxu0 %v618_v24 }
  0x1f   :  { %651 = vmatpush3.bf16.msra.mxu1 %v650_v25  ;;  %621 = vmatprep.subr.bf16.mxu0 %v620_v26 }
  0x20   :  { %653 = vmatprep.subr.bf16.mxu1 %v652_v30 }
  0x22   :  { %623 = vmatpush3.bf16.msra.mxu0 %v622_v34 }
  0x23   :  { %655 = vmatpush3.bf16.msra.mxu1 %v654_v35  ;;  %657 = vmatprep.subr.bf16.mxu0 %v656_v36 }
  0x24   :  { %688 = vmatprep.subr.bf16.mxu1 %v656_v36 }
  0x25   :  { %187 = vmatmul.mubr.f32.vlgmr.msra.gmra.mrb[0].mxu0 %v12_v39 }
  0x26   :  { %282 = vmatmul.mubr.f32.vlgmr.msra.gmra.mrb[0].mxu1 %v14_v40  ;;  %659 = vmatpush3.bf16.msra.mxu0 %v656_v36 }
  0x27   :  { %7 = vsyncpa [#allocation3], 0  ;;  %696 = vmatpush3.bf16.msra.mxu1 %v656_v36  ;;  %661 = vmatprep.subr.bf16.mxu0 %v660_v41  ;;  %v664_v47 = vpack.c.bf16 %v111_v43, %v110_v42  ;;  %v19_v48 = vld [vmem:[%s1091_s0 + $0x38] sm:$0xff]  ;;  %v112_v49 = vld [vmem:[%s1092_s1 + $0x230] sm:$0xff] }
  0x28   :  { %689 = vmatprep.subr.bf16.mxu1 %v660_v41  ;;  %191 = vmatprep.mubr.f32.mxu0 %v18_v44  ;;  %v113_v50 = vld [vmem:[%s1092_s1 + $0x238] sm:$0xff]  ;;  %v25_v52 = vld [vmem:[%s1091_s0 + $0x68] sm:$0xff]  ;;  %v22_v53 = vld [vmem:[%s1091_s0 + $0x50] sm:$0xff] }
  0x29   :  { %286 = vmatprep.mubr.f32.mxu1 %v20_v45  ;;  %192 = vmatmul.mubr.f32.gmra.mrb[2].mxu0 %v17_v46  ;;  %v23_v51 = vld [vmem:[%s1091_s0 + $0x58] sm:$0xff]  ;;  %v668_v54 = vpack.c.bf16 %v113_v50, %v112_v49  ;;  %v24_v55 = vld [vmem:[%s1091_s0 + $0x60] sm:$0xff]  ;;  %v115_v57 = vld [vmem:[%s1092_s1 + $0x248] sm:$0xff] }
  0x2a   :  { %663 = vmatpush3.bf16.msra.mxu0 %v660_v41  ;;  %287 = vmatmul.mubr.f32.gmra.mrb[2].mxu1 %v19_v48  ;;  %v114_v56 = vld [vmem:[%s1092_s1 + $0x240] sm:$0xff]  ;;  %v30_v59 = vld [vmem:[%s1091_s0 + $0x90] sm:$0xff]  ;;  %v27_v60 = vld [vmem:[%s1091_s0 + $0x78] sm:$0xff] }
  0x2b   :  { %697 = vmatpush3.bf16.msra.mxu1 %v660_v41  ;;  %665 = vmatprep.subr.bf16.mxu0 %v664_v47  ;;  %v28_v58 = vld [vmem:[%s1091_s0 + $0x80] sm:$0xff]  ;;  %v672_v61 = vpack.c.bf16 %v115_v57, %v114_v56  ;;  %v29_v62 = vld [vmem:[%s1091_s0 + $0x88] sm:$0xff]  ;;  %v116_v63 = vld [vmem:[%s1092_s1 + $0x250] sm:$0xff] }
  0x2c   :  { %690 = vmatprep.subr.bf16.mxu1 %v664_v47  ;;  %196 = vmatprep.mubr.f32.mxu0 %v23_v51  ;;  %v117_v0 = vld [vmem:[%s1092_s1 + $0x258] sm:$0xff]  ;;  %v33_v1 = vld [vmem:[%s1091_s0 + $0xa8] sm:$0xff]  ;;  %v32_v3 = vld [vmem:[%s1091_s0 + $0xa0] sm:$0xff] }
  0x2d   :  { %291 = vmatprep.mubr.f32.mxu1 %v25_v52  ;;  %197 = vmatmul.mubr.f32.gmra.mrb[4].mxu0 %v22_v53  ;;  %v35_v2 = vld [vmem:[%s1091_s0 + $0xb8] sm:$0xff]  ;;  %v676_v4 = vpack.c.bf16 %v117_v0, %v116_v63  ;;  %v34_v5 = vld [vmem:[%s1091_s0 + $0xb0] sm:$0xff]  ;;  %v118_v6 = vld [vmem:[%s1092_s1 + $0x260] sm:$0xff] }
  0x2e   :  { %667 = vmatpush3.bf16.msra.mxu0 %v664_v47  ;;  %292 = vmatmul.mubr.f32.gmra.mrb[4].mxu1 %v24_v55  ;;  %v119_v7 = vld [vmem:[%s1092_s1 + $0x268] sm:$0xff]  ;;  %v38_v8 = vld [vmem:[%s1091_s0 + $0xd0] sm:$0xff]  ;;  %v40_v9 = vld [vmem:[%s1091_s0 + $0xe0] sm:$0xff] }
  0x2f   :  { %698 = vmatpush3.bf16.msra.mxu1 %v664_v47  ;;  %669 = vmatprep.subr.bf16.mxu0 %v668_v54  ;;  %v37_v10 = vld [vmem:[%s1091_s0 + $0xc8] sm:$0xff]  ;;  %v680_v11 = vpack.c.bf16 %v119_v7, %v118_v6  ;;  %v39_v12 = vld [vmem:[%s1091_s0 + $0xd8] sm:$0xff]  ;;  %v120_v13 = vld [vmem:[%s1092_s1 + $0x270] sm:$0xff] }
  0x30   :  { %691 = vmatprep.subr.bf16.mxu1 %v668_v54  ;;  %201 = vmatprep.mubr.f32.mxu0 %v28_v58  ;;  %v121_v14 = vld [vmem:[%s1092_s1 + $0x278] sm:$0xff]  ;;  %v16_v15 = vld [vmem:[%s1091_s0 + $0x20] sm:$0xff]  ;;  %v26_v16 = vld [vmem:[%s1091_s0 + $0x70] sm:$0xff] }
  0x31   :  { %296 = vmatprep.mubr.f32.mxu1 %v30_v59  ;;  %202 = vmatmul.mubr.f32.gmra.mrb[6].mxu0 %v27_v60  ;;  %v684_v17 = vpack.c.bf16 %v121_v14, %v120_v13  ;;  %v21_v18 = vld [vmem:[%s1091_s0 + $0x48] sm:$0xff]  ;;  %v31_v19 = vld [vmem:[%s1091_s0 + $0x98] sm:$0xff]  ;;  %v36_v20 = vld [vmem:[%s1091_s0 + $0xc0] sm:$0xff] }
  0x32   :  { %671 = vmatpush3.bf16.msra.mxu0 %v668_v54  ;;  %297 = vmatmul.mubr.f32.gmra.mrb[6].mxu1 %v29_v62  ;;  %v41_v21 = vld [vmem:[%s1091_s0 + $0xe8] sm:$0xff]  ;;  %s731_s0 = smov [#allocation2]  }
  0x33   :  { %699 = vmatpush3.bf16.msra.mxu1 %v668_v54  ;;  %673 = vmatprep.subr.bf16.mxu0 %v672_v61  ;;  %s418_s4 = sshll.u32 %s731_s0, 4  ;;  %s419_s4 = int_to_ptr.vmem [resolvable:$true] %s418_s4 }
  0x34   :  { %692 = vmatprep.subr.bf16.mxu1 %v672_v61  ;;  %206 = vmatprep.mubr.f32.mxu0 %v33_v1  ;;  %s707_s5 = scalar_lea.vmem %s419_s4, 768  ;;  %p712_p1 = scmp.lt.s32.totalorder %s419_s4, %s419_s4 }
  0x35   :  { %301 = vmatprep.mubr.f32.mxu1 %v35_v2  ;;  %207 = vmatmul.mubr.f32.gmra.mrb[8].mxu0 %v32_v3  ;;  %p708_p0 = scmp.ne.s32.totalorder %s419_s4, %s707_s5  ;;  %p713_p2 = scmp.lt.s32.totalorder %s707_s5, %s707_s5 }
  0x36   :  { %675 = vmatpush3.bf16.msra.mxu0 %v672_v61  ;;  %302 = vmatmul.mubr.f32.gmra.mrb[8].mxu1 %v34_v5 }
  0x37   :  { %700 = vmatpush3.bf16.msra.mxu1 %v672_v61  ;;  %677 = vmatprep.subr.bf16.mxu0 %v676_v4  ;;  %p714_p3 = por %p713_p2, %p712_p1 }
  0x38   :  { %693 = vmatprep.subr.bf16.mxu1 %v676_v4  ;;  %211 = vmatprep.mubr.f32.mxu0 %v38_v8 }
  0x39   :  { %306 = vmatprep.mubr.f32.mxu1 %v40_v9  ;;  %212 = vmatmul.mubr.f32.gmra.mrb[10].mxu0 %v37_v10  ;;  %p715_p4 = pnand %p714_p3, %p708_p0 }
  0x3a   :  { %679 = vmatpush3.bf16.msra.mxu0 %v676_v4  ;;  %307 = vmatmul.mubr.f32.gmra.mrb[10].mxu1 %v39_v12 }
  0x3b   :  { %701 = vmatpush3.bf16.msra.mxu1 %v676_v4  ;;  %681 = vmatprep.subr.bf16.mxu0 %v680_v11 }
  0x3c   :  { %694 = vmatprep.subr.bf16.mxu1 %v680_v11  ;;  %583 = vmatprep.mubr.f32.mxu0 %v16_v15 }
  0x3d   :  { %586 = vmatprep.mubr.f32.mxu1 %v26_v16 }
  0x3e   :  { %683 = vmatpush3.bf16.msra.mxu0 %v680_v11 }
  0x3f   :  { %702 = vmatpush3.bf16.msra.mxu1 %v680_v11  ;;  %685 = vmatprep.subr.bf16.mxu0 %v684_v17 }
  0x40   :  { %695 = vmatprep.subr.bf16.mxu1 %v684_v17 }
  0x42   :  { %687 = vmatpush3.bf16.msra.mxu0 %v684_v17 }
  0x43   :  { %703 = vmatpush3.bf16.msra.mxu1 %v684_v17 }
  0x45   :  { %584 = vmatmul.mubr.f32.vlgmr.msra.gmra.mrb[12].mxu0 %v21_v18 }
  0x46   :  { %587 = vmatmul.mubr.f32.vlgmr.msra.gmra.mrb[12].mxu1 %v31_v19 }
  0x47   :  { %589 = vmatprep.mubr.f32.mxu1 %v36_v20 }
  0x4a   :  { %590 = vmatmul.mubr.f32.gmra.mrb[14].mxu1 %v41_v21 }
  0xf8   :  { %v461_v22 = vpop.f32.mrb[0].mxu0 }
  0xf9   :  { %v511_v23 = vpop.f32.mrb[0].mxu1  ;;  %v462_v24 = vpop.f32.mrb[1].mxu0 }
  0xfa   :  { %v463_v25 = vadd.f32 %v462_v24, %v461_v22  ;;  %v512_v26 = vpop.f32.mrb[1].mxu1 }
  0xfb   :  { %v513_v27 = vadd.f32 %v512_v26, %v511_v23 }
  0xfc   :  { %v464_v28 = vpop.f32.mrb[2].mxu0 }
  0xfd   :  { %v514_v29 = vpop.f32.mrb[2].mxu1  ;;  %v465_v30 = vpop.f32.mrb[3].mxu0  ;;  %v284_v31 = vadd.f32 %v513_v27, %v463_v25 }
  0xfe   :  { %v466_v32 = vadd.f32 %v465_v30, %v464_v28  ;;  %v515_v33 = vpop.f32.mrb[3].mxu1 }
  0xff   :  { %v516_v34 = vadd.f32 %v515_v33, %v514_v29 }
 0x100   :  { %v467_v35 = vpop.f32.mrb[4].mxu0 }
 0x101   :  { %v517_v36 = vpop.f32.mrb[4].mxu1  ;;  %v468_v37 = vpop.f32.mrb[5].mxu0  ;;  %v289_v38 = vadd.f32 %v516_v34, %v466_v32 }
 0x102   :  { %v469_v39 = vadd.f32 %v468_v37, %v467_v35  ;;  %v518_v40 = vpop.f32.mrb[5].mxu1 }
 0x103   :  { %v519_v41 = vadd.f32 %v518_v40, %v517_v36 }
 0x104   :  { %v470_v42 = vpop.f32.mrb[6].mxu0 }
 0x105   :  { %v520_v43 = vpop.f32.mrb[6].mxu1  ;;  %v471_v44 = vpop.f32.mrb[7].mxu0  ;;  %v294_v45 = vadd.f32 %v519_v41, %v469_v39 }
 0x106   :  { %v472_v46 = vadd.f32 %v471_v44, %v470_v42  ;;  %v521_v47 = vpop.f32.mrb[7].mxu1 }
 0x107   :  { %v522_v48 = vadd.f32 %v521_v47, %v520_v43 }
 0x108   :  { %v473_v49 = vpop.f32.mrb[8].mxu0 }
 0x109   :  { %v523_v50 = vpop.f32.mrb[8].mxu1  ;;  %v474_v51 = vpop.f32.mrb[9].mxu0  ;;  %v299_v52 = vadd.f32 %v522_v48, %v472_v46 }
 0x10a   :  { %v475_v53 = vadd.f32 %v474_v51, %v473_v49  ;;  %v524_v54 = vpop.f32.mrb[9].mxu1 }
 0x10b   :  { %v525_v55 = vadd.f32 %v524_v54, %v523_v50 }
 0x10c   :  { %v476_v56 = vpop.f32.mrb[10].mxu0 }
 0x10d   :  { %v526_v57 = vpop.f32.mrb[10].mxu1  ;;  %v477_v58 = vpop.f32.mrb[11].mxu0  ;;  %v304_v59 = vadd.f32 %v525_v55, %v475_v53 }
 0x10e   :  { %v478_v60 = vadd.f32 %v477_v58, %v476_v56  ;;  %v527_v61 = vpop.f32.mrb[11].mxu1 }
 0x10f   :  { %v528_v62 = vadd.f32 %v527_v61, %v526_v57 }
 0x111   :  { %v309_v63 = vadd.f32 %v528_v62, %v478_v60 }
 0x118   :  { %v585_v0 = vpop.f32.mrb[12].mxu0 }
 0x119   :  { %v384_v1 = vadd.f32 %v585_v0, %v289_v38  ;;  %v588_v2 = vpop.f32.mrb[12].mxu1  ;;  %v378_v3 = vpop.f32.mrb[13].mxu0 }
 0x11a   :  { %v394_v4 = vadd.f32 %v588_v2, %v299_v52  ;;  %v379_v5 = vadd.f32 %v378_v3, %v284_v31  ;;  %v388_v6 = vpop.f32.mrb[13].mxu1 }
 0x11b   :  { %408 = vst [vmem:[#allocation2 + $0x8] sm:$0xff] %v384_v1  ;;  %v389_v7 = vadd.f32 %v388_v6, %v294_v45 }
 0x11c   :  { %410 = vst [vmem:[#allocation2 + $0x18] sm:$0xff] %v394_v4  ;;  %407 = vst [vmem:[#allocation2] sm:$0xff] %v379_v5 }
 0x11d   :  { %409 = vst [vmem:[#allocation2 + $0x10] sm:$0xff] %v389_v7  ;;  %v591_v8 = vpop.f32.mrb[14].mxu1 }
 0x11e   :  { %v404_v9 = vadd.f32 %v591_v8, %v309_v63  ;;  %v398_v10 = vpop.f32.mrb[15].mxu1 }
 0x11f   :  { %v399_v11 = vadd.f32 %v398_v10, %v304_v59 }
 0x120   :  { %412 = vst [vmem:[#allocation2 + $0x28] sm:$0xff] %v404_v9 }
 0x121   :  { %411 = vst [vmem:[#allocation2 + $0x20] sm:$0xff] %v399_v11 }
 0x122   :  { %718 = shalt.err (!%p715_p4)
}
 0x123   :  { %s719_s8 = scalar_lea.hbm %s1093_s2, 768 }
 0x124   :  { %p720_p5 = scmp.ne.s32.totalorder %s1093_s2, %s719_s8  ;;  %p723_p6 = scmp.lt.u32.totalorder %s719_s8, %s1093_s2 }
 0x126   :  { %p725_p7 = pnand %p723_p6, %p720_p5 }
 0x128   :  { %728 = shalt.err (!%p725_p7)
}
 0x129   :  { %s732_s13 = smov 128   ;;  %s733_s14 = smov 8  }
 0x12a   :  { %424 = dma.vmem_to_hbm [thread:$0]  %s419_s4, 768, %s1093_s2, [#allocation3], %s732_s13, %s732_s13, %s733_s14  }
 0x12b   :  { %729 = dma.done.wait [#allocation3], 768  }
 0x12c   :  { %730 = vsyncadd [#allocation3], 4294966528 }
 0x12d   :  { %428 = vsyncpa [#allocation3], 1 }

// kernel: smpl_regressor_forward.14
= control target key start
LH: loop header
LB: loop body
LE: loop exit
PB: predicated region body
PF: predicated region fallthrough
CT: control target
= control target key end

     0   :  { %s920_s12 = smov 0   ;;  %s922_s13 = smov 0   ;;  %s1063_s0 = inlined_call_operand.vmem [shape: bf16[24,640], index: 0, kind: input, shape index: {}]   ;;  %s1064_s1 = inlined_call_operand.vmem [shape: bf16[192,24], index: 1, kind: input, shape index: {}]   ;;  %s1065_s2 = inlined_call_operand.vmem [shape: f32[3,16,640], index: 2, kind: input, shape index: {}]   ;;  %s1066_s3 = inlined_call_operand.vmem [shape: f32[3,16,640], index: 3, kind: output, shape index: {}]  }
   0x1   :  { %s924_s14 = smov 0  }
   0x2 LB: > { %s742_s15 = sadd.s32 4294967295, %s898_s14   ;;  %s937_s16 = sadd.s32 1, %s898_s14   ;;  %s898_s14 = sphi %s924_s14, %s1071_s14   ;;  %s894_s13 = sphi %s922_s13, %s1070_s13   ;;  %s890_s12 = sphi %s920_s12, %s1069_s12  }
   0x3   : > { %s17_s17 = ssub.s32 %s898_s14, %s937_s16  ;;  %s20_s18 = sadd.s32 1, %s894_s13 }
   0x4   : > { %p18_p0 = scmp.eq.s32.totalorder %s17_s17, 0  ;;  %p27_p1 = scmp.ne.s32.totalorder %s894_s13, %s890_s12 }
   0x5   : > { %p28_p2 = scmp.eq.s32.totalorder %s898_s14, 0  ;;  %p104_p3 = scmp.eq.s32.totalorder %s742_s15, 4 }
   0x6   : > { %s948_s19 = scalar_select %p18_p0, %s894_s13, %s20_s18  }
   0x7   : > { %p950_p4 = por %p28_p2, %p27_p1  ;;  %p954_p5 = por %p104_p3, %p27_p1 }
   0x8   : > { %p745_p6 = scmp.ge.s32.totalorder %s898_s14, 5 }
   0xa   : > { %129 = sbr.rel (%p745_p6) target bundleno = 32 (0x20), region = 20 }
  0x11   : > { %132 = sbr.rel (!%p950_p4) target bundleno = 24 (0x18), region = 24  ;;  %s134_s22 = sand.u32 (%p950_p4), 1, %s894_s13  }
  0x12   : > { %s746_s23 = sshll.u32 (%p950_p4), %s898_s14, 2  ;;  %s834_s24 = smul.u32 (%p950_p4), 12, %s134_s22 }
  0x13   : > { %s138_s27 = scalar_lea.vmem (%p950_p4), %s1063_s0, %s746_s23 }
  0x14   : > { %v154_v0 = vld [vmem:[%s138_s27] sm:$0xf] (%p950_p4)  ;;  %v156_v1 = vld [vmem:[%s138_s27 + $0x14] sm:$0xf] (%p950_p4)  ;;  %v158_v2 = vld [vmem:[%s138_s27 + $0x28] sm:$0xf] (%p950_p4) }
  0x15   : > { %s136_s28 = scalar_lea.vmem (%p950_p4), [#allocation2], %s834_s24 }
  0x16   : > { %155 = vst [vmem:[%s136_s28] sm:$0xf] (%p950_p4), %v154_v0  ;;  %157 = vst [vmem:[%s136_s28 + $0x4] sm:$0xf] (%p950_p4), %v156_v1 }
  0x17   : > { %159 = vst [vmem:[%s136_s28 + $0x8] sm:$0xf] (%p950_p4), %v158_v2 }
  0x18 PF: > { %188 = sbr.rel (!%p950_p4) target bundleno = 32 (0x20), region = 65  ;;  %s190_s29 = sand.u32 (%p950_p4), 1, %s894_s13  }
  0x19   : > { %s747_s30 = sshll.u32 (%p950_p4), %s898_s14, 3  ;;  %s835_s4 = smul.u32 (%p950_p4), 48, %s190_s29 }
  0x1a   : > { %s194_s7 = scalar_lea.vmem (%p950_p4), %s1065_s2, %s747_s30 }
  0x1b   : > { %v232_v3 = vld [vmem:[%s194_s7] sm:$0xff] (%p950_p4)  ;;  %v234_v4 = vld [vmem:[%s194_s7 + $0x28] sm:$0xff] (%p950_p4)  ;;  %v236_v5 = vld [vmem:[%s194_s7 + $0x50] sm:$0xff] (%p950_p4)  ;;  %s192_s8 = scalar_lea.vmem (%p950_p4), [#allocation3], %s835_s4 }
  0x1c   : > { %v238_v6 = vld [vmem:[%s194_s7 + $0x78] sm:$0xff] (%p950_p4)  ;;  %v240_v7 = vld [vmem:[%s194_s7 + $0xa0] sm:$0xff] (%p950_p4)  ;;  %v242_v8 = vld [vmem:[%s194_s7 + $0xc8] sm:$0xff] (%p950_p4)  ;;  %233 = vst [vmem:[%s192_s8] sm:$0xff] (%p950_p4), %v232_v3 }
  0x1d   : > { %235 = vst [vmem:[%s192_s8 + $0x8] sm:$0xff] (%p950_p4), %v234_v4  ;;  %237 = vst [vmem:[%s192_s8 + $0x10] sm:$0xff] (%p950_p4), %v236_v5 }
  0x1e   : > { %239 = vst [vmem:[%s192_s8 + $0x18] sm:$0xff] (%p950_p4), %v238_v6  ;;  %241 = vst [vmem:[%s192_s8 + $0x20] sm:$0xff] (%p950_p4), %v240_v7 }
  0x1f   : > { %243 = vst [vmem:[%s192_s8 + $0x28] sm:$0xff] %v242_v8 }
  0x20 PF: > { %p748_p7 = scmp.ge.s32.totalorder %s898_s14, 1  ;;  %p248_p8 = scmp.lt.s32.totalorder %s898_s14, 6 }
  0x22   : > { %p249_p9 = pnand %p748_p7, %p248_p8 }
  0x23   : > { %s255_s9 = sand.u32 (!%p249_p9), 1, %s890_s12   ;;  %v864_v9 = vld [vmem:[%s1064_s1] sm:$0xff] (!%p249_p9)   ;;  %vm385_vm0 = vcmask (!%p249_p9), 195584   ;;  %v865_v10 = vld [vmem:[%s1064_s1 + $0x30] sm:$0xff] (!%p249_p9)   ;;  %vm422_vm1 = vcmask (!%p249_p9), 1043456   ;;  %v866_v14 = vld [vmem:[%s1064_s1 + $0x8] sm:$0xff] (!%p249_p9)  }
  0x24   : > { %252 = sbr.rel (%p249_p9) target bundleno = 297 (0x129), region = 103  ;;  %804 = vmatprep.mubr.msk.bf16.mxu0 (!%p249_p9), %vm385_vm0, %v864_v9  ;;  %816 = vmatprep.mubr.msk.bf16.mxu1 (!%p249_p9), %vm385_vm0, %v865_v10  ;;  %v867_v15 = vld [vmem:[%s1064_s1 + $0x38] sm:$0xff] (!%p249_p9)   ;;  %v868_v16 = vld [vmem:[%s1064_s1 + $0x10] sm:$0xff] (!%p249_p9)   ;;  %v869_v17 = vld [vmem:[%s1064_s1 + $0x40] sm:$0xff] (!%p249_p9)  }
  0x25   : > { %s836_s10 = smul.u32 (!%p249_p9), 12, %s255_s9  ;;  %v870_v18 = vld [vmem:[%s1064_s1 + $0x18] sm:$0xff] (!%p249_p9)   ;;  %v871_v19 = vld [vmem:[%s1064_s1 + $0x48] sm:$0xff] (!%p249_p9)   ;;  %v872_v20 = vld [vmem:[%s1064_s1 + $0x20] sm:$0xff] (!%p249_p9)  }
  0x26   : > { %v873_v21 = vld [vmem:[%s1064_s1 + $0x50] sm:$0xff] (!%p249_p9)   ;;  %v874_v22 = vld [vmem:[%s1064_s1 + $0x28] sm:$0xff] (!%p249_p9)   ;;  %v875_v23 = vld [vmem:[%s1064_s1 + $0x58] sm:$0xff] (!%p249_p9)   ;;  %s1028_s24 = smul.u32 (!%p249_p9), 48, %s255_s9 }
  0x27   : > { %s257_s22 = scalar_lea.vmem (!%p249_p9), [#allocation2], %s836_s10 }
  0x28   : > { %v862_v11 = vld [vmem:[%s257_s22] sm:$0xff] (!%p249_p9)   ;;  %v863_v12 = vld [vmem:[%s257_s22 + $0x8] ss:$0 sps:$4 sm:$0xff] (!%p249_p9)   ;;  %s264_s25 = scalar_lea.vmem (!%p249_p9), [#allocation3], %s1028_s24  ;;  %s1032_s12 = scalar_lea.vmem (!%p249_p9), [#allocation4], %s1028_s24 }
  0x29   : > { %800 = vmatprep.subr.bf16.mxu0 (!%p249_p9), %v862_v11  ;;  %828 = vmatprep.subr.bf16.mxu1 (!%p249_p9), %v862_v11  ;;  %v424_v13 = vsel (!%p249_p9), %vm422_vm1, %v863_v12, 0  ;;  %v775_v24 = vld [vmem:[%s264_s25 + $0x10] sm:$0xff] (!%p249_p9)  ;;  %v555_v25 = vld [vmem:[%s264_s25] sm:$0xff] (!%p249_p9)  ;;  %v776_v29 = vld [vmem:[%s264_s25 + $0x18] sm:$0xff] (!%p249_p9) }
  0x2a   : > { %801 = vmatpush3.bf16.msra.mxu0 (!%p249_p9), %v862_v11  ;;  %830 = vmatpush3.bf16.msra.mxu1 (!%p249_p9), %v862_v11  ;;  %v777_v26 = vld [vmem:[%s264_s25 + $0x20] sm:$0xff] (!%p249_p9)  ;;  %v556_v33 = vld [vmem:[%s264_s25 + $0x8] sm:$0xff] (!%p249_p9) }
  0x2b   : > { %832 = vmatprep.subr.msk.bf16.mxu0 %vm422_vm1, %v863_v12  ;;  %833 = vmatprep.subr.msk.bf16.mxu1 %vm422_vm1, %v863_v12  ;;  %v778_v34 = vld [vmem:[%s264_s25 + $0x28] sm:$0xff]  ;;  %s783_s9 = sshll.u32 (%p954_p5), %s742_s15, 3 }
  0x2c   : > { %s615_s28 = scalar_lea.vmem (%p954_p5), %s1066_s3, %s783_s9 }
  0x2e   : > { %803 = vmatpush3.bf16.msra.mxu0 %v424_v13  ;;  %831 = vmatpush3.bf16.msra.mxu1 %v424_v13 }
  0x31   : > { %805 = vmatmul.mubr.msk.bf16.vlgmr.msra.gmra.mrb[0].mxu0 %vm385_vm0, %v866_v14  ;;  %817 = vmatmul.mubr.msk.bf16.vlgmr.msra.gmra.mrb[0].mxu1 %vm385_vm0, %v867_v15 }
  0x32   : > { %808 = vmatprep.mubr.msk.bf16.mxu0 %vm385_vm0, %v868_v16  ;;  %820 = vmatprep.mubr.msk.bf16.mxu1 %vm385_vm0, %v869_v17 }
  0x39   : > { %809 = vmatmul.mubr.msk.bf16.gmra.mrb[4].mxu0 %vm385_vm0, %v870_v18  ;;  %821 = vmatmul.mubr.msk.bf16.gmra.mrb[4].mxu1 %vm385_vm0, %v871_v19 }
  0x3a   : > { %812 = vmatprep.mubr.msk.bf16.mxu0 %vm385_vm0, %v872_v20  ;;  %824 = vmatprep.mubr.msk.bf16.mxu1 %vm385_vm0, %v873_v21 }
  0x41   : > { %813 = vmatmul.mubr.msk.bf16.gmra.mrb[8].mxu0 %vm385_vm0, %v874_v22  ;;  %825 = vmatmul.mubr.msk.bf16.gmra.mrb[8].mxu1 %vm385_vm0, %v875_v23 }
 0x104   : > { %v806_v27 = vpop.f32.mrb[0].mxu0  ;;  %v818_v28 = vpop.f32.mrb[0].mxu1 }
 0x105   : > { %v565_v30 = vmul.f32 %v806_v27, %v775_v24  ;;  %v460_v31 = vpop.f32.mrb[1].mxu0  ;;  %v508_v32 = vpop.f32.mrb[1].mxu1 }
 0x106   : > { %v563_v35 = vmul.f32 %v555_v25, %v460_v31  ;;  %v583_v36 = vmul.f32 %v777_v26, %v508_v32  ;;  %v807_v37 = vpop.f32.mrb[2].mxu0  ;;  %v819_v38 = vpop.f32.mrb[2].mxu1 }
 0x107   : > { %v566_v39 = vmul.f32 %v807_v37, %v776_v29  ;;  %v463_v40 = vpop.f32.mrb[3].mxu0  ;;  %v511_v41 = vpop.f32.mrb[3].mxu1 }
 0x108   : > { %v567_v42 = vadd.f32 %v565_v30, %v563_v35  ;;  %v564_v43 = vmul.f32 %v556_v33, %v463_v40  ;;  %v584_v44 = vmul.f32 %v778_v34, %v511_v41 }
 0x10a   : > { %v568_v45 = vadd.f32 %v566_v39, %v564_v43 }
 0x10c   : > { %v810_v46 = vpop.f32.mrb[4].mxu0  ;;  %v822_v47 = vpop.f32.mrb[4].mxu1 }
 0x10d   : > { %v594_v48 = vmul.f32 %v822_v47, %v775_v24  ;;  %v476_v49 = vpop.f32.mrb[5].mxu0  ;;  %v524_v50 = vpop.f32.mrb[5].mxu1 }
 0x10e   : > { %v569_v51 = vmul.f32 %v777_v26, %v476_v49  ;;  %v592_v52 = vmul.f32 %v555_v25, %v524_v50  ;;  %v811_v53 = vpop.f32.mrb[6].mxu0  ;;  %v823_v54 = vpop.f32.mrb[6].mxu1 }
 0x10f   : > { %v595_v55 = vmul.f32 %v823_v54, %v776_v29  ;;  %v479_v56 = vpop.f32.mrb[7].mxu0  ;;  %v527_v57 = vpop.f32.mrb[7].mxu1 }
 0x110   : > { %v571_v58 = vadd.f32 %v569_v51, %v567_v42  ;;  %v596_v59 = vadd.f32 %v594_v48, %v592_v52  ;;  %v570_v60 = vmul.f32 %v778_v34, %v479_v56  ;;  %v593_v61 = vmul.f32 %v556_v33, %v527_v57 }
 0x112   : > { %v573_v62 = vadd.f32 %v810_v46, %v571_v58  ;;  %v572_v63 = vadd.f32 %v570_v60, %v568_v45  ;;  %v597_v0 = vadd.f32 %v595_v55, %v593_v61 }
 0x114   : > { %575 = vst [vmem:[%s1032_s12] sm:$0xff] %v573_v62  ;;  %v574_v1 = vadd.f32 %v811_v53, %v572_v63  ;;  %v814_v2 = vpop.f32.mrb[8].mxu0  ;;  %v826_v3 = vpop.f32.mrb[8].mxu1 }
 0x115   : > { %v579_v4 = vmul.f32 %v814_v2, %v775_v24  ;;  %v492_v5 = vpop.f32.mrb[9].mxu0  ;;  %v540_v6 = vpop.f32.mrb[9].mxu1 }
 0x116   : > { %576 = vst [vmem:[%s1032_s12 + $0x8] sm:$0xff] %v574_v1  ;;  %v577_v7 = vmul.f32 %v555_v25, %v492_v5  ;;  %v598_v8 = vmul.f32 %v777_v26, %v540_v6  ;;  %v815_v9 = vpop.f32.mrb[10].mxu0  ;;  %v827_v10 = vpop.f32.mrb[10].mxu1 }
 0x117   : > { %v580_v11 = vmul.f32 %v815_v9, %v776_v29  ;;  %v495_v12 = vpop.f32.mrb[11].mxu0  ;;  %v543_v13 = vpop.f32.mrb[11].mxu1 }
 0x118   : > { %v581_v14 = vadd.f32 %v579_v4, %v577_v7  ;;  %v600_v15 = vadd.f32 %v598_v8, %v596_v59  ;;  %v578_v16 = vmul.f32 %v556_v33, %v495_v12  ;;  %v599_v17 = vmul.f32 %v778_v34, %v543_v13 }
 0x11a   : > { %v585_v18 = vadd.f32 %v583_v36, %v581_v14  ;;  %v602_v19 = vadd.f32 %v826_v3, %v600_v15  ;;  %v582_v20 = vadd.f32 %v580_v11, %v578_v16  ;;  %v601_v21 = vadd.f32 %v599_v17, %v597_v0  ;;  %613 = sbr.rel (!%p954_p5) target bundleno = 297 (0x129), region = 115 }
 0x11b   : > { %v653_v26 = vld [vmem:[%s1032_s12] sm:$0xff] (%p954_p5) }
 0x11c   : > { %v587_v22 = vadd.f32 %v818_v28, %v585_v18  ;;  %781 = vst [vmem:[%s1032_s12 + $0x20] sm:$0xff] %v602_v19  ;;  %v586_v23 = vadd.f32 %v584_v44, %v582_v20  ;;  %v603_v24 = vadd.f32 %v827_v10, %v601_v21  ;;  %654 = vst [vmem:[%s615_s28] sm:$0xff] (%p954_p5), %v653_v26 }
 0x11d   : > { %v655_v27 = vld [vmem:[%s1032_s12 + $0x8] sm:$0xff] (%p954_p5) }
 0x11e   : > { %779 = vst [vmem:[%s1032_s12 + $0x10] sm:$0xff] %v587_v22  ;;  %v588_v25 = vadd.f32 %v819_v38, %v586_v23  ;;  %782 = vst [vmem:[%s1032_s12 + $0x28] sm:$0xff] %v603_v24 }
 0x11f   : > { %656 = vst [vmem:[%s615_s28 + $0x28] sm:$0xff] (%p954_p5), %v655_v27 }
 0x120   : > { %780 = vst [vmem:[%s1032_s12 + $0x18] sm:$0xff] %v588_v25 }
 0x123   : > { %v661_v30 = vld [vmem:[%s1032_s12 + $0x20] sm:$0xff] }
 0x124   : > { %662 = vst [vmem:[%s615_s28 + $0xa0] sm:$0xff] %v661_v30 }
 0x125   : > { %v657_v28 = vld [vmem:[%s1032_s12 + $0x10] sm:$0xff]  ;;  %v663_v31 = vld [vmem:[%s1032_s12 + $0x28] sm:$0xff] }
 0x126   : > { %658 = vst [vmem:[%s615_s28 + $0x50] sm:$0xff] %v657_v28  ;;  %664 = vst [vmem:[%s615_s28 + $0xc8] sm:$0xff] %v663_v31 }
 0x127   : > { %v659_v29 = vld [vmem:[%s1032_s12 + $0x18] sm:$0xff] }
 0x128   : > { %660 = vst [vmem:[%s615_s28 + $0x78] sm:$0xff] %v659_v29 }
 0x129 PF: > { %p10_p10 = scmp.ge.s32.totalorder %s937_s16, 7   ;;  %s1069_s12 = smov %s894_s13 }
 0x12a   : > { %s1070_s13 = smov %s948_s19  ;;  %s1071_s14 = smov %s937_s16 }
 0x12b   :  { %12 = sbr.rel (!%p10_p10) target bundleno = 2 (0x2), region = 196 }

// kernel: smpl_regressor_forward.13
= control target key start
LH: loop header
LB: loop body
LE: loop exit
PB: predicated region body
PF: predicated region fallthrough
CT: control target
= control target key end

     0   :  { %s1449_s12 = smov 0   ;;  %s1451_s13 = smov 0   ;;  %s1802_s0 = inlined_call_operand.vmem [shape: bf16[16,224], index: 0, kind: input, shape index: {}]   ;;  %s1803_s1 = inlined_call_operand.vmem [shape: bf16[224,1920], index: 1, kind: input, shape index: {}]   ;;  %s1804_s2 = inlined_call_operand.vmem [shape: f32[1,1920], index: 2, kind: input, shape index: {}]   ;;  %s1805_s3 = inlined_call_operand.vmem [shape: f32[16,1920], index: 3, kind: output, shape index: {}]  }
   0x1   :  { %s1453_s14 = smov 0  }
   0x2 LB: > { %s1465_s15 = sadd.s32 4294967295, %s1426_s14   ;;  %s1468_s16 = sadd.s32 1, %s1426_s14   ;;  %s1426_s14 = sphi %s1453_s14, %s1809_s14   ;;  %s1422_s13 = sphi %s1451_s13, %s1808_s13   ;;  %s1418_s12 = sphi %s1449_s12, %s1807_s12  }
   0x3   : > { %s38_s17 = ssub.s32 %s1426_s14, %s1468_s16  ;;  %s41_s18 = sadd.s32 1, %s1422_s13 }
   0x4   : > { %p39_p0 = scmp.eq.s32.totalorder %s38_s17, 0  ;;  %p48_p1 = scmp.ne.s32.totalorder %s1422_s13, %s1418_s12 }
   0x5   : > { %p49_p2 = scmp.eq.s32.totalorder %s1426_s14, 0  ;;  %p104_p3 = scmp.eq.s32.totalorder %s1465_s15, 2 }
   0x6   : > { %s1478_s19 = scalar_select %p39_p0, %s1422_s13, %s41_s18  }
   0x7   : > { %p50_p4 = por %p49_p2, %p48_p1  ;;  %p1480_p5 = por %p104_p3, %p48_p1 }
   0x8   : > { %p1136_p6 = scmp.ge.s32.totalorder %s1426_s14, 3 }
   0xa   : > { %129 = sbr.rel (%p1136_p6) target bundleno = 68 (0x44), region = 20 }
  0x11   : > { %132 = sbr.rel (!%p50_p4) target bundleno = 68 (0x44), region = 24  ;;  %s134_s21 = sand.u32 (%p50_p4), 1, %s1422_s13  }
  0x12   : > { %s1273_s22 = smul.u32 (%p50_p4), 20, %s1426_s14 }
  0x13   : > { %s1275_s23 = smul.u32 (%p50_p4), 560, %s134_s21 }
  0x14   : > { %s1490_s26 = scalar_lea.vmem (%p50_p4), %s1803_s1, %s1273_s22 }
  0x15   : > { %v154_v0 = vld [vmem:[%s1490_s26] sm:$0xff] (%p50_p4)  ;;  %v156_v1 = vld [vmem:[%s1490_s26 + $0x8] sm:$0xff] (%p50_p4)  ;;  %s1495_s27 = scalar_lea.vmem (%p50_p4), [#allocation2], %s1275_s23  ;;  %v162_v4 = vld [vmem:[%s1490_s26 + $0x78] sm:$0xff] (%p50_p4) }
  0x16   : > { %v158_v2 = vld [vmem:[%s1490_s26 + $0x3c] sm:$0xff] (%p50_p4)  ;;  %155 = vst [vmem:[%s1495_s27] sm:$0xff] (%p50_p4), %v154_v0  ;;  %157 = vst [vmem:[%s1495_s27 + $0x8] sm:$0xff] (%p50_p4), %v156_v1  ;;  %v160_v3 = vld [vmem:[%s1490_s26 + $0x44] sm:$0xff] (%p50_p4) }
  0x17   : > { %159 = vst [vmem:[%s1495_s27 + $0x14] sm:$0xff] (%p50_p4), %v158_v2  ;;  %v164_v5 = vld [vmem:[%s1490_s26 + $0x80] sm:$0xff] (%p50_p4)  ;;  %161 = vst [vmem:[%s1495_s27 + $0x1c] sm:$0xff] (%p50_p4), %v160_v3  ;;  %v166_v6 = vld [vmem:[%s1490_s26 + $0xb4] sm:$0xff] (%p50_p4) }
  0x18   : > { %163 = vst [vmem:[%s1495_s27 + $0x28] sm:$0xff] %v162_v4  ;;  %165 = vst [vmem:[%s1495_s27 + $0x30] sm:$0xff] %v164_v5  ;;  %v168_v7 = vld [vmem:[%s1490_s26 + $0xbc] sm:$0xff]  ;;  %v170_v8 = vld [vmem:[%s1490_s26 + $0xf0] sm:$0xff] }
  0x19   : > { %167 = vst [vmem:[%s1495_s27 + $0x3c] sm:$0xff] %v166_v6  ;;  %169 = vst [vmem:[%s1495_s27 + $0x44] sm:$0xff] %v168_v7  ;;  %v172_v9 = vld [vmem:[%s1490_s26 + $0xf8] sm:$0xff]  ;;  %v174_v10 = vld [vmem:[%s1490_s26 + $0x12c] sm:$0xff] }
  0x1a   : > { %171 = vst [vmem:[%s1495_s27 + $0x50] sm:$0xff] %v170_v8  ;;  %v176_v11 = vld [vmem:[%s1490_s26 + $0x134] sm:$0xff]  ;;  %173 = vst [vmem:[%s1495_s27 + $0x58] sm:$0xff] %v172_v9  ;;  %v178_v12 = vld [vmem:[%s1490_s26 + $0x168] sm:$0xff] }
  0x1b   : > { %175 = vst [vmem:[%s1495_s27 + $0x64] sm:$0xff] %v174_v10  ;;  %177 = vst [vmem:[%s1495_s27 + $0x6c] sm:$0xff] %v176_v11  ;;  %v180_v13 = vld [vmem:[%s1490_s26 + $0x170] sm:$0xff]  ;;  %v182_v14 = vld [vmem:[%s1490_s26 + $0x1a4] sm:$0xff] }
  0x1c   : > { %179 = vst [vmem:[%s1495_s27 + $0x78] sm:$0xff] %v178_v12  ;;  %181 = vst [vmem:[%s1495_s27 + $0x80] sm:$0xff] %v180_v13  ;;  %v184_v15 = vld [vmem:[%s1490_s26 + $0x1ac] sm:$0xff]  ;;  %v186_v16 = vld [vmem:[%s1490_s26 + $0x1e0] sm:$0xff] }
  0x1d   : > { %183 = vst [vmem:[%s1495_s27 + $0x8c] sm:$0xff] %v182_v14  ;;  %v188_v17 = vld [vmem:[%s1490_s26 + $0x1e8] sm:$0xff]  ;;  %185 = vst [vmem:[%s1495_s27 + $0x94] sm:$0xff] %v184_v15  ;;  %v190_v18 = vld [vmem:[%s1490_s26 + $0x21c] sm:$0xff] }
  0x1e   : > { %187 = vst [vmem:[%s1495_s27 + $0xa0] sm:$0xff] %v186_v16  ;;  %189 = vst [vmem:[%s1495_s27 + $0xa8] sm:$0xff] %v188_v17  ;;  %v192_v19 = vld [vmem:[%s1490_s26 + $0x224] sm:$0xff]  ;;  %v194_v20 = vld [vmem:[%s1490_s26 + $0x258] sm:$0xff] }
  0x1f   : > { %191 = vst [vmem:[%s1495_s27 + $0xb4] sm:$0xff] %v190_v18  ;;  %193 = vst [vmem:[%s1495_s27 + $0xbc] sm:$0xff] %v192_v19  ;;  %v196_v21 = vld [vmem:[%s1490_s26 + $0x260] sm:$0xff]  ;;  %v198_v22 = vld [vmem:[%s1490_s26 + $0x294] sm:$0xff] }
  0x20   : > { %195 = vst [vmem:[%s1495_s27 + $0xc8] sm:$0xff] %v194_v20  ;;  %v200_v23 = vld [vmem:[%s1490_s26 + $0x29c] sm:$0xff]  ;;  %197 = vst [vmem:[%s1495_s27 + $0xd0] sm:$0xff] %v196_v21  ;;  %v202_v24 = vld [vmem:[%s1490_s26 + $0x2d0] sm:$0xff] }
  0x21   : > { %199 = vst [vmem:[%s1495_s27 + $0xdc] sm:$0xff] %v198_v22  ;;  %201 = vst [vmem:[%s1495_s27 + $0xe4] sm:$0xff] %v200_v23  ;;  %v204_v25 = vld [vmem:[%s1490_s26 + $0x2d8] sm:$0xff]  ;;  %v206_v26 = vld [vmem:[%s1490_s26 + $0x30c] sm:$0xff] }
  0x22   : > { %203 = vst [vmem:[%s1495_s27 + $0xf0] sm:$0xff] %v202_v24  ;;  %205 = vst [vmem:[%s1495_s27 + $0xf8] sm:$0xff] %v204_v25  ;;  %v208_v27 = vld [vmem:[%s1490_s26 + $0x314] sm:$0xff]  ;;  %v210_v28 = vld [vmem:[%s1490_s26 + $0x348] sm:$0xff] }
  0x23   : > { %207 = vst [vmem:[%s1495_s27 + $0x104] sm:$0xff] %v206_v26  ;;  %v212_v29 = vld [vmem:[%s1490_s26 + $0x350] sm:$0xff]  ;;  %209 = vst [vmem:[%s1495_s27 + $0x10c] sm:$0xff] %v208_v27  ;;  %v214_v30 = vld [vmem:[%s1490_s26 + $0x384] sm:$0xff] }
  0x24   : > { %211 = vst [vmem:[%s1495_s27 + $0x118] sm:$0xff] %v210_v28  ;;  %213 = vst [vmem:[%s1495_s27 + $0x120] sm:$0xff] %v212_v29  ;;  %v216_v31 = vld [vmem:[%s1490_s26 + $0x38c] sm:$0xff]  ;;  %v218_v32 = vld [vmem:[%s1490_s26 + $0x3c0] sm:$0xff] }
  0x25   : > { %215 = vst [vmem:[%s1495_s27 + $0x12c] sm:$0xff] %v214_v30  ;;  %217 = vst [vmem:[%s1495_s27 + $0x134] sm:$0xff] %v216_v31  ;;  %v220_v33 = vld [vmem:[%s1490_s26 + $0x3c8] sm:$0xff]  ;;  %v222_v34 = vld [vmem:[%s1490_s26 + $0x3fc] sm:$0xff] }
  0x26   : > { %219 = vst [vmem:[%s1495_s27 + $0x140] sm:$0xff] %v218_v32  ;;  %v224_v35 = vld [vmem:[%s1490_s26 + $0x404] sm:$0xff]  ;;  %221 = vst [vmem:[%s1495_s27 + $0x148] sm:$0xff] %v220_v33  ;;  %v226_v36 = vld [vmem:[%s1490_s26 + $0x438] sm:$0xff] }
  0x27   : > { %223 = vst [vmem:[%s1495_s27 + $0x154] sm:$0xff] %v222_v34  ;;  %225 = vst [vmem:[%s1495_s27 + $0x15c] sm:$0xff] %v224_v35  ;;  %v228_v37 = vld [vmem:[%s1490_s26 + $0x440] sm:$0xff]  ;;  %v230_v38 = vld [vmem:[%s1490_s26 + $0x474] sm:$0xff] }
  0x28   : > { %227 = vst [vmem:[%s1495_s27 + $0x168] sm:$0xff] %v226_v36  ;;  %229 = vst [vmem:[%s1495_s27 + $0x170] sm:$0xff] %v228_v37  ;;  %v232_v39 = vld [vmem:[%s1490_s26 + $0x47c] sm:$0xff]  ;;  %v234_v40 = vld [vmem:[%s1490_s26 + $0x4b0] sm:$0xff] }
  0x29   : > { %231 = vst [vmem:[%s1495_s27 + $0x17c] sm:$0xff] %v230_v38  ;;  %v236_v41 = vld [vmem:[%s1490_s26 + $0x4b8] sm:$0xff]  ;;  %233 = vst [vmem:[%s1495_s27 + $0x184] sm:$0xff] %v232_v39  ;;  %v238_v42 = vld [vmem:[%s1490_s26 + $0x4ec] sm:$0xff] }
  0x2a   : > { %235 = vst [vmem:[%s1495_s27 + $0x190] sm:$0xff] %v234_v40  ;;  %237 = vst [vmem:[%s1495_s27 + $0x198] sm:$0xff] %v236_v41  ;;  %v240_v43 = vld [vmem:[%s1490_s26 + $0x4f4] sm:$0xff]  ;;  %v242_v44 = vld [vmem:[%s1490_s26 + $0x528] sm:$0xff] }
  0x2b   : > { %239 = vst [vmem:[%s1495_s27 + $0x1a4] sm:$0xff] %v238_v42  ;;  %241 = vst [vmem:[%s1495_s27 + $0x1ac] sm:$0xff] %v240_v43  ;;  %v244_v45 = vld [vmem:[%s1490_s26 + $0x530] sm:$0xff]  ;;  %v246_v46 = vld [vmem:[%s1490_s26 + $0x564] sm:$0xff] }
  0x2c   : > { %243 = vst [vmem:[%s1495_s27 + $0x1b8] sm:$0xff] %v242_v44  ;;  %v248_v47 = vld [vmem:[%s1490_s26 + $0x56c] sm:$0xff]  ;;  %245 = vst [vmem:[%s1495_s27 + $0x1c0] sm:$0xff] %v244_v45  ;;  %v250_v48 = vld [vmem:[%s1490_s26 + $0x5a0] sm:$0xff] }
  0x2d   : > { %247 = vst [vmem:[%s1495_s27 + $0x1cc] sm:$0xff] %v246_v46  ;;  %249 = vst [vmem:[%s1495_s27 + $0x1d4] sm:$0xff] %v248_v47  ;;  %v252_v49 = vld [vmem:[%s1490_s26 + $0x5a8] sm:$0xff]  ;;  %v254_v50 = vld [vmem:[%s1490_s26 + $0x5dc] sm:$0xff] }
  0x2e   : > { %251 = vst [vmem:[%s1495_s27 + $0x1e0] sm:$0xff] %v250_v48  ;;  %253 = vst [vmem:[%s1495_s27 + $0x1e8] sm:$0xff] %v252_v49  ;;  %v256_v51 = vld [vmem:[%s1490_s26 + $0x5e4] sm:$0xff]  ;;  %v258_v52 = vld [vmem:[%s1490_s26 + $0x618] sm:$0xff] }
  0x2f   : > { %255 = vst [vmem:[%s1495_s27 + $0x1f4] sm:$0xff] %v254_v50  ;;  %v260_v53 = vld [vmem:[%s1490_s26 + $0x620] sm:$0xff]  ;;  %257 = vst [vmem:[%s1495_s27 + $0x1fc] sm:$0xff] %v256_v51  ;;  %v262_v54 = vld [vmem:[%s1490_s26 + $0x654] sm:$0xff] }
  0x30   : > { %259 = vst [vmem:[%s1495_s27 + $0x208] sm:$0xff] %v258_v52  ;;  %261 = vst [vmem:[%s1495_s27 + $0x210] sm:$0xff] %v260_v53  ;;  %v264_v55 = vld [vmem:[%s1490_s26 + $0x65c] sm:$0xff]  ;;  %v1138_v56 = vld [vmem:[%s1490_s26 + $0x10] sm:$0xf] }
  0x31   : > { %263 = vst [vmem:[%s1495_s27 + $0x21c] sm:$0xff] %v262_v54  ;;  %265 = vst [vmem:[%s1495_s27 + $0x224] sm:$0xff] %v264_v55  ;;  %v1140_v57 = vld [vmem:[%s1490_s26 + $0x4c] sm:$0xf]  ;;  %v1142_v58 = vld [vmem:[%s1490_s26 + $0x88] sm:$0xf] }
  0x32   : > { %1139 = vst [vmem:[%s1495_s27 + $0x10] sm:$0xf] %v1138_v56  ;;  %v1144_v59 = vld [vmem:[%s1490_s26 + $0xc4] sm:$0xf]  ;;  %1141 = vst [vmem:[%s1495_s27 + $0x24] sm:$0xf] %v1140_v57 }
  0x33   : > { %1143 = vst [vmem:[%s1495_s27 + $0x38] sm:$0xf] %v1142_v58  ;;  %1145 = vst [vmem:[%s1495_s27 + $0x4c] sm:$0xf] %v1144_v59  ;;  %v1146_v60 = vld [vmem:[%s1490_s26 + $0x100] sm:$0xf] }
  0x34   : > { %v1148_v61 = vld [vmem:[%s1490_s26 + $0x13c] sm:$0xf]  ;;  %v1150_v62 = vld [vmem:[%s1490_s26 + $0x178] sm:$0xf]  ;;  %1147 = vst [vmem:[%s1495_s27 + $0x60] sm:$0xf] %v1146_v60 }
  0x35   : > { %1149 = vst [vmem:[%s1495_s27 + $0x74] sm:$0xf] %v1148_v61  ;;  %1151 = vst [vmem:[%s1495_s27 + $0x88] sm:$0xf] %v1150_v62  ;;  %v1152_v63 = vld [vmem:[%s1490_s26 + $0x1b4] sm:$0xf] }
  0x36   : > { %v1154_v0 = vld [vmem:[%s1490_s26 + $0x1f0] sm:$0xf]  ;;  %v1156_v1 = vld [vmem:[%s1490_s26 + $0x22c] sm:$0xf]  ;;  %1153 = vst [vmem:[%s1495_s27 + $0x9c] sm:$0xf] %v1152_v63 }
  0x37   : > { %1155 = vst [vmem:[%s1495_s27 + $0xb0] sm:$0xf] %v1154_v0  ;;  %1157 = vst [vmem:[%s1495_s27 + $0xc4] sm:$0xf] %v1156_v1  ;;  %v1158_v2 = vld [vmem:[%s1490_s26 + $0x268] sm:$0xf] }
  0x38   : > { %v1160_v3 = vld [vmem:[%s1490_s26 + $0x2a4] sm:$0xf]  ;;  %v1162_v4 = vld [vmem:[%s1490_s26 + $0x2e0] sm:$0xf]  ;;  %1159 = vst [vmem:[%s1495_s27 + $0xd8] sm:$0xf] %v1158_v2 }
  0x39   : > { %1161 = vst [vmem:[%s1495_s27 + $0xec] sm:$0xf] %v1160_v3  ;;  %1163 = vst [vmem:[%s1495_s27 + $0x100] sm:$0xf] %v1162_v4  ;;  %v1164_v5 = vld [vmem:[%s1490_s26 + $0x31c] sm:$0xf] }
  0x3a   : > { %v1166_v6 = vld [vmem:[%s1490_s26 + $0x358] sm:$0xf]  ;;  %v1168_v7 = vld [vmem:[%s1490_s26 + $0x394] sm:$0xf]  ;;  %1165 = vst [vmem:[%s1495_s27 + $0x114] sm:$0xf] %v1164_v5 }
  0x3b   : > { %1167 = vst [vmem:[%s1495_s27 + $0x128] sm:$0xf] %v1166_v6  ;;  %1169 = vst [vmem:[%s1495_s27 + $0x13c] sm:$0xf] %v1168_v7  ;;  %v1170_v8 = vld [vmem:[%s1490_s26 + $0x3d0] sm:$0xf] }
  0x3c   : > { %v1172_v9 = vld [vmem:[%s1490_s26 + $0x40c] sm:$0xf]  ;;  %v1174_v10 = vld [vmem:[%s1490_s26 + $0x448] sm:$0xf]  ;;  %1171 = vst [vmem:[%s1495_s27 + $0x150] sm:$0xf] %v1170_v8 }
  0x3d   : > { %1173 = vst [vmem:[%s1495_s27 + $0x164] sm:$0xf] %v1172_v9  ;;  %1175 = vst [vmem:[%s1495_s27 + $0x178] sm:$0xf] %v1174_v10  ;;  %v1176_v11 = vld [vmem:[%s1490_s26 + $0x484] sm:$0xf] }
  0x3e   : > { %v1178_v12 = vld [vmem:[%s1490_s26 + $0x4c0] sm:$0xf]  ;;  %v1180_v13 = vld [vmem:[%s1490_s26 + $0x4fc] sm:$0xf]  ;;  %1177 = vst [vmem:[%s1495_s27 + $0x18c] sm:$0xf] %v1176_v11 }
  0x3f   : > { %1179 = vst [vmem:[%s1495_s27 + $0x1a0] sm:$0xf] %v1178_v12  ;;  %1181 = vst [vmem:[%s1495_s27 + $0x1b4] sm:$0xf] %v1180_v13  ;;  %v1182_v14 = vld [vmem:[%s1490_s26 + $0x538] sm:$0xf] }
  0x40   : > { %v1184_v15 = vld [vmem:[%s1490_s26 + $0x574] sm:$0xf]  ;;  %v1186_v16 = vld [vmem:[%s1490_s26 + $0x5b0] sm:$0xf]  ;;  %1183 = vst [vmem:[%s1495_s27 + $0x1c8] sm:$0xf] %v1182_v14 }
  0x41   : > { %1185 = vst [vmem:[%s1495_s27 + $0x1dc] sm:$0xf] %v1184_v15  ;;  %1187 = vst [vmem:[%s1495_s27 + $0x1f0] sm:$0xf] %v1186_v16  ;;  %v1188_v17 = vld [vmem:[%s1490_s26 + $0x5ec] sm:$0xf] }
  0x42   : > { %v1190_v18 = vld [vmem:[%s1490_s26 + $0x628] sm:$0xf]  ;;  %v1192_v19 = vld [vmem:[%s1490_s26 + $0x664] sm:$0xf]  ;;  %1189 = vst [vmem:[%s1495_s27 + $0x204] sm:$0xf] %v1188_v17 }
  0x43   : > { %1191 = vst [vmem:[%s1495_s27 + $0x218] sm:$0xf] %v1190_v18  ;;  %1193 = vst [vmem:[%s1495_s27 + $0x22c] sm:$0xf] %v1192_v19 }
  0x44 PF: > { %p1194_p7 = scmp.ge.s32.totalorder %s1426_s14, 1  ;;  %p341_p8 = scmp.lt.s32.totalorder %s1426_s14, 4 }
  0x46   : > { %p342_p9 = pnand %p1194_p7, %p341_p8 }
  0x47   : > { %s348_s28 = sand.u32 (!%p342_p9), 1, %s1418_s12   ;;  %v1668_v20 = vld [vmem:[%s1802_s0 + $0x4] ss:$8 sps:$4 sm:$0xff] (!%p342_p9)   ;;  %vm842_vm0 = vcmask (!%p342_p9), 785408   ;;  %v1728_v4 = vld [vmem:[%s1802_s0] ss:$8 sps:$4 sm:$0xff] (!%p342_p9)  }
  0x48   : > { %345 = sbr.rel (%p342_p9) target bundleno = 414 (0x19e), region = 54  ;;  %1267 = vmatprep.mubr.msk.bf16.mxu0 (!%p342_p9), %vm842_vm0, %v1668_v20  ;;  %1268 = vmatprep.mubr.msk.bf16.mxu1 (!%p342_p9), %vm842_vm0, %v1668_v20  ;;  %v1428_v8 = vmov (!%p342_p9), 0  }
  0x49   : > { %s1276_s4 = smul.u32 (!%p342_p9), 560, %s348_s28 }
  0x4a   : > { %s375_s8 = smul.u32 (!%p342_p9), 5, %s1465_s15 }
  0x4b   : > { %s1676_s5 = scalar_lea.vmem (!%p342_p9), [#allocation2], %s1276_s4  ;;  %s1277_s14 = smul.u32 (!%p342_p9), 80, %s348_s28 }
  0x4c   : > { %v1303_v21 = vld [vmem:[%s1676_s5 + $0x4] ss:$20 sps:$4 sm:$0xff] (!%p342_p9)   ;;  %v1305_v22 = vld [vmem:[%s1676_s5] ss:$20 sps:$4 sm:$0xff] (!%p342_p9)   ;;  %v1308_v24 = vld [vmem:[%s1676_s5 + $0x28] ss:$20 sps:$4 sm:$0xff] (!%p342_p9)  }
  0x4d   : > { %846 = vmatprep.subr.bf16.mxu0 (!%p342_p9), %v1303_v21  ;;  %v1306_v23 = vld [vmem:[%s1676_s5 + $0x2c] ss:$20 sps:$4 sm:$0xff] (!%p342_p9)   ;;  %v1309_v25 = vld [vmem:[%s1676_s5 + $0x54] ss:$20 sps:$4 sm:$0xff] (!%p342_p9)   ;;  %v1311_v26 = vld [vmem:[%s1676_s5 + $0x50] ss:$20 sps:$4 sm:$0xff] (!%p342_p9)  }
  0x4e   : > { %847 = vmatpush1.bf16.msra.mxu0 (!%p342_p9), %v1305_v22  ;;  %v1312_v27 = vld [vmem:[%s1676_s5 + $0x7c] ss:$20 sps:$4 sm:$0xff] (!%p342_p9)   ;;  %v1314_v28 = vld [vmem:[%s1676_s5 + $0x78] ss:$20 sps:$4 sm:$0xff] (!%p342_p9)   ;;  %v1317_v30 = vld [vmem:[%s1676_s5 + $0xa0] ss:$20 sps:$4 sm:$0xff] (!%p342_p9)  }
  0x4f   : > { %848 = vmatprep.subr.bf16.mxu0 %v1306_v23  ;;  %v1315_v29 = vld [vmem:[%s1676_s5 + $0xa4] ss:$20 sps:$4 sm:$0xff]   ;;  %v1318_v31 = vld [vmem:[%s1676_s5 + $0xcc] ss:$20 sps:$4 sm:$0xff]   ;;  %v1320_v32 = vld [vmem:[%s1676_s5 + $0xc8] ss:$20 sps:$4 sm:$0xff]  }
  0x50   : > { %v1321_v33 = vld [vmem:[%s1676_s5 + $0xf4] ss:$20 sps:$4 sm:$0xff]   ;;  %v1344_v34 = vld [vmem:[%s1676_s5 + $0xc] ss:$20 sps:$4 sm:$0xff]   ;;  %v1353_v37 = vld [vmem:[%s1676_s5 + $0x30] ss:$20 sps:$4 sm:$0xff]  }
  0x51   : > { %v1347_v35 = vld [vmem:[%s1676_s5 + $0x8] ss:$20 sps:$4 sm:$0xff]   ;;  %889 = vmatprep.subr.bf16.mxu1 %v1344_v34  ;;  %v1323_v38 = vld [vmem:[%s1676_s5 + $0xf0] ss:$20 sps:$4 sm:$0xff]   ;;  %v1326_v41 = vld [vmem:[%s1676_s5 + $0x118] ss:$20 sps:$4 sm:$0xff]  }
  0x52   : > { %849 = vmatpush1.bf16.msra.mxu0 %v1308_v24  ;;  %v1351_v36 = vld [vmem:[%s1676_s5 + $0x34] ss:$20 sps:$4 sm:$0xff]   ;;  %890 = vmatpush1.bf16.msra.mxu1 %v1347_v35  ;;  %v1355_v39 = vld [vmem:[%s1676_s5 + $0x5c] ss:$20 sps:$4 sm:$0xff]   ;;  %v1357_v42 = vld [vmem:[%s1676_s5 + $0x58] ss:$20 sps:$4 sm:$0xff]  }
  0x53   : > { %850 = vmatprep.subr.bf16.mxu0 %v1309_v25  ;;  %891 = vmatprep.subr.bf16.mxu1 %v1351_v36  ;;  %v1324_v40 = vld [vmem:[%s1676_s5 + $0x11c] ss:$20 sps:$4 sm:$0xff]   ;;  %v1359_v43 = vld [vmem:[%s1676_s5 + $0x84] ss:$20 sps:$4 sm:$0xff]   ;;  %v1329_v45 = vld [vmem:[%s1676_s5 + $0x140] ss:$20 sps:$4 sm:$0xff]  }
  0x54   : > { %v1327_v44 = vld [vmem:[%s1676_s5 + $0x144] ss:$20 sps:$4 sm:$0xff]   ;;  %v1361_v46 = vld [vmem:[%s1676_s5 + $0x80] ss:$20 sps:$4 sm:$0xff]   ;;  %v1332_v49 = vld [vmem:[%s1676_s5 + $0x168] ss:$20 sps:$4 sm:$0xff]  }
  0x55   : > { %v1363_v47 = vld [vmem:[%s1676_s5 + $0xac] ss:$20 sps:$4 sm:$0xff]   ;;  %v1365_v50 = vld [vmem:[%s1676_s5 + $0xa8] ss:$20 sps:$4 sm:$0xff]   ;;  %v1369_v53 = vld [vmem:[%s1676_s5 + $0xd0] ss:$20 sps:$4 sm:$0xff]  }
  0x56   : > { %851 = vmatpush1.bf16.msra.mxu0 %v1311_v26  ;;  %892 = vmatpush1.bf16.msra.mxu1 %v1353_v37  ;;  %v1330_v48 = vld [vmem:[%s1676_s5 + $0x16c] ss:$20 sps:$4 sm:$0xff]   ;;  %v1367_v51 = vld [vmem:[%s1676_s5 + $0xd4] ss:$20 sps:$4 sm:$0xff]   ;;  %v1335_v54 = vld [vmem:[%s1676_s5 + $0x190] ss:$20 sps:$4 sm:$0xff]  }
  0x57   : > { %852 = vmatprep.subr.bf16.mxu0 %v1312_v27  ;;  %893 = vmatprep.subr.bf16.mxu1 %v1355_v39  ;;  %v1333_v52 = vld [vmem:[%s1676_s5 + $0x194] ss:$20 sps:$4 sm:$0xff]   ;;  %v1371_v55 = vld [vmem:[%s1676_s5 + $0xfc] ss:$20 sps:$4 sm:$0xff]   ;;  %v1338_v57 = vld [vmem:[%s1676_s5 + $0x1b8] ss:$20 sps:$4 sm:$0xff]  }
  0x58   : > { %v1336_v56 = vld [vmem:[%s1676_s5 + $0x1bc] ss:$20 sps:$4 sm:$0xff]   ;;  %v1373_v58 = vld [vmem:[%s1676_s5 + $0xf8] ss:$20 sps:$4 sm:$0xff]   ;;  %v1341_v61 = vld [vmem:[%s1676_s5 + $0x1e0] ss:$20 sps:$4 sm:$0xff]  }
  0x59   : > { %v1375_v59 = vld [vmem:[%s1676_s5 + $0x124] ss:$20 sps:$4 sm:$0xff]   ;;  %v1377_v62 = vld [vmem:[%s1676_s5 + $0x120] ss:$20 sps:$4 sm:$0xff]   ;;  %v1381_v1 = vld [vmem:[%s1676_s5 + $0x148] ss:$20 sps:$4 sm:$0xff]  }
  0x5a   : > { %853 = vmatpush1.bf16.msra.mxu0 %v1314_v28  ;;  %894 = vmatpush1.bf16.msra.mxu1 %v1357_v42  ;;  %v1339_v60 = vld [vmem:[%s1676_s5 + $0x1e4] ss:$20 sps:$4 sm:$0xff]   ;;  %v1379_v63 = vld [vmem:[%s1676_s5 + $0x14c] ss:$20 sps:$4 sm:$0xff]   ;;  %v1346_v2 = vld [vmem:[%s1676_s5 + $0x208] ss:$20 sps:$4 sm:$0xff]  }
  0x5b   : > { %854 = vmatprep.subr.bf16.mxu0 %v1315_v29  ;;  %895 = vmatprep.subr.bf16.mxu1 %v1359_v43  ;;  %v1342_v0 = vld [vmem:[%s1676_s5 + $0x20c] ss:$20 sps:$4 sm:$0xff]   ;;  %v1383_v3 = vld [vmem:[%s1676_s5 + $0x174] ss:$20 sps:$4 sm:$0xff]   ;;  %v1385_v5 = vld [vmem:[%s1676_s5 + $0x170] ss:$20 sps:$4 sm:$0xff]   ;;  %v974_v29 = vlaneseq }
  0x5c   : > { %v1354_v6 = vld [vmem:[%s1676_s5 + $0x10] ss:$20 sps:$4 sm:$0xff]   ;;  %v1389_v9 = vld [vmem:[%s1676_s5 + $0x198] ss:$20 sps:$4 sm:$0xff]   ;;  %v1393_v12 = vld [vmem:[%s1676_s5 + $0x1c0] ss:$20 sps:$4 sm:$0xff]  }
  0x5d   : > { %v1387_v7 = vld [vmem:[%s1676_s5 + $0x19c] ss:$20 sps:$4 sm:$0xff]   ;;  %v1358_v10 = vld [vmem:[%s1676_s5 + $0x38] ss:$20 sps:$4 sm:$0xff]   ;;  %v1362_v13 = vld [vmem:[%s1676_s5 + $0x60] ss:$20 sps:$4 sm:$0xff]  }
  0x5e   : > { %855 = vmatpush1.bf16.msra.mxu0 %v1317_v30  ;;  %896 = vmatpush1.bf16.msra.mxu1 %v1361_v46  ;;  %v1391_v11 = vld [vmem:[%s1676_s5 + $0x1c4] ss:$20 sps:$4 sm:$0xff]   ;;  %v1395_v14 = vld [vmem:[%s1676_s5 + $0x1ec] ss:$20 sps:$4 sm:$0xff]   ;;  %v1397_v15 = vld [vmem:[%s1676_s5 + $0x1e8] ss:$20 sps:$4 sm:$0xff]  }
  0x5f   : > { %856 = vmatprep.subr.bf16.mxu0 %v1318_v31  ;;  %897 = vmatprep.subr.bf16.mxu1 %v1363_v47  ;;  %v1366_v16 = vld [vmem:[%s1676_s5 + $0x88] ss:$20 sps:$4 sm:$0xff]   ;;  %v1401_v18 = vld [vmem:[%s1676_s5 + $0x210] ss:$20 sps:$4 sm:$0xff]   ;;  %v1378_v21 = vld [vmem:[%s1676_s5 + $0x100] ss:$20 sps:$4 sm:$0xff]  }
  0x60   : > { %v1399_v17 = vld [vmem:[%s1676_s5 + $0x214] ss:$20 sps:$4 sm:$0xff]   ;;  %v1370_v19 = vld [vmem:[%s1676_s5 + $0xb0] ss:$20 sps:$4 sm:$0xff]   ;;  %v1390_v24 = vld [vmem:[%s1676_s5 + $0x178] ss:$20 sps:$4 sm:$0xff]  }
  0x61   : > { %v1382_v22 = vld [vmem:[%s1676_s5 + $0x128] ss:$20 sps:$4 sm:$0xff]   ;;  %v1386_v23 = vld [vmem:[%s1676_s5 + $0x150] ss:$20 sps:$4 sm:$0xff]   ;;  %v1394_v25 = vld [vmem:[%s1676_s5 + $0x1a0] ss:$20 sps:$4 sm:$0xff]  }
  0x62   : > { %857 = vmatpush1.bf16.msra.mxu0 %v1320_v32  ;;  %898 = vmatpush1.bf16.msra.mxu1 %v1365_v50  ;;  %v1398_v26 = vld [vmem:[%s1676_s5 + $0x1c8] ss:$20 sps:$4 sm:$0xff]   ;;  %v1402_v27 = vld [vmem:[%s1676_s5 + $0x1f0] ss:$20 sps:$4 sm:$0xff]   ;;  %v1403_v28 = vld [vmem:[%s1676_s5 + $0x218] ss:$20 sps:$4 sm:$0xff]  }
  0x63   : > { %858 = vmatprep.subr.bf16.mxu0 %v1321_v33  ;;  %899 = vmatprep.subr.bf16.mxu1 %v1367_v51  ;;  %p376_p10 = scmp.lt.s32.totalorder %s375_s8, 14  ;;  %v975_v30 = vshrl.u32 %v974_v29, 7  ;;  %s1764_s17 = scalar_lea.vmem [#allocation3], %s1277_s14 }
  0x64   : > { %s1274_s12 = smul.u32 (%p1480_p5), 40, %s1465_s15 }
  0x65   : > { %s1811_s8 = smov (!%p376_p10, %s375_s8), 14  ;;  %v976_v31 = vsub.s32 0, %v975_v30  ;;  %v980_v33 = vsub.s32 1, %v975_v30 }
  0x66   : > { %859 = vmatpush1.bf16.msra.mxu0 %v1323_v38  ;;  %900 = vmatpush1.bf16.msra.mxu1 %v1369_v53  ;;  %s378_s11 = scalar_lea.vmem %s1804_s2, %s1811_s8  ;;  %s1028_s21 = scalar_lea.vmem (%p1480_p5), %s1805_s3, %s1274_s12 }
  0x67   : > { %860 = vmatprep.subr.bf16.mxu0 %v1324_v40  ;;  %901 = vmatprep.subr.bf16.mxu1 %v1371_v55  ;;  %v382_v32 = vld [vmem:[%s378_s11] sm:$0x1f] }
  0x68   : > { %v977_v34 = vrot.slane %v382_v32, %v976_v31  ;;  %v981_v35 = vrot.slane %v382_v32, %v980_v33 }
  0x6a   : > { %861 = vmatpush1.bf16.msra.mxu0 %v1326_v41  ;;  %902 = vmatpush1.bf16.msra.mxu1 %v1373_v58 }
  0x6b   : > { %862 = vmatprep.subr.bf16.mxu0 %v1327_v44  ;;  %903 = vmatprep.subr.bf16.mxu1 %v1375_v59  ;;  %v984_v44 = vsub.s32 2, %v975_v30 }
  0x6d   : > { %v985_v46 = vrot.slane %v382_v32, %v984_v44 }
  0x6e   : > { %863 = vmatpush1.bf16.msra.mxu0 %v1329_v45  ;;  %904 = vmatpush1.bf16.msra.mxu1 %v1377_v62  ;;  %v988_v45 = vsub.s32 3, %v975_v30 }
  0x6f   : > { %864 = vmatprep.subr.bf16.mxu0 %v1330_v48  ;;  %905 = vmatprep.subr.bf16.mxu1 %v1379_v63 }
  0x70   : > { %v989_v47 = vrot.slane %v382_v32, %v988_v45 }
  0x72   : > { %865 = vmatpush1.bf16.msra.mxu0 %v1332_v49  ;;  %906 = vmatpush1.bf16.msra.mxu1 %v1381_v1 }
  0x73   : > { %866 = vmatprep.subr.bf16.mxu0 %v1333_v52  ;;  %907 = vmatprep.subr.bf16.mxu1 %v1383_v3 }
  0x76   : > { %867 = vmatpush1.bf16.msra.mxu0 %v1335_v54  ;;  %908 = vmatpush1.bf16.msra.mxu1 %v1385_v5 }
  0x77   : > { %868 = vmatprep.subr.bf16.mxu0 %v1336_v56  ;;  %909 = vmatprep.subr.bf16.mxu1 %v1387_v7  ;;  %v992_v56 = vsub.s32 4, %v975_v30 }
  0x7a   : > { %869 = vmatpush1.bf16.msra.mxu0 %v1338_v57  ;;  %910 = vmatpush1.bf16.msra.mxu1 %v1389_v9  ;;  %v993_v57 = vrot.slane %v382_v32, %v992_v56 }
  0x7b   : > { %870 = vmatprep.subr.bf16.mxu0 %v1339_v60  ;;  %911 = vmatprep.subr.bf16.mxu1 %v1391_v11 }
  0x7e   : > { %871 = vmatpush1.bf16.msra.mxu0 %v1341_v61  ;;  %912 = vmatpush1.bf16.msra.mxu1 %v1393_v12 }
  0x7f   : > { %872 = vmatprep.subr.bf16.mxu0 %v1342_v0  ;;  %913 = vmatprep.subr.bf16.mxu1 %v1395_v14 }
  0x82   : > { %873 = vmatpush1.bf16.msra.mxu0 %v1346_v2  ;;  %914 = vmatpush1.bf16.msra.mxu1 %v1397_v15 }
  0x83   : > { %932 = vmatprep.subr.bf16.mxu0 %v1428_v8  ;;  %915 = vmatprep.subr.bf16.mxu1 %v1399_v17 }
  0x85   : > { %879 = vmatmul.mubr.bf16.vlgmr.msra.gmra.mrb[0].mxu0 %v1728_v4 }
  0x86   : > { %933 = vmatpush1.bf16.msra.mxu0 %v1354_v6  ;;  %1269 = vmatprep.mubr.msk.bf16.mxu0 %vm842_vm0, %v1668_v20  ;;  %v1374_v20 = vld [vmem:[%s1676_s5 + $0xd8] ss:$20 sps:$4 sm:$0xff]  }
  0x87   : > { %934 = vmatprep.subr.bf16.mxu0 %v1428_v8  ;;  %916 = vmatpush1.bf16.msra.mxu1 %v1401_v18 }
  0x8a   : > { %935 = vmatpush1.bf16.msra.mxu0 %v1358_v10  ;;  %922 = vmatmul.mubr.bf16.vlgmr.msra.gmra.mrb[0].mxu1 %v1728_v4 }
  0x8b   : > { %936 = vmatprep.subr.bf16.mxu0 %v1428_v8 }
  0x8e   : > { %937 = vmatpush1.bf16.msra.mxu0 %v1362_v13 }
  0x8f   : > { %938 = vmatprep.subr.bf16.mxu0 %v1428_v8 }
  0x92   : > { %939 = vmatpush1.bf16.msra.mxu0 %v1366_v16 }
  0x93   : > { %940 = vmatprep.subr.bf16.mxu0 %v1428_v8 }
  0x96   : > { %941 = vmatpush1.bf16.msra.mxu0 %v1370_v19 }
  0x97   : > { %942 = vmatprep.subr.bf16.mxu0 %v1428_v8 }
  0x9a   : > { %943 = vmatpush1.bf16.msra.mxu0 %v1374_v20 }
  0x9b   : > { %944 = vmatprep.subr.bf16.mxu0 %v1428_v8 }
  0x9e   : > { %945 = vmatpush1.bf16.msra.mxu0 %v1378_v21 }
  0x9f   : > { %946 = vmatprep.subr.bf16.mxu0 %v1428_v8 }
  0xa2   : > { %947 = vmatpush1.bf16.msra.mxu0 %v1382_v22 }
  0xa3   : > { %948 = vmatprep.subr.bf16.mxu0 %v1428_v8 }
  0xa6   : > { %949 = vmatpush1.bf16.msra.mxu0 %v1386_v23 }
  0xa7   : > { %950 = vmatprep.subr.bf16.mxu0 %v1428_v8 }
  0xaa   : > { %951 = vmatpush1.bf16.msra.mxu0 %v1390_v24 }
  0xab   : > { %952 = vmatprep.subr.bf16.mxu0 %v1428_v8 }
  0xae   : > { %953 = vmatpush1.bf16.msra.mxu0 %v1394_v25 }
  0xaf   : > { %954 = vmatprep.subr.bf16.mxu0 %v1428_v8 }
  0xb2   : > { %955 = vmatpush1.bf16.msra.mxu0 %v1398_v26 }
  0xb3   : > { %956 = vmatprep.subr.bf16.mxu0 %v1428_v8 }
  0xb6   : > { %957 = vmatpush1.bf16.msra.mxu0 %v1402_v27 }
  0xb7   : > { %958 = vmatprep.subr.bf16.mxu0 %v1428_v8 }
  0xba   : > { %959 = vmatpush1.bf16.msra.mxu0 %v1403_v28 }
  0xbd   : > { %965 = vmatmul.mubr.bf16.vlgmr.msra.gmra.mrb[4].mxu0 %v1728_v4 }
 0x158   : > { %v880_v36 = vpop.f32.mrb[0].mxu0 }
 0x159   : > { %v999_v37 = vadd.f32 %v977_v34, %v880_v36  ;;  %v882_v38 = vpop.f32.mrb[1].mxu0 }
 0x15a   : > { %v1000_v39 = vadd.f32 %v981_v35, %v882_v38  ;;  %v884_v40 = vpop.f32.mrb[2].mxu0 }
 0x15b   : > { %1009 = vst [vmem:[%s1764_s17] sm:$0xff] %v999_v37  ;;  %v1004_v41 = vadd.f32 %v977_v34, %v884_v40  ;;  %v886_v42 = vpop.f32.mrb[3].mxu0 }
 0x15c   : > { %1010 = vst [vmem:[%s1764_s17 + $0x8] sm:$0xff] %v1000_v39  ;;  %v1005_v43 = vadd.f32 %v981_v35, %v886_v42 }
 0x15d   : > { %1014 = vst [vmem:[%s1764_s17 + $0x28] sm:$0xff] %v1004_v41  ;;  %v923_v48 = vpop.f32.mrb[0].mxu1 }
 0x15e   : > { %1015 = vst [vmem:[%s1764_s17 + $0x30] sm:$0xff] %v1005_v43  ;;  %v1001_v49 = vadd.f32 %v985_v46, %v923_v48  ;;  %v925_v50 = vpop.f32.mrb[1].mxu1 }
 0x15f   : > { %v1002_v51 = vadd.f32 %v989_v47, %v925_v50  ;;  %v927_v52 = vpop.f32.mrb[2].mxu1 }
 0x160   : > { %1011 = vst [vmem:[%s1764_s17 + $0x10] sm:$0xff] %v1001_v49  ;;  %v1006_v53 = vadd.f32 %v985_v46, %v927_v52  ;;  %v929_v54 = vpop.f32.mrb[3].mxu1 }
 0x161   : > { %1012 = vst [vmem:[%s1764_s17 + $0x18] sm:$0xff] %v1002_v51  ;;  %v1007_v55 = vadd.f32 %v989_v47, %v929_v54 }
 0x162   : > { %1016 = vst [vmem:[%s1764_s17 + $0x38] sm:$0xff] %v1006_v53  ;;  %v1041_v0 = vld [vmem:[%s1764_s17] sm:$0xff] (%p1480_p5) }
 0x163   : > { %1017 = vst [vmem:[%s1764_s17 + $0x40] sm:$0xff] %v1007_v55  ;;  %v1043_v1 = vld [vmem:[%s1764_s17 + $0x8] sm:$0xff] (%p1480_p5)  ;;  %1042 = vst [vmem:[%s1028_s21] sm:$0xff] (%p1480_p5), %v1041_v0 }
 0x164   : > { %v1051_v5 = vld [vmem:[%s1764_s17 + $0x28] sm:$0xff] (%p1480_p5)  ;;  %1044 = vst [vmem:[%s1028_s21 + $0x8] sm:$0xff] (%p1480_p5), %v1043_v1 }
 0x165   : > { %v1053_v6 = vld [vmem:[%s1764_s17 + $0x30] sm:$0xff] (%p1480_p5)  ;;  %1052 = vst [vmem:[%s1028_s21 + $0x78] sm:$0xff] (%p1480_p5), %v1051_v5 }
 0x166   : > { %1054 = vst [vmem:[%s1028_s21 + $0x80] sm:$0xff] (%p1480_p5), %v1053_v6 }
 0x167   : > { %v1045_v2 = vld [vmem:[%s1764_s17 + $0x10] sm:$0xff] (%p1480_p5) }
 0x168   : > { %v1047_v3 = vld [vmem:[%s1764_s17 + $0x18] sm:$0xff] (%p1480_p5)  ;;  %1046 = vst [vmem:[%s1028_s21 + $0x10] sm:$0xff] (%p1480_p5), %v1045_v2 }
 0x169   : > { %v1055_v7 = vld [vmem:[%s1764_s17 + $0x38] sm:$0xff] (%p1480_p5)  ;;  %1048 = vst [vmem:[%s1028_s21 + $0x18] sm:$0xff] (%p1480_p5), %v1047_v3 }
 0x16a   : > { %v1057_v8 = vld [vmem:[%s1764_s17 + $0x40] sm:$0xff] (%p1480_p5)  ;;  %1056 = vst [vmem:[%s1028_s21 + $0x88] sm:$0xff] (%p1480_p5), %v1055_v7 }
 0x16b   : > { %1058 = vst [vmem:[%s1028_s21 + $0x90] sm:$0xff] (%p1480_p5), %v1057_v8 }
 0x18f   : > { %1025 = sbr.rel (!%p1480_p5) target bundleno = 414 (0x19e), region = 62 }
 0x190   : > { %v966_v58 = vpop.f32.mrb[4].mxu0 }
 0x191   : > { %v1003_v59 = vadd.f32 %v993_v57, %v966_v58  ;;  %v968_v60 = vpop.f32.mrb[5].mxu0 }
 0x192   : > { %v969_v61 = vpop.f32.mrb[6].mxu0 }
 0x193   : > { %1013 = vst [vmem:[%s1764_s17 + $0x20] sm:$0xff] %v1003_v59  ;;  %v1008_v62 = vadd.f32 %v993_v57, %v969_v61  ;;  %v971_v63 = vpop.f32.mrb[7].mxu0 }
 0x195   : > { %1018 = vst [vmem:[%s1764_s17 + $0x48] sm:$0xff] %v1008_v62 }
 0x19a   : > { %v1049_v4 = vld [vmem:[%s1764_s17 + $0x20] sm:$0xff] }
 0x19b   : > { %1050 = vst [vmem:[%s1028_s21 + $0x20] sm:$0xff] %v1049_v4 }
 0x19c   : > { %v1059_v9 = vld [vmem:[%s1764_s17 + $0x48] sm:$0xff] }
 0x19d   : > { %1060 = vst [vmem:[%s1028_s21 + $0x98] sm:$0xff] %v1059_v9 }
 0x19e PF: > { %p10_p11 = scmp.ge.s32.totalorder %s1468_s16, 5   ;;  %s1807_s12 = smov %s1422_s13 }
 0x19f   : > { %s1808_s13 = smov %s1478_s19  ;;  %s1809_s14 = smov %s1468_s16 }
 0x1a0   :  { %12 = sbr.rel (!%p10_p11) target bundleno = 2 (0x2), region = 125 }

</bundles_post_ra>
